<compile_context>
chip_gen: v5e
topology: v5e:2x2
jax: 0.10.0
libtpu: 0.0.40
codegen_flags: <defaults>
</compile_context>

<pallas_src>
import jax
import jax.numpy as jnp
from jax.experimental import pallas as pl
from jax.experimental.pallas import tpu as pltpu

D_MODEL = 32
NHEAD = 4
HEAD_DIM = D_MODEL // NHEAD
NUM_LAYERS = 2
NUM_CLASSES = 4
DIM_FF = 2048          # nn.TransformerEncoderLayer default dim_feedforward
VOCAB = 30522
EPS = 1e-5
C_PAD = 128            # fc output padded to one full lane width (lane-dense store)


# ----------------------------------------------------------------------------- fused kernel

def fused_forward_kernel(emb_ref,
                         w_in_ref, wo_ref, w1_ref, w2t_ref,
                         p_ref,                      # packed per-layer small params (8, DIM_FF)
                         wfc_ref, bfc_ref,
                         o_ref, h_scr):
    layer = pl.program_id(0)

    # ---- prologue: EmbeddingBag output becomes the resident activation ----
    @pl.when(layer == 0)
    def _():
        h_scr[...] = emb_ref[...]

    x = h_scr[...]                                        # (S, D) f32
    x16 = x.astype(jnp.bfloat16)

    # ---- unpack the per-layer param slab (static slices, 1 DMA per layer) ----
    bf1  = p_ref[0:1, :]                                  # (1, DIM_FF)
    b_in = p_ref[1:2, 0:3 * D_MODEL]                      # (1, 3D)  (q part pre-scaled)
    bo   = p_ref[2:3, 0:D_MODEL]                          # (1, D)
    g1   = p_ref[3:4, 0:D_MODEL]
    be1  = p_ref[4:5, 0:D_MODEL]
    g2   = p_ref[5:6, 0:D_MODEL]
    be2  = p_ref[6:7, 0:D_MODEL]
    bf2  = p_ref[7:8, 0:D_MODEL]

    # ---- fused QKV projection: one bf16 MXU matmul, f32 accumulate ----
    qkv = jnp.dot(x16, w_in_ref[...],
                  preferred_element_type=jnp.float32) + b_in          # (S, 3D) f32

    # ---- per-head attention (K/N = 8 dots stay f32; softmax stats f32) ----
    ctxs = []
    for h in range(NHEAD):                                # static unroll over heads
        q = qkv[:, h * HEAD_DIM:(h + 1) * HEAD_DIM]                     # (S, hd)
        k = qkv[:, D_MODEL + h * HEAD_DIM:D_MODEL + (h + 1) * HEAD_DIM]
        v = qkv[:, 2 * D_MODEL + h * HEAD_DIM:2 * D_MODEL + (h + 1) * HEAD_DIM]
        s = jax.lax.dot_general(q, k, (((1,), (1,)), ((), ())),
                                preferred_element_type=jnp.float32)     # (S, S)
        s = s - jnp.max(s, axis=-1, keepdims=True)
        p = jnp.exp(s)
        p = p * pl.reciprocal(jnp.sum(p, axis=-1, keepdims=True), approx=True)
        ctxs.append(jnp.dot(p, v, preferred_element_type=jnp.float32))  # (S, hd)

    # ---- fused output projection: one (S,D)@(D,D) bf16 matmul ----
    ctx_all = jnp.concatenate(ctxs, axis=-1).astype(jnp.bfloat16)       # (S, D)
    attn = jnp.dot(ctx_all, wo_ref[...],
                   preferred_element_type=jnp.float32) + bo             # (S, D)

    # ---- residual + LayerNorm 1 (post-norm, f32 stats) ----
    h1 = x + attn
    mu = jnp.mean(h1, axis=-1, keepdims=True)
    var = jnp.mean((h1 - mu) ** 2, axis=-1, keepdims=True)
    h1 = (h1 - mu) * jax.lax.rsqrt(var + EPS) * g1 + be1

    # ---- feed-forward: relu(h1 @ W1 + b1) @ W2 + b2 (bf16 MXU operands, f32 accumulate) ----
    f = jnp.dot(h1.astype(jnp.bfloat16), w1_ref[...],
                preferred_element_type=jnp.float32) + bf1               # (S, DIM_FF)
    f = jnp.maximum(f, 0.0)
    # W2 stored transposed (D, DIM_FF); contract the DIM_FF (lane) dims of both operands.
    f = jax.lax.dot_general(f.astype(jnp.bfloat16), w2t_ref[...],
                            (((1,), (1,)), ((), ())),
                            preferred_element_type=jnp.float32) + bf2   # (S, D)

    # ---- residual + LayerNorm 2 -> resident activation for the next layer ----
    h2 = h1 + f
    mu2 = jnp.mean(h2, axis=-1, keepdims=True)
    var2 = jnp.mean((h2 - mu2) ** 2, axis=-1, keepdims=True)
    h_scr[...] = (h2 - mu2) * jax.lax.rsqrt(var2 + EPS) * g2 + be2

    # ---- epilogue: x.mean(dim=1) -> fc, written once as a lane-dense (8, 128) slab ----
    @pl.when(layer == pl.num_programs(0) - 1)
    def _():
        m = jnp.mean(h_scr[...], axis=1, keepdims=True)                  # (S, 1), S == D
        o = jax.lax.dot_general(m, wfc_ref[...], (((0,), (0,)), ((), ())),
                                preferred_element_type=jnp.float32)      # (1, C_PAD)
        o = o + bfc_ref[...]
        o_ref[...] = jnp.broadcast_to(o, o_ref.shape)


# ----------------------------------------------------------------------------- params / wrapper

def init_params(key):
    keys = iter(jax.random.split(key, 32))

    def nrm(shape, scale=0.02):
        return scale * jax.random.normal(next(keys), shape, dtype=jnp.float32)

    L, D = NUM_LAYERS, D_MODEL
    scale = 1.0 / (HEAD_DIM ** 0.5)

    # packed in-projection: columns [0:D)=Q, [D:2D)=K, [2D:3D)=V;  y = x @ W_in + b_in
    w_in = nrm((L, D, 3 * D))
    b_in = nrm((L, 1, 3 * D))
    # fold 1/sqrt(head_dim) into the Q columns (one-time host-side preprocessing)
    w_in = w_in.at[:, :, :D].multiply(scale)
    b_in = b_in.at[:, :, :D].multiply(scale)

    wo = nrm((L, D, D))
    bo = nrm((L, 1, D))
    g1 = jnp.ones((L, 1, D), jnp.float32); be1 = jnp.zeros((L, 1, D), jnp.float32)
    g2 = jnp.ones((L, 1, D), jnp.float32); be2 = jnp.zeros((L, 1, D), jnp.float32)
    w1 = nrm((L, D, DIM_FF));  bf1 = nrm((L, 1, DIM_FF))
    w2t = nrm((L, D, DIM_FF)); bf2 = nrm((L, 1, D))   # W2 stored transposed (contiguous rows)

    # pack all small per-layer params into one lane-dense (L, 8, DIM_FF) slab (1 DMA/layer)
    slab = jnp.zeros((L, 8, DIM_FF), jnp.float32)
    slab = slab.at[:, 0, :].set(bf1[:, 0, :])
    slab = slab.at[:, 1, :3 * D].set(b_in[:, 0, :])
    slab = slab.at[:, 2, :D].set(bo[:, 0, :])
    slab = slab.at[:, 3, :D].set(g1[:, 0, :])
    slab = slab.at[:, 4, :D].set(be1[:, 0, :])
    slab = slab.at[:, 5, :D].set(g2[:, 0, :])
    slab = slab.at[:, 6, :D].set(be2[:, 0, :])
    slab = slab.at[:, 7, :D].set(bf2[:, 0, :])

    wfc = nrm((D, NUM_CLASSES))
    bfc = nrm((1, NUM_CLASSES))
    return {
        "emb_table": nrm((VOCAB, D), 0.05),
        # MXU operands stored bf16 (halves weight DMA); accumulation stays f32 in-kernel
        "w_in": w_in.astype(jnp.bfloat16),
        "wo": wo.astype(jnp.bfloat16),
        "w1": w1.astype(jnp.bfloat16),
        "w2t": w2t.astype(jnp.bfloat16),
        "pslab": slab,
        # fc padded to a full 128-lane slab; wrapper slices the first NUM_CLASSES columns
        "wfc": jnp.pad(wfc, ((0, 0), (0, C_PAD - NUM_CLASSES))),
        "bfc": jnp.pad(bfc, ((0, 0), (0, C_PAD - NUM_CLASSES))),
    }


def transformer_classifier(params, token_ids):
    B, L = token_ids.shape
    S = B                                       # encoder sees an unbatched length-S sequence

    # EmbeddingBag(mode='mean'): data-dependent row gather + mean stays in plain JAX
    # (XLA fuses gather+reduce; a pallas_call here would be pure launch overhead).
    # TODO(synk): table gather uses plain-JAX indexing (no clean rectangular BlockSpec).
    emb = jnp.mean(params["emb_table"][token_ids], axis=1)               # (B, D) f32

    def _full(shape):
        nd = len(shape)
        return pl.BlockSpec(shape, lambda l, _n=nd: (0,) * _n)

    def _per_layer(shape):
        # leading NUM_LAYERS axis squeezed out; block index follows the grid layer index,
        # so BlockSpec double-buffers layer-(l+1) weight DMA behind layer-l compute.
        nd = len(shape)
        return pl.BlockSpec((None,) + shape, lambda l, _n=nd: (l,) + (0,) * _n)

    in_specs = [
        _full((S, D_MODEL)),                               # emb
        _per_layer((D_MODEL, 3 * D_MODEL)),                # w_in (bf16, packed QKV)
        _per_layer((D_MODEL, D_MODEL)),                    # wo   (bf16)
        _per_layer((D_MODEL, DIM_FF)),                     # w1   (bf16)
        _per_layer((D_MODEL, DIM_FF)),                     # w2t  (bf16, W2 transposed)
        _per_layer((8, DIM_FF)),                           # packed small params (f32)
        _full((D_MODEL, C_PAD)),                           # wfc (lane-padded)
        _full((1, C_PAD)),                                 # bfc (lane-padded)
    ]

    out = pl.pallas_call(
        fused_forward_kernel,
        grid=(NUM_LAYERS,),
        in_specs=in_specs,
        out_specs=pl.BlockSpec((8, C_PAD), lambda l: (0, 0)),
        out_shape=jax.ShapeDtypeStruct((8, C_PAD), jnp.float32),
        scratch_shapes=[pltpu.VMEM((S, D_MODEL), jnp.float32)],   # resident activation
        compiler_params=pltpu.CompilerParams(
            dimension_semantics=("arbitrary",),       # layers are strictly sequential
            vmem_limit_bytes=8 << 20),                # <2 MiB used; safe on v7x (64 MiB/TC)
    )(emb,
      params["w_in"], params["wo"], params["w1"], params["w2t"],
      params["pslab"], params["wfc"], params["bfc"])

    return out[0, :NUM_CLASSES]                                        # (num_classes,)


if __name__ == "__main__":
    key = jax.random.PRNGKey(0)
    pkey, xkey = jax.random.split(key)
    params = init_params(pkey)

    # As in the PyTorch module, x.mean(dim=1) feeds fc(d_model -> C): batch must equal d_model.
    B, L = D_MODEL, 8
    token_ids = jax.random.randint(xkey, (B, L), 0, VOCAB, dtype=jnp.int32)

    logits = transformer_classifier(params, token_ids)
    logits = jax.block_until_ready(logits)
    assert logits.shape == (NUM_CLASSES,)
    assert bool(jnp.all(jnp.isfinite(logits)))
    print("KERNEL_OK")
</pallas_src>

<mosaic_0001>
module attributes {stable_mosaic.version = 11 : i64} {
  func.func @fused_forward_kernel(%arg0: i32, %arg1: memref<32x32xf32, #tpu.memory_space<vmem>>, %arg2: memref<1x32x96xbf16, #tpu.memory_space<vmem>>, %arg3: memref<1x32x32xbf16, #tpu.memory_space<vmem>>, %arg4: memref<1x32x2048xbf16, #tpu.memory_space<vmem>>, %arg5: memref<1x32x2048xbf16, #tpu.memory_space<vmem>>, %arg6: memref<1x8x2048xf32, #tpu.memory_space<vmem>>, %arg7: memref<32x128xf32, #tpu.memory_space<vmem>>, %arg8: memref<1x128xf32, #tpu.memory_space<vmem>>, %arg9: memref<8x128xf32, #tpu.memory_space<vmem>>, %arg10: memref<32x32xf32, #tpu.memory_space<vmem>>) attributes {dimension_semantics = [#tpu.dimension_semantics<arbitrary>], iteration_bounds = array<i64: 2>, scalar_prefetch = 0 : i64, scratch_operands = 1 : i64, tpu.core_type = #tpu.core_type<tc>, window_params = [{pipeline_mode = #tpu.pipeline_mode<synchronous>, transform_indices = @transform_0, window_bounds = array<i64: 32, 32>}, {transform_indices = @transform_1, window_bounds = array<i64: 1, 32, 96>}, {transform_indices = @transform_2, window_bounds = array<i64: 1, 32, 32>}, {transform_indices = @transform_3, window_bounds = array<i64: 1, 32, 2048>}, {transform_indices = @transform_4, window_bounds = array<i64: 1, 32, 2048>}, {transform_indices = @transform_5, window_bounds = array<i64: 1, 8, 2048>}, {pipeline_mode = #tpu.pipeline_mode<synchronous>, transform_indices = @transform_6, window_bounds = array<i64: 32, 128>}, {pipeline_mode = #tpu.pipeline_mode<synchronous>, transform_indices = @transform_7, window_bounds = array<i64: 1, 128>}, {pipeline_mode = #tpu.pipeline_mode<synchronous>, transform_indices = @transform_8, window_bounds = array<i64: 8, 128>}]} {
    %c0_i32 = arith.constant 0 : i32
    %0 = arith.cmpi eq, %arg0, %c0_i32 : i32
    %1 = arith.extui %0 : i1 to i32
    %c0_i32_0 = arith.constant 0 : i32
    %2 = arith.cmpi ne, %1, %c0_i32_0 : i32
    scf.if %2 {
      %c0_64 = arith.constant 0 : index
      %c0_65 = arith.constant 0 : index
      %157 = vector.load %arg1[%c0_64, %c0_65] : memref<32x32xf32, #tpu.memory_space<vmem>>, vector<32x32xf32>
      %c0_66 = arith.constant 0 : index
      %c0_67 = arith.constant 0 : index
      %158 = vector.load %arg10[%c0_66, %c0_67] : memref<32x32xf32, #tpu.memory_space<vmem>>, vector<32x32xf32>
      tpu.vector_store %arg10[%c0_66, %c0_67], %157 {strides = array<i32>} : memref<32x32xf32, #tpu.memory_space<vmem>>, vector<32x32xf32>,
    } else {
    }
    %c0 = arith.constant 0 : index
    %c0_1 = arith.constant 0 : index
    %3 = vector.load %arg10[%c0, %c0_1] : memref<32x32xf32, #tpu.memory_space<vmem>>, vector<32x32xf32>
    %4 = arith.truncf %3 : vector<32x32xf32> to vector<32x32xbf16>
    %c0_2 = arith.constant 0 : index
    %c0_3 = arith.constant 0 : index
    %c0_4 = arith.constant 0 : index
    %5 = vector.load %arg6[%c0_2, %c0_3, %c0_4] : memref<1x8x2048xf32, #tpu.memory_space<vmem>>, vector<1x1x2048xf32>
    %6 = vector.shape_cast %5 : vector<1x1x2048xf32> to vector<1x2048xf32>
    %c0_5 = arith.constant 0 : index
    %c1 = arith.constant 1 : index
    %c0_6 = arith.constant 0 : index
    %7 = vector.load %arg6[%c0_5, %c1, %c0_6] : memref<1x8x2048xf32, #tpu.memory_space<vmem>>, vector<1x1x96xf32>
    %8 = vector.shape_cast %7 : vector<1x1x96xf32> to vector<1x96xf32>
    %c0_7 = arith.constant 0 : index
    %c2 = arith.constant 2 : index
    %c0_8 = arith.constant 0 : index
    %9 = vector.load %arg6[%c0_7, %c2, %c0_8] : memref<1x8x2048xf32, #tpu.memory_space<vmem>>, vector<1x1x32xf32>
    %10 = vector.shape_cast %9 : vector<1x1x32xf32> to vector<1x32xf32>
    %c0_9 = arith.constant 0 : index
    %c3 = arith.constant 3 : index
    %c0_10 = arith.constant 0 : index
    %11 = vector.load %arg6[%c0_9, %c3, %c0_10] : memref<1x8x2048xf32, #tpu.memory_space<vmem>>, vector<1x1x32xf32>
    %12 = vector.shape_cast %11 : vector<1x1x32xf32> to vector<1x32xf32>
    %c0_11 = arith.constant 0 : index
    %c4 = arith.constant 4 : index
    %c0_12 = arith.constant 0 : index
    %13 = vector.load %arg6[%c0_11, %c4, %c0_12] : memref<1x8x2048xf32, #tpu.memory_space<vmem>>, vector<1x1x32xf32>
    %14 = vector.shape_cast %13 : vector<1x1x32xf32> to vector<1x32xf32>
    %c0_13 = arith.constant 0 : index
    %c5 = arith.constant 5 : index
    %c0_14 = arith.constant 0 : index
    %15 = vector.load %arg6[%c0_13, %c5, %c0_14] : memref<1x8x2048xf32, #tpu.memory_space<vmem>>, vector<1x1x32xf32>
    %16 = vector.shape_cast %15 : vector<1x1x32xf32> to vector<1x32xf32>
    %c0_15 = arith.constant 0 : index
    %c6 = arith.constant 6 : index
    %c0_16 = arith.constant 0 : index
    %17 = vector.load %arg6[%c0_15, %c6, %c0_16] : memref<1x8x2048xf32, #tpu.memory_space<vmem>>, vector<1x1x32xf32>
    %18 = vector.shape_cast %17 : vector<1x1x32xf32> to vector<1x32xf32>
    %c0_17 = arith.constant 0 : index
    %c7 = arith.constant 7 : index
    %c0_18 = arith.constant 0 : index
    %19 = vector.load %arg6[%c0_17, %c7, %c0_18] : memref<1x8x2048xf32, #tpu.memory_space<vmem>>, vector<1x1x32xf32>
    %20 = vector.shape_cast %19 : vector<1x1x32xf32> to vector<1x32xf32>
    %c0_19 = arith.constant 0 : index
    %c0_20 = arith.constant 0 : index
    %c0_21 = arith.constant 0 : index
    %21 = vector.load %arg2[%c0_19, %c0_20, %c0_21] : memref<1x32x96xbf16, #tpu.memory_space<vmem>>, vector<1x32x96xbf16>
    %22 = vector.shape_cast %21 : vector<1x32x96xbf16> to vector<32x96xbf16>
    %cst = arith.constant dense<0.000000e+00> : vector<32x96xf32>
    %23 = tpu.matmul %4, %22, %cst {dimension_numbers = #tpu.dot_dimension_numbers<[1], [0], [0], [1], [0, 0, 1, 1], [], []>} : vector<32x32xbf16>, vector<32x96xbf16>, vector<32x96xf32> -> vector<32x96xf32>
    %24 = vector.broadcast %8 : vector<1x96xf32> to vector<32x96xf32>
    %25 = arith.addf %23, %24 : vector<32x96xf32>
    %26 = vector.extract_strided_slice %25 {offsets = [0, 0], sizes = [32, 8], strides = [1, 1]} : vector<32x96xf32> to vector<32x8xf32>
    %27 = vector.extract_strided_slice %25 {offsets = [0, 32], sizes = [32, 8], strides = [1, 1]} : vector<32x96xf32> to vector<32x8xf32>
    %28 = vector.extract_strided_slice %25 {offsets = [0, 64], sizes = [32, 8], strides = [1, 1]} : vector<32x96xf32> to vector<32x8xf32>
    %cst_22 = arith.constant dense<0.000000e+00> : vector<32x32xf32>
    %29 = tpu.matmul %26, %27, %cst_22 {dimension_numbers = #tpu.dot_dimension_numbers<[1], [1], [0], [0], [0, 0, 1, 0], [], []>} : vector<32x8xf32>, vector<32x8xf32>, vector<32x32xf32> -> vector<32x32xf32>
    %cst_23 = arith.constant dense<0xFF800000> : vector<32xf32>
    %30 = vector.multi_reduction <maximumf>, %29, %cst_23 [1] : vector<32x32xf32> to vector<32xf32>
    %31 = vector.shape_cast %30 : vector<32xf32> to vector<32x1xf32>
    %32 = vector.broadcast %31 : vector<32x1xf32> to vector<32x32xf32>
    %33 = arith.subf %29, %32 : vector<32x32xf32>
    %34 = math.exp %33 : vector<32x32xf32>
    %cst_24 = arith.constant dense<0.000000e+00> : vector<32xf32>
    %35 = vector.multi_reduction <add>, %34, %cst_24 [1] : vector<32x32xf32> to vector<32xf32>
    %36 = vector.shape_cast %35 : vector<32xf32> to vector<32x1xf32>
    %37 = tpu.reciprocal %36 {approx = true} : vector<32x1xf32> -> vector<32x1xf32>
    %38 = vector.broadcast %37 : vector<32x1xf32> to vector<32x32xf32>
    %39 = arith.mulf %34, %38 : vector<32x32xf32>
    %cst_25 = arith.constant dense<0.000000e+00> : vector<32x8xf32>
    %40 = tpu.matmul %39, %28, %cst_25 {dimension_numbers = #tpu.dot_dimension_numbers<[1], [0], [0], [1], [0, 0, 1, 1], [], []>} : vector<32x32xf32>, vector<32x8xf32>, vector<32x8xf32> -> vector<32x8xf32>
    %41 = vector.extract_strided_slice %25 {offsets = [0, 8], sizes = [32, 8], strides = [1, 1]} : vector<32x96xf32> to vector<32x8xf32>
    %42 = vector.extract_strided_slice %25 {offsets = [0, 40], sizes = [32, 8], strides = [1, 1]} : vector<32x96xf32> to vector<32x8xf32>
    %43 = vector.extract_strided_slice %25 {offsets = [0, 72], sizes = [32, 8], strides = [1, 1]} : vector<32x96xf32> to vector<32x8xf32>
    %cst_26 = arith.constant dense<0.000000e+00> : vector<32x32xf32>
    %44 = tpu.matmul %41, %42, %cst_26 {dimension_numbers = #tpu.dot_dimension_numbers<[1], [1], [0], [0], [0, 0, 1, 0], [], []>} : vector<32x8xf32>, vector<32x8xf32>, vector<32x32xf32> -> vector<32x32xf32>
    %cst_27 = arith.constant dense<0xFF800000> : vector<32xf32>
    %45 = vector.multi_reduction <maximumf>, %44, %cst_27 [1] : vector<32x32xf32> to vector<32xf32>
    %46 = vector.shape_cast %45 : vector<32xf32> to vector<32x1xf32>
    %47 = vector.broadcast %46 : vector<32x1xf32> to vector<32x32xf32>
    %48 = arith.subf %44, %47 : vector<32x32xf32>
    %49 = math.exp %48 : vector<32x32xf32>
    %cst_28 = arith.constant dense<0.000000e+00> : vector<32xf32>
    %50 = vector.multi_reduction <add>, %49, %cst_28 [1] : vector<32x32xf32> to vector<32xf32>
    %51 = vector.shape_cast %50 : vector<32xf32> to vector<32x1xf32>
    %52 = tpu.reciprocal %51 {approx = true} : vector<32x1xf32> -> vector<32x1xf32>
    %53 = vector.broadcast %52 : vector<32x1xf32> to vector<32x32xf32>
    %54 = arith.mulf %49, %53 : vector<32x32xf32>
    %cst_29 = arith.constant dense<0.000000e+00> : vector<32x8xf32>
    %55 = tpu.matmul %54, %43, %cst_29 {dimension_numbers = #tpu.dot_dimension_numbers<[1], [0], [0], [1], [0, 0, 1, 1], [], []>} : vector<32x32xf32>, vector<32x8xf32>, vector<32x8xf32> -> vector<32x8xf32>
    %56 = vector.extract_strided_slice %25 {offsets = [0, 16], sizes = [32, 8], strides = [1, 1]} : vector<32x96xf32> to vector<32x8xf32>
    %57 = vector.extract_strided_slice %25 {offsets = [0, 48], sizes = [32, 8], strides = [1, 1]} : vector<32x96xf32> to vector<32x8xf32>
    %58 = vector.extract_strided_slice %25 {offsets = [0, 80], sizes = [32, 8], strides = [1, 1]} : vector<32x96xf32> to vector<32x8xf32>
    %cst_30 = arith.constant dense<0.000000e+00> : vector<32x32xf32>
    %59 = tpu.matmul %56, %57, %cst_30 {dimension_numbers = #tpu.dot_dimension_numbers<[1], [1], [0], [0], [0, 0, 1, 0], [], []>} : vector<32x8xf32>, vector<32x8xf32>, vector<32x32xf32> -> vector<32x32xf32>
    %cst_31 = arith.constant dense<0xFF800000> : vector<32xf32>
    %60 = vector.multi_reduction <maximumf>, %59, %cst_31 [1] : vector<32x32xf32> to vector<32xf32>
    %61 = vector.shape_cast %60 : vector<32xf32> to vector<32x1xf32>
    %62 = vector.broadcast %61 : vector<32x1xf32> to vector<32x32xf32>
    %63 = arith.subf %59, %62 : vector<32x32xf32>
    %64 = math.exp %63 : vector<32x32xf32>
    %cst_32 = arith.constant dense<0.000000e+00> : vector<32xf32>
    %65 = vector.multi_reduction <add>, %64, %cst_32 [1] : vector<32x32xf32> to vector<32xf32>
    %66 = vector.shape_cast %65 : vector<32xf32> to vector<32x1xf32>
    %67 = tpu.reciprocal %66 {approx = true} : vector<32x1xf32> -> vector<32x1xf32>
    %68 = vector.broadcast %67 : vector<32x1xf32> to vector<32x32xf32>
    %69 = arith.mulf %64, %68 : vector<32x32xf32>
    %cst_33 = arith.constant dense<0.000000e+00> : vector<32x8xf32>
    %70 = tpu.matmul %69, %58, %cst_33 {dimension_numbers = #tpu.dot_dimension_numbers<[1], [0], [0], [1], [0, 0, 1, 1], [], []>} : vector<32x32xf32>, vector<32x8xf32>, vector<32x8xf32> -> vector<32x8xf32>
    %71 = vector.extract_strided_slice %25 {offsets = [0, 24], sizes = [32, 8], strides = [1, 1]} : vector<32x96xf32> to vector<32x8xf32>
    %72 = vector.extract_strided_slice %25 {offsets = [0, 56], sizes = [32, 8], strides = [1, 1]} : vector<32x96xf32> to vector<32x8xf32>
    %73 = vector.extract_strided_slice %25 {offsets = [0, 88], sizes = [32, 8], strides = [1, 1]} : vector<32x96xf32> to vector<32x8xf32>
    %cst_34 = arith.constant dense<0.000000e+00> : vector<32x32xf32>
    %74 = tpu.matmul %71, %72, %cst_34 {dimension_numbers = #tpu.dot_dimension_numbers<[1], [1], [0], [0], [0, 0, 1, 0], [], []>} : vector<32x8xf32>, vector<32x8xf32>, vector<32x32xf32> -> vector<32x32xf32>
    %cst_35 = arith.constant dense<0xFF800000> : vector<32xf32>
    %75 = vector.multi_reduction <maximumf>, %74, %cst_35 [1] : vector<32x32xf32> to vector<32xf32>
    %76 = vector.shape_cast %75 : vector<32xf32> to vector<32x1xf32>
    %77 = vector.broadcast %76 : vector<32x1xf32> to vector<32x32xf32>
    %78 = arith.subf %74, %77 : vector<32x32xf32>
    %79 = math.exp %78 : vector<32x32xf32>
    %cst_36 = arith.constant dense<0.000000e+00> : vector<32xf32>
    %80 = vector.multi_reduction <add>, %79, %cst_36 [1] : vector<32x32xf32> to vector<32xf32>
    %81 = vector.shape_cast %80 : vector<32xf32> to vector<32x1xf32>
    %82 = tpu.reciprocal %81 {approx = true} : vector<32x1xf32> -> vector<32x1xf32>
    %83 = vector.broadcast %82 : vector<32x1xf32> to vector<32x32xf32>
    %84 = arith.mulf %79, %83 : vector<32x32xf32>
    %cst_37 = arith.constant dense<0.000000e+00> : vector<32x8xf32>
    %85 = tpu.matmul %84, %73, %cst_37 {dimension_numbers = #tpu.dot_dimension_numbers<[1], [0], [0], [1], [0, 0, 1, 1], [], []>} : vector<32x32xf32>, vector<32x8xf32>, vector<32x8xf32> -> vector<32x8xf32>
    %86 = tpu.concatenate %40, %55, %70, %85 in 1 : vector<32x8xf32>, vector<32x8xf32>, vector<32x8xf32>, vector<32x8xf32> -> vector<32x32xf32>
    %87 = arith.truncf %86 : vector<32x32xf32> to vector<32x32xbf16>
    %c0_38 = arith.constant 0 : index
    %c0_39 = arith.constant 0 : index
    %c0_40 = arith.constant 0 : index
    %88 = vector.load %arg3[%c0_38, %c0_39, %c0_40] : memref<1x32x32xbf16, #tpu.memory_space<vmem>>, vector<1x32x32xbf16>
    %89 = vector.shape_cast %88 : vector<1x32x32xbf16> to vector<32x32xbf16>
    %cst_41 = arith.constant dense<0.000000e+00> : vector<32x32xf32>
    %90 = tpu.matmul %87, %89, %cst_41 {dimension_numbers = #tpu.dot_dimension_numbers<[1], [0], [0], [1], [0, 0, 1, 1], [], []>} : vector<32x32xbf16>, vector<32x32xbf16>, vector<32x32xf32> -> vector<32x32xf32>
    %91 = vector.broadcast %10 : vector<1x32xf32> to vector<32x32xf32>
    %92 = arith.addf %90, %91 : vector<32x32xf32>
    %93 = arith.addf %3, %92 : vector<32x32xf32>
    %cst_42 = arith.constant dense<0.000000e+00> : vector<32xf32>
    %94 = vector.multi_reduction <add>, %93, %cst_42 [1] : vector<32x32xf32> to vector<32xf32>
    %95 = vector.shape_cast %94 : vector<32xf32> to vector<32x1xf32>
    %cst_43 = arith.constant 3.200000e+01 : f32
    %96 = vector.broadcast %cst_43 : f32 to vector<32x1xf32>
    %97 = arith.divf %95, %96 : vector<32x1xf32>
    %98 = vector.broadcast %97 : vector<32x1xf32> to vector<32x32xf32>
    %99 = arith.subf %93, %98 : vector<32x32xf32>
    %100 = arith.mulf %99, %99 : vector<32x32xf32>
    %cst_44 = arith.constant dense<0.000000e+00> : vector<32xf32>
    %101 = vector.multi_reduction <add>, %100, %cst_44 [1] : vector<32x32xf32> to vector<32xf32>
    %102 = vector.shape_cast %101 : vector<32xf32> to vector<32x1xf32>
    %cst_45 = arith.constant 3.200000e+01 : f32
    %103 = vector.broadcast %cst_45 : f32 to vector<32x1xf32>
    %104 = arith.divf %102, %103 : vector<32x1xf32>
    %105 = vector.broadcast %97 : vector<32x1xf32> to vector<32x32xf32>
    %106 = arith.subf %93, %105 : vector<32x32xf32>
    %cst_46 = arith.constant 9.99999974E-6 : f32
    %107 = vector.broadcast %cst_46 : f32 to vector<32x1xf32>
    %108 = arith.addf %104, %107 : vector<32x1xf32>
    %109 = math.rsqrt %108 : vector<32x1xf32>
    %110 = vector.broadcast %109 : vector<32x1xf32> to vector<32x32xf32>
    %111 = arith.mulf %106, %110 : vector<32x32xf32>
    %112 = vector.broadcast %12 : vector<1x32xf32> to vector<32x32xf32>
    %113 = arith.mulf %111, %112 : vector<32x32xf32>
    %114 = vector.broadcast %14 : vector<1x32xf32> to vector<32x32xf32>
    %115 = arith.addf %113, %114 : vector<32x32xf32>
    %116 = arith.truncf %115 : vector<32x32xf32> to vector<32x32xbf16>
    %c0_47 = arith.constant 0 : index
    %c0_48 = arith.constant 0 : index
    %c0_49 = arith.constant 0 : index
    %117 = vector.load %arg4[%c0_47, %c0_48, %c0_49] : memref<1x32x2048xbf16, #tpu.memory_space<vmem>>, vector<1x32x2048xbf16>
    %118 = vector.shape_cast %117 : vector<1x32x2048xbf16> to vector<32x2048xbf16>
    %cst_50 = arith.constant dense<0.000000e+00> : vector<32x2048xf32>
    %119 = tpu.matmul %116, %118, %cst_50 {dimension_numbers = #tpu.dot_dimension_numbers<[1], [0], [0], [1], [0, 0, 1, 1], [], []>} : vector<32x32xbf16>, vector<32x2048xbf16>, vector<32x2048xf32> -> vector<32x2048xf32>
    %120 = vector.broadcast %6 : vector<1x2048xf32> to vector<32x2048xf32>
    %121 = arith.addf %119, %120 : vector<32x2048xf32>
    %cst_51 = arith.constant 0.000000e+00 : f32
    %122 = vector.broadcast %cst_51 : f32 to vector<32x2048xf32>
    %123 = arith.maximumf %121, %122 : vector<32x2048xf32>
    %124 = arith.truncf %123 : vector<32x2048xf32> to vector<32x2048xbf16>
    %c0_52 = arith.constant 0 : index
    %c0_53 = arith.constant 0 : index
    %c0_54 = arith.constant 0 : index
    %125 = vector.load %arg5[%c0_52, %c0_53, %c0_54] : memref<1x32x2048xbf16, #tpu.memory_space<vmem>>, vector<1x32x2048xbf16>
    %126 = vector.shape_cast %125 : vector<1x32x2048xbf16> to vector<32x2048xbf16>
    %cst_55 = arith.constant dense<0.000000e+00> : vector<32x32xf32>
    %127 = tpu.matmul %124, %126, %cst_55 {dimension_numbers = #tpu.dot_dimension_numbers<[1], [1], [0], [0], [0, 0, 1, 0], [], []>} : vector<32x2048xbf16>, vector<32x2048xbf16>, vector<32x32xf32> -> vector<32x32xf32>
    %128 = vector.broadcast %20 : vector<1x32xf32> to vector<32x32xf32>
    %129 = arith.addf %127, %128 : vector<32x32xf32>
    %130 = arith.addf %115, %129 : vector<32x32xf32>
    %cst_56 = arith.constant dense<0.000000e+00> : vector<32xf32>
    %131 = vector.multi_reduction <add>, %130, %cst_56 [1] : vector<32x32xf32> to vector<32xf32>
    %132 = vector.shape_cast %131 : vector<32xf32> to vector<32x1xf32>
    %cst_57 = arith.constant 3.200000e+01 : f32
    %133 = vector.broadcast %cst_57 : f32 to vector<32x1xf32>
    %134 = arith.divf %132, %133 : vector<32x1xf32>
    %135 = vector.broadcast %134 : vector<32x1xf32> to vector<32x32xf32>
    %136 = arith.subf %130, %135 : vector<32x32xf32>
    %137 = arith.mulf %136, %136 : vector<32x32xf32>
    %cst_58 = arith.constant dense<0.000000e+00> : vector<32xf32>
    %138 = vector.multi_reduction <add>, %137, %cst_58 [1] : vector<32x32xf32> to vector<32xf32>
    %139 = vector.shape_cast %138 : vector<32xf32> to vector<32x1xf32>
    %cst_59 = arith.constant 3.200000e+01 : f32
    %140 = vector.broadcast %cst_59 : f32 to vector<32x1xf32>
    %141 = arith.divf %139, %140 : vector<32x1xf32>
    %142 = vector.broadcast %134 : vector<32x1xf32> to vector<32x32xf32>
    %143 = arith.subf %130, %142 : vector<32x32xf32>
    %cst_60 = arith.constant 9.99999974E-6 : f32
    %144 = vector.broadcast %cst_60 : f32 to vector<32x1xf32>
    %145 = arith.addf %141, %144 : vector<32x1xf32>
    %146 = math.rsqrt %145 : vector<32x1xf32>
    %147 = vector.broadcast %146 : vector<32x1xf32> to vector<32x32xf32>
    %148 = arith.mulf %143, %147 : vector<32x32xf32>
    %149 = vector.broadcast %16 : vector<1x32xf32> to vector<32x32xf32>
    %150 = arith.mulf %148, %149 : vector<32x32xf32>
    %151 = vector.broadcast %18 : vector<1x32xf32> to vector<32x32xf32>
    %152 = arith.addf %150, %151 : vector<32x32xf32>
    %c0_61 = arith.constant 0 : index
    %c0_62 = arith.constant 0 : index
    %153 = vector.load %arg10[%c0_61, %c0_62] : memref<32x32xf32, #tpu.memory_space<vmem>>, vector<32x32xf32>
    tpu.vector_store %arg10[%c0_61, %c0_62], %152 {strides = array<i32>} : memref<32x32xf32, #tpu.memory_space<vmem>>, vector<32x32xf32>,
    %c1_i32 = arith.constant 1 : i32
    %154 = arith.cmpi eq, %arg0, %c1_i32 : i32
    %155 = arith.extui %154 : i1 to i32
    %c0_i32_63 = arith.constant 0 : i32
    %156 = arith.cmpi ne, %155, %c0_i32_63 : i32
    scf.if %156 {
      %c0_64 = arith.constant 0 : index
      %c0_65 = arith.constant 0 : index
      %157 = vector.load %arg10[%c0_64, %c0_65] : memref<32x32xf32, #tpu.memory_space<vmem>>, vector<32x32xf32>
      %cst_66 = arith.constant dense<0.000000e+00> : vector<32xf32>
      %158 = vector.multi_reduction <add>, %157, %cst_66 [1] : vector<32x32xf32> to vector<32xf32>
      %159 = vector.shape_cast %158 : vector<32xf32> to vector<32x1xf32>
      %cst_67 = arith.constant 3.200000e+01 : f32
      %160 = vector.broadcast %cst_67 : f32 to vector<32x1xf32>
      %161 = arith.divf %159, %160 : vector<32x1xf32>
      %c0_68 = arith.constant 0 : index
      %c0_69 = arith.constant 0 : index
      %162 = vector.load %arg7[%c0_68, %c0_69] : memref<32x128xf32, #tpu.memory_space<vmem>>, vector<32x128xf32>
      %cst_70 = arith.constant dense<0.000000e+00> : vector<1x128xf32>
      %163 = tpu.matmul %161, %162, %cst_70 {dimension_numbers = #tpu.dot_dimension_numbers<[0], [0], [1], [1], [0, 1, 1, 1], [], []>} : vector<32x1xf32>, vector<32x128xf32>, vector<1x128xf32> -> vector<1x128xf32>
      %c0_71 = arith.constant 0 : index
      %c0_72 = arith.constant 0 : index
      %164 = vector.load %arg8[%c0_71, %c0_72] : memref<1x128xf32, #tpu.memory_space<vmem>>, vector<1x128xf32>
      %165 = arith.addf %163, %164 : vector<1x128xf32>
      %166 = vector.shape_cast %165 : vector<1x128xf32> to vector<1x128xf32>
      %167 = vector.broadcast %166 : vector<1x128xf32> to vector<8x128xf32>
      %c0_73 = arith.constant 0 : index
      %c0_74 = arith.constant 0 : index
      %168 = vector.load %arg9[%c0_73, %c0_74] : memref<8x128xf32, #tpu.memory_space<vmem>>, vector<8x128xf32>
      tpu.vector_store %arg9[%c0_73, %c0_74], %167 {strides = array<i32>} : memref<8x128xf32, #tpu.memory_space<vmem>>, vector<8x128xf32>,
    } else {
    }
    return
  }
  func.func @transform_0(%arg0: i32) -> (i32, i32) {
    %c0_i32 = arith.constant 0 : i32
    %c0_i32_0 = arith.constant 0 : i32
    %c0_i32_1 = arith.constant 0 : i32
    return %c0_i32, %c0_i32_0 : i32, i32
  }
  func.func @transform_1(%arg0: i32) -> (i32, i32, i32) {
    %c0_i32 = arith.constant 0 : i32
    %c0_i32_0 = arith.constant 0 : i32
    %c0_i32_1 = arith.constant 0 : i32
    return %arg0, %c0_i32, %c0_i32_0 : i32, i32, i32
  }
  func.func @transform_2(%arg0: i32) -> (i32, i32, i32) {
    %c0_i32 = arith.constant 0 : i32
    %c0_i32_0 = arith.constant 0 : i32
    %c0_i32_1 = arith.constant 0 : i32
    return %arg0, %c0_i32, %c0_i32_0 : i32, i32, i32
  }
  func.func @transform_3(%arg0: i32) -> (i32, i32, i32) {
    %c0_i32 = arith.constant 0 : i32
    %c0_i32_0 = arith.constant 0 : i32
    %c0_i32_1 = arith.constant 0 : i32
    return %arg0, %c0_i32, %c0_i32_0 : i32, i32, i32
  }
  func.func @transform_4(%arg0: i32) -> (i32, i32, i32) {
    %c0_i32 = arith.constant 0 : i32
    %c0_i32_0 = arith.constant 0 : i32
    %c0_i32_1 = arith.constant 0 : i32
    return %arg0, %c0_i32, %c0_i32_0 : i32, i32, i32
  }
  func.func @transform_5(%arg0: i32) -> (i32, i32, i32) {
    %c0_i32 = arith.constant 0 : i32
    %c0_i32_0 = arith.constant 0 : i32
    %c0_i32_1 = arith.constant 0 : i32
    return %arg0, %c0_i32, %c0_i32_0 : i32, i32, i32
  }
  func.func @transform_6(%arg0: i32) -> (i32, i32) {
    %c0_i32 = arith.constant 0 : i32
    %c0_i32_0 = arith.constant 0 : i32
    %c0_i32_1 = arith.constant 0 : i32
    return %c0_i32, %c0_i32_0 : i32, i32
  }
  func.func @transform_7(%arg0: i32) -> (i32, i32) {
    %c0_i32 = arith.constant 0 : i32
    %c0_i32_0 = arith.constant 0 : i32
    %c0_i32_1 = arith.constant 0 : i32
    return %c0_i32, %c0_i32_0 : i32, i32
  }
  func.func @transform_8(%arg0: i32) -> (i32, i32) {
    %c0_i32 = arith.constant 0 : i32
    %c0_i32_0 = arith.constant 0 : i32
    %c0_i32_1 = arith.constant 0 : i32
    return %c0_i32, %c0_i32_0 : i32, i32
  }
}

</mosaic_0001>

<bundles_post_ra>
// kernel: tpu_custom_call.1
= control target key start
LH: loop header
LB: loop body
LE: loop exit
PB: predicated region body
PF: predicated region fallthrough
CT: control target
= control target key end

     0   :  { %s4931_s0 = inlined_call_operand.hbm [shape: f32[32,32], index: 0, kind: input, shape index: {}]   ;;  %s4932_s1 = inlined_call_operand.hbm [shape: bf16[2,32,96], index: 1, kind: input, shape index: {}]   ;;  %s4933_s2 = inlined_call_operand.hbm [shape: bf16[2,32,32], index: 2, kind: input, shape index: {}]   ;;  %s4934_s3 = inlined_call_operand.hbm [shape: bf16[2,32,2048], index: 3, kind: input, shape index: {}]   ;;  %s4935_s4 = inlined_call_operand.hbm [shape: bf16[2,32,2048], index: 4, kind: input, shape index: {}]   ;;  %s4936_s5 = inlined_call_operand.hbm [shape: f32[2,8,2048], index: 5, kind: input, shape index: {}]   ;;  %s4937_s6 = inlined_call_operand.hbm [shape: f32[32,128], index: 6, kind: input, shape index: {}]   ;;  %s4938_s7 = inlined_call_operand.vmem [shape: f32[1,128], index: 7, kind: input, shape index: {}]   ;;  %s4939_s8 = inlined_call_operand.hbm [shape: f32[8,128], index: 8, kind: output, shape index: {}]  }
   0x1   :  { %4952 = sst [smem:[#allocation28_spill]] %s4932_s1 }
   0x2   :  { %4953 = sst [smem:[#allocation29_spill]] %s4934_s3 }
   0x3   :  { %4954 = sst [smem:[#allocation30_spill]] %s4937_s6 }
   0x4   :  { %4955 = sst [smem:[#allocation31_spill]] %s4938_s7 }
   0x5   :  { %4956 = sst [smem:[#allocation32_spill]] %s4939_s8 }
   0x6   :  { %13 = vsyncpa [#allocation4], 0 }
   0x7   :  { %14 = vsyncpa [#allocation7], 0 }
   0x8   :  { %16 = vsyncpa [#allocation7 + $0x1], 0 }
   0x9   :  { %17 = vsyncpa [#allocation10], 0 }
   0xa   :  { %19 = vsyncpa [#allocation10 + $0x1], 0 }
   0xb   :  { %20 = vsyncpa [#allocation13], 0 }
   0xc   :  { %22 = vsyncpa [#allocation13 + $0x1], 0 }
   0xd   :  { %23 = vsyncpa [#allocation5], 0  ;;  %s4004_s27 = smov 0   ;;  %s4006_s28 = smov 0  }
   0xe   :  { %s4008_s29 = smov 0   ;;  %s4010_s30 = smov 0  }
   0xf LB: > { %4957 = sst [smem:[#allocation22_spill]] %s3926_s28  ;;  %s4023_s9 = sadd.s32 4294967295, %s3934_s30   ;;  %s3934_s30 = sphi %s4010_s30, %s4984_s30   ;;  %s3930_s29 = sphi %s4008_s29, %s4987_s29   ;;  %s3926_s28 = sphi %s4006_s28, %s4986_s28   ;;  %s3922_s27 = sphi %s4004_s27, %s4985_s27  }
  0x10   : > { %4958 = sst [smem:[#allocation23_spill]] %s3930_s29  ;;  %p70_p0 = scmp.ne.s32.totalorder %s3926_s28, %s3922_s27 }
  0x11   : > { %4959 = sst [smem:[#allocation24_spill]] %s4023_s9  ;;  %p71_p1 = scmp.eq.s32.totalorder %s4023_s9, 0 }
  0x12   : > { %p2911_p2 = scmp.ge.s32.totalorder %s3934_s30, 1  ;;  %p248_p3 = scmp.lt.s32.totalorder %s3934_s30, 3 }
  0x13   : > { %p2912_p4 = scmp.ne.s32.totalorder %s4023_s9, 0  ;;  %p4032_p5 = por %p71_p1, %p70_p0 }
  0x14   : > { %p4036_p6 = pnand %p2911_p2, %p248_p3  ;;  %s4963_s6 = sld [smem:[#allocation30_spill]] }
  0x15   : > { %s4960_s10 = scalar_select %p4032_p5, 1, 0 }
  0x16   : > { %p3404_p7 = pneg %p4036_p6  ;;  %s3936_s15 = smov [#allocation14]  }
  0x17   : > { %4961 = sst [smem:[#allocation25_spill]] %s4960_s10  ;;  %s275_s16 = sshll.u32 %s3936_s15, 4  ;;  %s276_s16 = int_to_ptr.vmem [resolvable:$true] %s275_s16 }
  0x18   : > { %p4047_p8 = pnand %p3404_p7, %p71_p1  ;;  %s4052_s18 = sadd.s32 1, %s3934_s30  }
  0x19   : > { %4965 = sst [smem:[#allocation26_spill]] %s4052_s18  ;;  %s4940_s19 = smov 128  }
  0x1a   : > { %s273_s14 = sshll.u32 %s4963_s6, 4  ;;  %s4941_s20 = smov 8   ;;  %s274_s14 = int_to_ptr.hbm [resolvable:$true] %s273_s14 }
  0x1b   : > { %3410 = dma.hbm_to_vmem [thread:$0]  (!%p4047_p8), %s274_s14, 512, %s276_s16, [#allocation13], %s4940_s19, %s4940_s19, %s4941_s20  }
  0x1c   : > { %s54_s21 = ssub.s32 %s3934_s30, %s4052_s18  ;;  %s57_s22 = sadd.s32 1, %s3930_s29 }
  0x1d   : > { %p55_p9 = scmp.eq.s32.totalorder %s54_s21, 0  ;;  %p64_p10 = scmp.ne.s32.totalorder %s3930_s29, %s3926_s28 }
  0x1e   : > { %p65_p11 = scmp.eq.s32.totalorder %s3934_s30, 0  ;;  %p3429_p12 = scmp.lt.s32.totalorder %s3934_s30, 2 }
  0x1f   : > { %s4067_s23 = scalar_select %p55_p9, %s3930_s29, %s57_s22  }
  0x20   : > { %p66_p13 = por %p65_p11, %p64_p10  ;;  %s4070_s24 = sand.u32 1, %s3934_s30  }
  0x21   : > { %4966 = sst [smem:[#allocation27_spill]] %s4067_s23  ;;  %s4073_s25 = sand.u32 1, %s3930_s29  }
  0x22   : > { %s4943_s26 = sshll.u32 %s4073_s25, 4  ;;  %s3303_s27 = sshll.u32 %s3934_s30, 4 }
  0x23   : > { %s4967_s1 = sld [smem:[#allocation28_spill]]  ;;  %s296_s16 = scalar_lea.vmem [#allocation6], %s4943_s26 }
  0x24   : > { %s304_s21 = sshll.u32 %s296_s16, 4  ;;  %p4084_p0 = pnand %p3429_p12, %p66_p13  ;;  %s305_s21 = int_to_ptr.vmem [resolvable:$true] %s304_s21 }
  0x25   : > { %s323_s6 = scalar_lea.hbm %s4933_s2, %s3303_s27 }
  0x26   : > { %p4094_p3 = pneg %p4084_p0 }
  0x29   : > { %s301_s14 = scalar_lea.hbm %s4967_s1, %s3303_s27  ;;  %s3679_s19 = scalar_lea.hbm %s4967_s1, 32 }
  0x2a   : > { %s302_s15 = sshll.u32 %s301_s14, 4  ;;  %s303_s15 = int_to_ptr.hbm [resolvable:$true] %s302_s15 }
  0x2b   : > { %s3672_s29 = sshra.s32 %s303_s15, 4  ;;  %s3673_s29 = int_to_ptr.hbm [resolvable:$true] %s3672_s29 }
  0x2c   : > { %s3674_s12 = scalar_lea.hbm %s3673_s29, 16  ;;  %p3680_p10 = scmp.lt.s32.totalorder %s3673_s29, %s4967_s1 }
  0x2d   : > { %p3675_p2 = scmp.ne.s32.totalorder %s3673_s29, %s3674_s12  ;;  %p3681_p11 = scmp.lt.s32.totalorder %s3679_s19, %s3674_s12 }
  0x2f   : > { %p3677_p7 = pnand %p4094_p3, %p3675_p2  ;;  %p3682_p12 = por %p3681_p11, %p3680_p10 }
  0x31   : > { %p3678_p9 = pneg %p3677_p7 }
  0x33   : > { %p3683_p13 = pnand %p3682_p12, %p3678_p9 }
  0x35   : > { %3686 = shalt.err (!%p3683_p13)
}
  0x36   : > { %s3939_s26 = smov 64   ;;  %s4949_s23 = smov 4  }
  0x37   : > { %s4970_s14 = scalar_lea.sflag [#allocation7], %s4070_s24  ;;  %s324_s16 = sshll.u32 %s323_s6, 4  ;;  %s4115_s16 = int_to_ptr.hbm [resolvable:$true] %s324_s16 }
  0x38   : > { %3414 = dma.hbm_to_vmem [thread:$0]  (!%p4084_p0), %s303_s15, 256, %s305_s21, %s4970_s14, %s3939_s26, %s3939_s26, %s4949_s23  }
  0x39   : > { %s4971_s29 = sshll.u32 %s4073_s25, 4  ;;  %s2921_s20 = sshll.u32 %s4073_s25, 8 }
  0x3a   : > { %s318_s12 = scalar_lea.vmem [#allocation8], %s4971_s29  ;;  %s3305_s27 = sshll.u32 %s3934_s30, 8 }
  0x3b   : > { %s326_s19 = sshll.u32 %s318_s12, 4  ;;  %s4972_s3 = sld [smem:[#allocation29_spill]]  ;;  %s4117_s19 = int_to_ptr.vmem [resolvable:$true] %s326_s19 }
  0x3c   : > { %s340_s7 = scalar_lea.vmem [#allocation9], %s2921_s20  ;;  %s337_s6 = scalar_lea.sflag [#allocation10], %s4070_s24 }
  0x3d   : > { %s348_s10 = sshll.u32 %s340_s7, 4  ;;  %s349_s10 = int_to_ptr.vmem [resolvable:$true] %s348_s10 }
  0x41   : > { %s345_s8 = scalar_lea.hbm %s4972_s3, %s3305_s27  ;;  %s3709_s12 = scalar_lea.hbm %s4972_s3, 512 }
  0x42   : > { %s346_s28 = sshll.u32 %s345_s8, 4  ;;  %s347_s28 = int_to_ptr.hbm [resolvable:$true] %s346_s28 }
  0x43   : > { %s3702_s15 = sshra.s32 %s347_s28, 4  ;;  %s3703_s15 = int_to_ptr.hbm [resolvable:$true] %s3702_s15 }
  0x44   : > { %s3704_s21 = scalar_lea.hbm %s3703_s15, 256  ;;  %p3710_p10 = scmp.lt.s32.totalorder %s3703_s15, %s4972_s3 }
  0x45   : > { %p3705_p2 = scmp.ne.s32.totalorder %s3703_s15, %s3704_s21  ;;  %p3711_p11 = scmp.lt.s32.totalorder %s3709_s12, %s3704_s21 }
  0x47   : > { %p3707_p7 = pnand %p3705_p2, %p4094_p3  ;;  %p3712_p12 = por %p3711_p11, %p3710_p10 }
  0x49   : > { %p3708_p9 = pneg %p3707_p7 }
  0x4b   : > { %p3713_p13 = pnand %p3712_p12, %p3708_p9 }
  0x4d   : > { %3716 = shalt.err (!%p3713_p13)
}
  0x4e   : > { %s3941_s7 = smov 1024   ;;  %s367_s23 = scalar_lea.hbm %s4935_s4, %s3305_s27 }
  0x4f   : > { %3420 = dma.hbm_to_vmem [thread:$0]  (!%p4084_p0), %s347_s28, 4096, %s349_s10, %s337_s6, %s3941_s7, %s3941_s7, %s3939_s26  }
  0x50   : > { %s368_s15 = sshll.u32 %s367_s23, 4  ;;  %s362_s21 = scalar_lea.vmem [#allocation11], %s2921_s20  ;;  %s4143_s15 = int_to_ptr.hbm [resolvable:$true] %s368_s15 }
  0x51   : > { %s370_s14 = sshll.u32 %s362_s21, 4  ;;  %s259_s1 = sshll.u32 %s4931_s0, 4  ;;  %s4145_s14 = int_to_ptr.vmem [resolvable:$true] %s370_s14  ;;  %s260_s1 = int_to_ptr.hbm [resolvable:$true] %s259_s1 }
  0x52   : > { %s3942_s3 = smov [#allocation3]   ;;  %s4973_s28 = smov 8  }
  0x53   : > { %s261_s9 = sshll.u32 %s3942_s3, 4  ;;  %s4974_s10 = smov 128   ;;  %s262_s9 = int_to_ptr.vmem [resolvable:$true] %s261_s9 }
  0x54   : > { %3407 = dma.hbm_to_vmem [thread:$0]  (!%p4047_p8), %s260_s1, 512, %s262_s9, [#allocation4], %s4974_s10, %s4974_s10, %s4973_s28  }
  0x55   : > { %s3762_s27 = sshra.s32 %s4115_s16, 4  ;;  %s3769_s23 = scalar_lea.hbm %s4933_s2, 32  ;;  %s3763_s27 = int_to_ptr.hbm [resolvable:$true] %s3762_s27 }
  0x56   : > { %s3764_s20 = scalar_lea.hbm %s3763_s27, 16  ;;  %p3770_p10 = scmp.lt.s32.totalorder %s3763_s27, %s4933_s2 }
  0x57   : > { %p3765_p2 = scmp.ne.s32.totalorder %s3763_s27, %s3764_s20  ;;  %p3771_p11 = scmp.lt.s32.totalorder %s3769_s23, %s3764_s20 }
  0x59   : > { %p3767_p7 = pnand %p3765_p2, %p4094_p3  ;;  %p3772_p12 = por %p3771_p11, %p3770_p10 }
  0x5b   : > { %p3768_p9 = pneg %p3767_p7 }
  0x5d   : > { %p3773_p13 = pnand %p3772_p12, %p3768_p9 }
  0x5f   : > { %3776 = shalt.err (!%p3773_p13)
}
  0x60   : > { %s4975_s3 = smov 4   ;;  %s4976_s9 = scalar_lea.sflag [#allocation7], %s4070_s24 }
  0x61   : > { %3417 = dma.hbm_to_vmem [thread:$0]  (!%p4084_p0), %s4115_s16, 256, %s4117_s19, %s4976_s9, %s3939_s26, %s3939_s26, %s4975_s3  }
  0x62   : > { %s3792_s17 = sshra.s32 %s4143_s15, 4  ;;  %s3799_s10 = scalar_lea.hbm %s4935_s4, 512  ;;  %s3793_s17 = int_to_ptr.hbm [resolvable:$true] %s3792_s17 }
  0x63   : > { %s3794_s12 = scalar_lea.hbm %s3793_s17, 256  ;;  %p3800_p9 = scmp.lt.s32.totalorder %s3793_s17, %s4935_s4 }
  0x64   : > { %p3795_p8 = scmp.ne.s32.totalorder %s3793_s17, %s3794_s12  ;;  %p3801_p10 = scmp.lt.s32.totalorder %s3799_s10, %s3794_s12 }
  0x66   : > { %p3797_p2 = pnand %p3795_p8, %p4094_p3  ;;  %p3802_p11 = por %p3801_p10, %p3800_p9 }
  0x68   : > { %p3798_p7 = pneg %p3797_p2 }
  0x6a   : > { %p3803_p12 = pnand %p3802_p11, %p3798_p7 }
  0x6c   : > { %3806 = shalt.err (!%p3803_p12)
}
  0x6d   : > { %3423 = dma.hbm_to_vmem [thread:$0]  (!%p4084_p0), %s4143_s15, 4096, %s4145_s14, %s337_s6, %s3941_s7, %s3941_s7, %s3939_s26  }
  0x6e   : > { %s2927_s16 = sshll.u32 %s4073_s25, 7  ;;  %s3307_s19 = sshll.u32 %s3934_s30, 7 }
  0x6f   : > { %s389_s23 = scalar_lea.hbm %s4936_s5, %s3307_s19  ;;  %s384_s29 = scalar_lea.vmem [#allocation12], %s2927_s16 }
  0x70   : > { %s391_s21 = sshll.u32 %s389_s23, 4  ;;  %s393_s3 = sshll.u32 %s384_s29, 4  ;;  %s392_s21 = int_to_ptr.hbm [resolvable:$true] %s391_s21  ;;  %s394_s3 = int_to_ptr.vmem [resolvable:$true] %s393_s3 }
  0x71   : > { %s381_s9 = scalar_lea.sflag [#allocation13], %s4070_s24  ;;  %s3822_s17 = sshra.s32 %s392_s21, 4  ;;  %s3823_s17 = int_to_ptr.hbm [resolvable:$true] %s3822_s17 }
  0x72   : > { %s3824_s12 = scalar_lea.hbm %s3823_s17, 128  ;;  %s3829_s30 = scalar_lea.hbm %s4936_s5, 256 }
  0x73   : > { %p3825_p13 = scmp.ne.s32.totalorder %s3823_s17, %s3824_s12  ;;  %p3830_p7 = scmp.lt.s32.totalorder %s3823_s17, %s4936_s5 }
  0x74   : > { %p3831_p9 = scmp.lt.s32.totalorder %s3829_s30, %s3824_s12 }
  0x75   : > { %p3827_p8 = pnand %p3825_p13, %p4094_p3 }
  0x76   : > { %p3832_p10 = por %p3831_p9, %p3830_p7 }
  0x77   : > { %p3828_p2 = pneg %p3827_p8 }
  0x79   : > { %p3833_p11 = pnand %p3832_p10, %p3828_p2 }
  0x7b   : > { %3836 = shalt.err (!%p3833_p11)
}
  0x7c   : > { %3426 = dma.hbm_to_vmem [thread:$0]  (!%p4084_p0), %s392_s21, 2048, %s394_s3, %s381_s9  }
  0x7d   : > { %402 = sbr.rel (%p4036_p6) target bundleno = 3144 (0xc48), region = 52  ;;  %s4977_s24 = sld [smem:[#allocation24_spill]] (!%p4036_p6) }
  0x82   : > { %3897 = dma.done.wait (%p71_p1), [#allocation4], 512  }
  0x83   : > { %3899 = vsyncadd (%p71_p1), [#allocation4], 4294966784  ;;  %s4978_s13 = sld [smem:[#allocation22_spill]]  ;;  %s409_s14 = sand.u32 1, %s4977_s24  }
  0x84   : > { %s410_s10 = scalar_lea.sflag [#allocation7], %s409_s14 }
  0x89   : > { %s411_s1 = sand.u32 1, %s4978_s13  }
  0x8a   : > { %s2932_s28 = sshll.u32 %s411_s1, 4 }
  0x8b   : > { %s413_s27 = scalar_lea.vmem [#allocation6], %s2932_s28 }
  0x8c   : > { %3901 = dma.done.wait (%p4032_p5), %s410_s10, 512  }
  0x8d   : > { %3903 = vsyncadd (%p4032_p5), %s410_s10, 4294966784  ;;  %s2934_s11 = sshll.u32 %s411_s1, 8  ;;  %s4219_s22 = scalar_lea.vmem [#allocation8], %s2932_s28 }
  0x8e   : > { %s430_s20 = scalar_lea.sflag [#allocation10], %s409_s14  ;;  %s4221_s16 = scalar_lea.vmem [#allocation9], %s2934_s11 }
  0x8f   : > { %3905 = dma.done.wait (%p4032_p5), %s430_s20, 8192  }
  0x90   : > { %3907 = vsyncadd (%p4032_p5), %s430_s20, 4294959104  ;;  %s2936_s19 = sshll.u32 %s411_s1, 7  ;;  %s4227_s8 = scalar_lea.vmem [#allocation11], %s2934_s11 }
  0x91   : > { %s450_s18 = scalar_lea.sflag [#allocation13], %s409_s14  ;;  %s4229_s23 = scalar_lea.vmem [#allocation12], %s2936_s19 }
  0x92   : > { %3909 = dma.done.wait (%p4032_p5), %s450_s18, 2048  }
  0x93   : > { %3911 = vsyncadd (%p4032_p5), %s450_s18, 4294965248 }
  0x94   : > { %3913 = dma.done.wait (%p71_p1), [#allocation13], 512  }
  0x95   : > { %3915 = vsyncadd (%p71_p1), [#allocation13], 4294966784  ;;  %511 = sbr.rel (%p2912_p4) target bundleno = 159 (0x9f), region = 84 }
  0x9a   : > { %v512_v0 = vld [vmem:[#allocation3] sm:$0xff]  ;;  %vm516_vm0 = vcmask 261120   ;;  %v513_v1 = vld [vmem:[#allocation3 + $0x8] sm:$0xff]  ;;  %v514_v2 = vld [vmem:[#allocation3 + $0x10] sm:$0xff] }
  0x9b   : > { %517 = vst.msk [vmem:[#allocation2] sm:$0xff] %vm516_vm0, %v512_v0  ;;  %v515_v3 = vld [vmem:[#allocation3 + $0x18] sm:$0xff] }
  0x9c   : > { %518 = vst.msk [vmem:[#allocation2 + $0x8] sm:$0xff] %vm516_vm0, %v513_v1 }
  0x9d   : > { %519 = vst.msk [vmem:[#allocation2 + $0x10] sm:$0xff] %vm516_vm0, %v514_v2 }
  0x9e   : > { %520 = vst.msk [vmem:[#allocation2 + $0x18] sm:$0xff] %vm516_vm0, %v515_v3 }
  0x9f PF: > { %v3309_v4 = vld [vmem:[%s413_s27 + $0x8] sm:$0xff]  ;;  %v3308_v5 = vld [vmem:[%s413_s27] sm:$0xff]  ;;  %vm557_vm1 = vcmask 261120   ;;  %s3943_s21 = smov 96   ;;  %s3944_s29 = smov 64   ;;  %vm595_vm2 = vcmask 64512  }
  0xa0   : > { %570 = vmatpush.bf16.msra.mxu0 %v3309_v4  ;;  %3376 = vmatpush.bf16.msra.mxu1 %v3309_v4  ;;  %v534_v14 = vld [vmem:[%s4229_s23 + $0x1] ss:$0 sm:$0xff]  ;;  %s3945_s3 = smov 120   ;;  %s3946_s9 = smov 88   ;;  %vm1264_vm3 = vcmask 130048   ;;  %vm1269_vm4 = vcmask 195584  }
  0xa1   : > { %s3947_s17 = smov 80   ;;  %s3948_s12 = smov 72  }
  0xa2   : > { %v4241_v6 = vld [vmem:[#allocation2] sm:$0xff]  ;;  %s3949_s26 = smov 104   ;;  %s3950_s25 = smov 112  }
  0xa3   : > { %v4243_v7 = vld [vmem:[#allocation2 + $0x8] sm:$0xff]  ;;  %s3951_s30 = smov 56   ;;  %s3952_s6 = smov 48  }
  0xa4   : > { %v4245_v8 = vld [vmem:[#allocation2 + $0x10] sm:$0xff]  ;;  %v525_v10 = vpack.c.bf16 %v4243_v7, %v4241_v6  ;;  %571 = vmatpush.bf16.msra.mxu0 %v3308_v5  ;;  %3377 = vmatpush.bf16.msra.mxu1 %v3308_v5  ;;  %s3953_s7 = smov 40   ;;  %s3954_s24 = smov 8  }
  0xa5   : > { %v4247_v9 = vld [vmem:[#allocation2 + $0x18] sm:$0xff]  ;;  %s3955_s13 = smov 16   ;;  %s3956_s15 = smov 24  }
  0xa6   : > { %v526_v11 = vpack.c.bf16 %v4247_v9, %v4245_v8  ;;  %s4980_s14 = sld [smem:[#allocation24_spill]] }
  0xa7   : > { %2949 = vmatmul.msk.bf16.vlgmr.msra.gmra.mxu0 %vm557_vm1, %v525_v10 }
  0xa8   : > { %2950 = vmatmul.msk.bf16.vlgmr.msra.gmra.mxu1 %vm557_vm1, %v526_v11 }
  0xac   : > { %p3297_p1 = scmp.ne.s32.totalorder %s4980_s14, 1 }
  0xad   : > { %s4981_s10 = sld [smem:[#allocation31_spill]] (!%p3297_p1) }
 0x124   : > { %v573_v12 = vpop.f32.mrf.mxu0 }
 0x125   : > { %v578_v13 = vpop.f32.mrf.mxu1  ;;  %v4269_v21 = vadd.f32 %v573_v12, %v534_v14 }
 0x126   : > { %v4256_v17 = vadd.f32 %v578_v13, %v534_v14 }
 0x12c   : > { %v575_v15 = vpop.f32.mrf.mxu0 }
 0x12d   : > { %v580_v16 = vpop.f32.mrf.mxu1  ;;  %v4258_v18 = vadd.f32 %v575_v15, %v534_v14 }
 0x12e   : > { %v4260_v19 = vadd.f32 %v580_v16, %v534_v14 }
 0x12f   : > { %589 = vrot.lane.b32.xlu1 %v4258_v18, %s3943_s21  ;;  %v4275_v22 = vpack.i.bf16 %v4269_v21, %v4258_v18 }
 0x130   : > { %593 = vrot.lane.b32.xlu0 %v4260_v19, %s3943_s21  ;;  %v4266_v20 = vpack.i.bf16 %v4256_v17, %v4260_v19 }
 0x132   : > { %3491 = vrot.lane.b32.xlu2 %v4266_v20, %s3944_s29 }
 0x137   : > { %587 = vrot.lane.b32.xlu1 %v4269_v21, %s3943_s21 }
 0x138   : > { %591 = vrot.lane.b32.xlu0 %v4256_v17, %s3943_s21 }
 0x13a   : > { %3496 = vrot.lane.b32.xlu2 %v4275_v22, %s3944_s29 }
 0x13f   : > { %750 = vrot.lane.b32.xlu1 %v4256_v17, %s3946_s9 }
 0x140   : > { %738 = vrot.lane.b32.xlu0 %v4269_v21, %s3945_s3 }
 0x142   : > { %910 = vrot.lane.b32.xlu2 %v4260_v19, %s3947_s17 }
 0x147   : > { %746 = vrot.lane.b32.xlu1 %v4269_v21, %s3946_s9 }
 0x148   : > { %742 = vrot.lane.b32.xlu0 %v4256_v17, %s3945_s3 }
 0x150   : > { %752 = vrot.lane.b32.xlu0 %v4260_v19, %s3946_s9 }
 0x158   : > { %748 = vrot.lane.b32.xlu0 %v4258_v18, %s3946_s9 }
 0x160   : > { %740 = vrot.lane.b32.xlu0 %v4258_v18, %s3945_s3 }
 0x18c   : > { %v3492_v23 = vpop.permute.xlu2 %3491 }
 0x18d   : > { %v3493_v24 = vunpack.i.l.bf16 %v3492_v23  ;;  %v3494_v25 = vunpack.i.h.bf16 %v3492_v23 }
 0x18f   : > { %721 = vmatpush.msra.mxu2 %v3493_v24  ;;  %3378 = vmatpush.msra.mxu3 %v3493_v24 }
 0x191   : > { %722 = vmatpush.msra.mxu2 %v3494_v25  ;;  %3379 = vmatpush.msra.mxu3 %v3494_v25 }
 0x194   : > { %v3497_v26 = vpop.permute.xlu2 %3496 }
 0x195   : > { %v3498_v27 = vunpack.i.l.bf16 %v3497_v26  ;;  %v3499_v28 = vunpack.i.h.bf16 %v3497_v26 }
 0x197   : > { %723 = vmatpush.msra.mxu2 %v3498_v27  ;;  %3380 = vmatpush.msra.mxu3 %v3498_v27 }
 0x199   : > { %724 = vmatpush.msra.mxu2 %v3499_v28  ;;  %3381 = vmatpush.msra.mxu3 %v3499_v28 }
 0x19c   : > { %v911_v29 = vpop.permute.xlu2 %910 }
 0x19d   : > { %2975 = vmatpush.xpose.msk.msrb.mxu2 %vm595_vm2, %v911_v29 }
 0x1a1   : > { %v590_v31 = vpop.permute.xlu1 %589 }
 0x1a2   : > { %v594_v30 = vpop.permute.xlu0 %593 }
 0x1a3   : > { %2951 = vmatpush.xpose.msk.msrb.mxu1 %vm595_vm2, %v594_v30 }
 0x1a9   : > { %v588_v33 = vpop.permute.xlu1 %587 }
 0x1aa   : > { %v592_v32 = vpop.permute.xlu0 %591 }
 0x1ab   : > { %2952 = vmatpush.xpose.msk.msrb.mxu1 %vm595_vm2, %v592_v32 }
 0x1af   : > { %2953 = vmatpush.xpose.msk.msrb.mxu1 %vm595_vm2, %v590_v31 }
 0x1b1   : > { %v751_v37 = vpop.permute.xlu1 %750 }
 0x1b2   : > { %v4294_v34 = vpop.permute.xlu0 %738 }
 0x1b3   : > { %2954 = vmatpush.xpose.msk.msrb.mxu1 %vm595_vm2, %v588_v33 }
 0x1b6   : > { %2955 = vmatmul.msk.f32.vlgmr.msrb.gmra.mxu1 %vm595_vm2, %v4269_v21 }
 0x1b9   : > { %v747_v39 = vpop.permute.xlu1 %746 }
 0x1ba   : > { %v4299_v35 = vpop.permute.xlu0 %742 }
 0x1be   : > { %2956 = vmatmul.msk.f32.gmra.mxu1 %vm595_vm2, %v4258_v18 }
 0x1c2   : > { %v753_v36 = vpop.permute.xlu0 %752 }
 0x1c3   : > { %2963 = vmatpush.xpose.msk.msrb.mxu3 %vm595_vm2, %v753_v36 }
 0x1c6   : > { %2957 = vmatmul.msk.f32.gmra.mxu1 %vm595_vm2, %v4256_v17 }
 0x1c7   : > { %2964 = vmatpush.xpose.msk.msrb.mxu3 %vm595_vm2, %v751_v37 }
 0x1ca   : > { %v749_v38 = vpop.permute.xlu0 %748 }
 0x1cb   : > { %2965 = vmatpush.xpose.msk.msrb.mxu3 %vm595_vm2, %v749_v38 }
 0x1ce   : > { %2958 = vmatmul.msk.f32.gmra.mxu1 %vm595_vm2, %v4260_v19 }
 0x1cf   : > { %2966 = vmatpush.xpose.msk.msrb.mxu3 %vm595_vm2, %v747_v39 }
 0x1d2   : > { %v4331_v48 = vpop.permute.xlu0 %740 }
 0x233   : > { %v629_v40 = vpop.f32.mrf.mxu1 }
 0x234   : > { %v641_v41 = vsel %vm557_vm1, %v629_v40, -inf }
 0x235   : > { %642 = vmax.xlane.f32.xlu0 %v641_v41 }
 0x23b   : > { %v632_v42 = vpop.f32.mrf.mxu1 }
 0x23c   : > { %v644_v43 = vsel %vm557_vm1, %v632_v42, -inf }
 0x23d   : > { %645 = vmax.xlane.f32.xlu1 %v644_v43 }
 0x243   : > { %v635_v44 = vpop.f32.mrf.mxu1 }
 0x244   : > { %v647_v45 = vsel %vm557_vm1, %v635_v44, -inf }
 0x245   : > { %648 = vmax.xlane.f32.xlu2 %v647_v45 }
 0x249   : > { %1068 = vrot.lane.b32.xlu0 %v4260_v19, %s3948_s12 }
 0x24b   : > { %v638_v46 = vpop.f32.mrf.mxu1 }
 0x24c   : > { %v650_v47 = vsel %vm557_vm1, %v638_v46, -inf }
 0x24d   : > { %651 = vmax.xlane.f32.xlu2 %v650_v47 }
 0x251   : > { %908 = vrot.lane.b32.xlu0 %v4256_v17, %s3947_s17 }
 0x256   : > { %906 = vrot.lane.b32.xlu1 %v4258_v18, %s3947_s17 }
 0x259   : > { %1066 = vrot.lane.b32.xlu0 %v4256_v17, %s3948_s12 }
 0x261   : > { %1064 = vrot.lane.b32.xlu0 %v4258_v18, %s3948_s12 }
 0x265   : > { %744 = vrot.lane.b32.xlu2 %v4260_v19, %s3945_s3 }
 0x269   : > { %1062 = vrot.lane.b32.xlu0 %v4269_v21, %s3948_s12 }
 0x271   : > { %1054 = vrot.lane.b32.xlu0 %v4269_v21, %s3949_s26 }
 0x279   : > { %1056 = vrot.lane.b32.xlu0 %v4258_v18, %s3949_s26 }
 0x281   : > { %902 = vrot.lane.b32.xlu0 %v4260_v19, %s3950_s25 }
 0x2a8   : > { %v643_v49 = vpop.xlane.xlu0 %642 }
 0x2a9   : > { %v653_v50 = vsub.f32 %v629_v40, %v643_v49 }
 0x2ab   : > { %v657_v51 = vmul.f32 1.442695, %v653_v50 }
 0x2ad   : > { %3560 = vpow2.f32 %v657_v51 }
 0x2b0   : > { %v646_v52 = vpop.xlane.xlu1 %645 }
 0x2b1   : > { %v654_v53 = vsub.f32 %v632_v42, %v646_v52 }
 0x2b3   : > { %v3561_v54 = vpop.eup %3560  ;;  %v659_v55 = vmul.f32 1.442695, %v654_v53 }
 0x2b4   : > { %v665_v56 = vsel %vm557_vm1, %v3561_v54, 0.0 }
 0x2b5   : > { %3562 = vpow2.f32 %v659_v55  ;;  %666 = vadd.xlane.f32.xlu1 %v665_v56 }
 0x2b8   : > { %v649_v57 = vpop.xlane.xlu2 %648 }
 0x2b9   : > { %v655_v58 = vsub.f32 %v635_v44, %v649_v57 }
 0x2bb   : > { %v3563_v59 = vpop.eup %3562  ;;  %v661_v60 = vmul.f32 1.442695, %v655_v58  ;;  %v1069_v61 = vpop.permute.xlu0 %1068 }
 0x2bc   : > { %v668_v62 = vsel %vm557_vm1, %v3563_v59, 0.0 }
 0x2bd   : > { %3564 = vpow2.f32 %v661_v60  ;;  %669 = vadd.xlane.f32.xlu2 %v668_v62 }
 0x2c0   : > { %v652_v63 = vpop.xlane.xlu2 %651 }
 0x2c1   : > { %v656_v0 = vsub.f32 %v638_v46, %v652_v63 }
 0x2c3   : > { %v3565_v1 = vpop.eup %3564  ;;  %v663_v2 = vmul.f32 1.442695, %v656_v0  ;;  %v909_v3 = vpop.permute.xlu0 %908 }
 0x2c4   : > { %2976 = vmatpush.xpose.msk.msrb.mxu2 %vm595_vm2, %v909_v3  ;;  %v671_v4 = vsel %vm557_vm1, %v3565_v1, 0.0 }
 0x2c5   : > { %3566 = vpow2.f32 %v663_v2  ;;  %672 = vadd.xlane.f32.xlu2 %v671_v4 }
 0x2c8   : > { %v907_v5 = vpop.permute.xlu1 %906  ;;  %v745_v12 = vpop.permute.xlu2 %744 }
 0x2c9   : > { %2977 = vmatpush.xpose.msk.msrb.mxu2 %vm595_vm2, %v907_v5 }
 0x2cb   : > { %v3567_v10 = vpop.eup %3566 }
 0x2cc   : > { %v674_v11 = vsel %vm557_vm1, %v3567_v10, 0.0 }
 0x2cd   : > { %675 = vadd.xlane.f32.xlu2 %v674_v11 }
 0x2ce   : > { %900 = vrot.lane.b32.xlu1 %v4256_v17, %s3950_s25 }
 0x2d6   : > { %1060 = vrot.lane.b32.xlu1 %v4260_v19, %s3949_s26  ;;  %v1067_v19 = vpop.permute.xlu0 %1066 }
 0x2de   : > { %3501 = vrot.lane.b32.xlu1 %v4266_v20, %s3951_s30 }
 0x2e5   : > { %904 = vrot.lane.b32.xlu2 %v4269_v21, %s3947_s17 }
 0x2ed   : > { %896 = vrot.lane.b32.xlu2 %v4269_v21, %s3950_s25  ;;  %v1065_v21 = vpop.permute.xlu0 %1064 }
 0x2f5   : > { %898 = vrot.lane.b32.xlu2 %v4258_v18, %s3950_s25  ;;  %v1063_v32 = vpop.permute.xlu0 %1062 }
 0x2fd   : > { %1058 = vrot.lane.b32.xlu2 %v4256_v17, %s3949_s26  ;;  %v1055_v39 = vpop.permute.xlu0 %1054 }
 0x305   : > { %v1057_v41 = vpop.permute.xlu0 %1056 }
 0x30d   : > { %v903_v42 = vpop.permute.xlu0 %902 }
 0x328   : > { %v667_v13 = vpop.xlane.xlu1 %666 }
 0x329   : > { %3568 = vrcp.f32 %v667_v13 }
 0x32f   : > { %v3569_v14 = vpop.eup %3568 }
 0x330   : > { %v670_v15 = vpop.xlane.xlu2 %669  ;;  %v681_v16 = vmul.f32 %v3569_v14, %v3561_v54 }
 0x331   : > { %3570 = vrcp.f32 %v670_v15 }
 0x332   : > { %2959 = vmatmul.msk.f32.vlgmr.msra.gmra.mxu2 %vm557_vm1, %v681_v16 }
 0x337   : > { %v3571_v23 = vpop.eup %3570 }
 0x338   : > { %v673_v24 = vpop.xlane.xlu2 %672  ;;  %v682_v25 = vmul.f32 %v3571_v23, %v3563_v59 }
 0x339   : > { %3572 = vrcp.f32 %v673_v24 }
 0x33a   : > { %2960 = vmatmul.msk.f32.gmra.mxu2 %vm557_vm1, %v682_v25 }
 0x33f   : > { %v3573_v18 = vpop.eup %3572 }
 0x340   : > { %v676_v26 = vpop.xlane.xlu2 %675  ;;  %v901_v17 = vpop.permute.xlu1 %900  ;;  %v683_v27 = vmul.f32 %v3573_v18, %v3565_v1 }
 0x341   : > { %3574 = vrcp.f32 %v676_v26 }
 0x342   : > { %2961 = vmatmul.msk.f32.vlgmr.msra.gmra.mxu3 %vm557_vm1, %v683_v27 }
 0x343   : > { %2987 = vmatpush.xpose.msk.msra.mxu3 %vm595_vm2, %v1069_v61 }
 0x347   : > { %v3575_v28 = vpop.eup %3574  ;;  %2988 = vmatpush.xpose.msk.msra.mxu3 %vm595_vm2, %v1067_v19 }
 0x348   : > { %v905_v29 = vpop.permute.xlu2 %904  ;;  %v1061_v30 = vpop.permute.xlu1 %1060  ;;  %v684_v31 = vmul.f32 %v3575_v28, %v3567_v10 }
 0x349   : > { %2978 = vmatpush.xpose.msk.msrb.mxu2 %vm595_vm2, %v905_v29 }
 0x34a   : > { %2962 = vmatmul.msk.f32.gmra.mxu3 %vm557_vm1, %v684_v31 }
 0x34b   : > { %2989 = vmatpush.xpose.msk.msra.mxu3 %vm595_vm2, %v1065_v21 }
 0x34f   : > { %2990 = vmatpush.xpose.msk.msra.mxu3 %vm595_vm2, %v1063_v32 }
 0x350   : > { %v897_v33 = vpop.permute.xlu2 %896  ;;  %v3502_v36 = vpop.permute.xlu1 %3501 }
 0x351   : > { %2979 = vmatmul.msk.f32.vlgmr.msrb.gmra.mxu2 %vm595_vm2, %v897_v33  ;;  %v3503_v37 = vunpack.i.l.bf16 %v3502_v36  ;;  %v3504_v38 = vunpack.i.h.bf16 %v3502_v36 }
 0x352   : > { %2967 = vmatmul.msk.f32.vlgmr.msrb.gmra.mxu3 %vm595_vm2, %v4294_v34 }
 0x353   : > { %879 = vmatpush.msrb.mxu0 %v3503_v37 }
 0x355   : > { %880 = vmatpush.msrb.mxu0 %v3504_v38 }
 0x358   : > { %v899_v40 = vpop.permute.xlu2 %898 }
 0x359   : > { %2980 = vmatmul.msk.f32.gmra.mxu2 %vm595_vm2, %v899_v40 }
 0x35a   : > { %2968 = vmatmul.msk.f32.gmra.mxu3 %vm595_vm2, %v4331_v48 }
 0x360   : > { %v1059_v34 = vpop.permute.xlu2 %1058 }
 0x361   : > { %2981 = vmatmul.msk.f32.gmra.mxu2 %vm595_vm2, %v901_v17 }
 0x362   : > { %2969 = vmatmul.msk.f32.gmra.mxu3 %vm595_vm2, %v4299_v35 }
 0x369   : > { %2982 = vmatmul.msk.f32.gmra.mxu2 %vm595_vm2, %v903_v42 }
 0x36a   : > { %2970 = vmatmul.msk.f32.gmra.mxu3 %vm595_vm2, %v745_v12 }
 0x372   : > { %2991 = vmatmul.msk.f32.vlgmr.msra.gmra.mxu3 %vm595_vm2, %v1055_v39 }
 0x37a   : > { %2992 = vmatmul.msk.f32.gmra.mxu3 %vm595_vm2, %v1057_v41 }
 0x382   : > { %2993 = vmatmul.msk.f32.gmra.mxu3 %vm595_vm2, %v1059_v34 }
 0x38a   : > { %2994 = vmatmul.msk.f32.gmra.mxu3 %vm595_vm2, %v1061_v30 }
 0x3b5   : > { %v4377_v43 = vpop.f32.mrf.mxu2 }
 0x3bd   : > { %v4381_v45 = vpop.f32.mrf.mxu2 }
 0x3c5   : > { %v4379_v44 = vpop.f32.mrf.mxu3 }
 0x3cd   : > { %v4383_v35 = vpop.f32.mrf.mxu3 }
 0x3d4   : > { %v945_v46 = vpop.f32.mrf.mxu2 }
 0x3d5   : > { %v787_v47 = vpop.f32.mrf.mxu3  ;;  %v957_v48 = vsel %vm557_vm1, %v945_v46, -inf }
 0x3d6   : > { %958 = vmax.xlane.f32.xlu0 %v957_v48  ;;  %v799_v54 = vsel %vm557_vm1, %v787_v47, -inf }
 0x3dc   : > { %v4386_v49 = vpop.f32.mrf.mxu2 }
 0x3dd   : > { %v4388_v50 = vpop.f32.mrf.mxu3  ;;  %v960_v51 = vsel %vm557_vm1, %v4386_v49, -inf }
 0x3de   : > { %961 = vmax.xlane.f32.xlu2 %v960_v51  ;;  %v802_v61 = vsel %vm557_vm1, %v4388_v50, -inf }
 0x3e4   : > { %v4392_v52 = vpop.f32.mrf.mxu2 }
 0x3e5   : > { %v4394_v53 = vpop.f32.mrf.mxu3  ;;  %v963_v55 = vsel %vm557_vm1, %v4392_v52, -inf }
 0x3e6   : > { %800 = vmax.xlane.f32.xlu2 %v799_v54  ;;  %964 = vmax.xlane.f32.xlu1 %v963_v55  ;;  %v805_v57 = vsel %vm557_vm1, %v4394_v53, -inf }
 0x3ea   : > { %3511 = vrot.lane.b32.xlu0 %v4266_v20, %s3952_s6 }
 0x3ec   : > { %v4418_v1 = vpop.f32.mrf.mxu2 }
 0x3ed   : > { %v4401_v56 = vpop.f32.mrf.mxu3  ;;  %v966_v3 = vsel %vm557_vm1, %v4418_v1, -inf }
 0x3ee   : > { %806 = vmax.xlane.f32.xlu1 %v805_v57  ;;  %v808_v4 = vsel %vm557_vm1, %v4401_v56, -inf }
 0x3f5   : > { %v1103_v58 = vpop.f32.mrf.mxu3 }
 0x3f6   : > { %v1115_v59 = vsel %vm557_vm1, %v1103_v58, -inf }
 0x3f7   : > { %1116 = vmax.xlane.f32.xlu1 %v1115_v59 }
 0x3fd   : > { %v4408_v60 = vpop.f32.mrf.mxu3 }
 0x3fe   : > { %3506 = vrot.lane.b32.xlu2 %v4275_v22, %s3951_s30  ;;  %v1118_v63 = vsel %vm557_vm1, %v4408_v60, -inf }
 0x405   : > { %v4412_v62 = vpop.f32.mrf.mxu3 }
 0x406   : > { %v1121_v5 = vsel %vm557_vm1, %v4412_v62, -inf }
 0x40d   : > { %v4416_v0 = vpop.f32.mrf.mxu3 }
 0x40e   : > { %v1124_v2 = vsel %vm557_vm1, %v4416_v0, -inf }
 0x414   : > { %803 = vmax.xlane.f32.xlu0 %v802_v61 }
 0x41c   : > { %1119 = vmax.xlane.f32.xlu0 %v1118_v63 }
 0x424   : > { %1125 = vmax.xlane.f32.xlu0 %v1124_v2 }
 0x427   : > { %967 = vmax.xlane.f32.xlu2 %v966_v3 }
 0x42f   : > { %809 = vmax.xlane.f32.xlu2 %v808_v4 }
 0x437   : > { %1122 = vmax.xlane.f32.xlu2 %v1121_v5 }
 0x449   : > { %v959_v10 = vpop.xlane.xlu0 %958 }
 0x44a   : > { %v969_v11 = vsub.f32 %v945_v46, %v959_v10 }
 0x44c   : > { %v973_v12 = vmul.f32 1.442695, %v969_v11 }
 0x44e   : > { %3576 = vpow2.f32 %v973_v12 }
 0x451   : > { %v4428_v13 = vpop.xlane.xlu2 %961 }
 0x454   : > { %v4430_v14 = vpop.eup %3576 }
 0x455   : > { %v981_v15 = vsel %vm557_vm1, %v4430_v14, 0.0 }
 0x456   : > { %982 = vadd.xlane.f32.xlu0 %v981_v15 }
 0x459   : > { %v801_v16 = vpop.xlane.xlu2 %800  ;;  %v965_v19 = vpop.xlane.xlu1 %964 }
 0x45a   : > { %v811_v23 = vsub.f32 %v787_v47, %v801_v16  ;;  %v971_v55 = vsub.f32 %v4392_v52, %v965_v19  ;;  %v970_v52 = vsub.f32 %v4386_v49, %v4428_v13 }
 0x45c   : > { %v815_v24 = vmul.f32 1.442695, %v811_v23  ;;  %v3512_v25 = vpop.permute.xlu0 %3511  ;;  %v977_v57 = vmul.f32 1.442695, %v971_v55  ;;  %v975_v3 = vmul.f32 1.442695, %v970_v52 }
 0x45d   : > { %v3513_v18 = vunpack.i.l.bf16 %v3512_v25  ;;  %v3514_v21 = vunpack.i.h.bf16 %v3512_v25 }
 0x45e   : > { %3578 = vpow2.f32 %v815_v24 }
 0x45f   : > { %1037 = vmatpush.msra.mxu1 %v3513_v18 }
 0x461   : > { %1038 = vmatpush.msra.mxu1 %v3514_v21  ;;  %v3507_v26 = vpop.permute.xlu2 %3506  ;;  %v807_v17 = vpop.xlane.xlu1 %806 }
 0x462   : > { %v3508_v27 = vunpack.i.l.bf16 %v3507_v26  ;;  %v3509_v29 = vunpack.i.h.bf16 %v3507_v26  ;;  %v813_v40 = vsub.f32 %v4394_v53, %v807_v17 }
 0x464   : > { %v4434_v28 = vpop.eup %3578  ;;  %881 = vmatpush.msrb.mxu0 %v3508_v27  ;;  %v819_v42 = vmul.f32 1.442695, %v813_v40 }
 0x465   : > { %v823_v30 = vsel %vm557_vm1, %v4434_v28, 0.0 }
 0x466   : > { %824 = vadd.xlane.f32.xlu0 %v823_v30  ;;  %882 = vmatpush.msrb.mxu0 %v3509_v29 }
 0x46a   : > { %v1117_v31 = vpop.xlane.xlu1 %1116 }
 0x46b   : > { %v1127_v32 = vsub.f32 %v1103_v58, %v1117_v31 }
 0x46d   : > { %v1131_v33 = vmul.f32 1.442695, %v1127_v32 }
 0x46f   : > { %3580 = vpow2.f32 %v1131_v33 }
 0x475   : > { %v4438_v36 = vpop.eup %3580 }
 0x476   : > { %v1139_v37 = vsel %vm557_vm1, %v4438_v36, 0.0 }
 0x477   : > { %1140 = vadd.xlane.f32.xlu2 %v1139_v37 }
 0x487   : > { %v804_v38 = vpop.xlane.xlu0 %803 }
 0x488   : > { %v812_v39 = vsub.f32 %v4388_v50, %v804_v38 }
 0x48a   : > { %v817_v41 = vmul.f32 1.442695, %v812_v39 }
 0x48c   : > { %3582 = vpow2.f32 %v817_v41 }
 0x48d   : > { %3584 = vpow2.f32 %v819_v42 }
 0x48f   : > { %3526 = vrot.lane.b32.xlu2 %v4275_v22, %s3953_s7 }
 0x492   : > { %v4445_v34 = vpop.eup %3582 }
 0x493   : > { %v826_v46 = vsel %vm557_vm1, %v4445_v34, 0.0  ;;  %v4449_v47 = vpop.eup %3584 }
 0x494   : > { %827 = vadd.xlane.f32.xlu0 %v826_v46  ;;  %v829_v50 = vsel %vm557_vm1, %v4449_v47, 0.0 }
 0x49a   : > { %v968_v48 = vpop.xlane.xlu2 %967 }
 0x49b   : > { %v972_v4 = vsub.f32 %v4418_v1, %v968_v48 }
 0x49c   : > { %830 = vadd.xlane.f32.xlu0 %v829_v50 }
 0x4a2   : > { %v810_v51 = vpop.xlane.xlu2 %809 }
 0x4a3   : > { %v814_v53 = vsub.f32 %v4401_v56, %v810_v51  ;;  %v1120_v56 = vpop.xlane.xlu0 %1119 }
 0x4a4   : > { %v1128_v1 = vsub.f32 %v4408_v60, %v1120_v56 }
 0x4a5   : > { %v821_v54 = vmul.f32 1.442695, %v814_v53 }
 0x4a6   : > { %v1133_v24 = vmul.f32 1.442695, %v1128_v1 }
 0x4a7   : > { %3586 = vpow2.f32 %v821_v54 }
 0x4a8   : > { %3588 = vpow2.f32 %v977_v57 }
 0x4a9   : > { %3590 = vpow2.f32 %v975_v3 }
 0x4aa   : > { %v1123_v10 = vpop.xlane.xlu2 %1122 }
 0x4ab   : > { %v1126_v2 = vpop.xlane.xlu0 %1125  ;;  %v1129_v12 = vsub.f32 %v4412_v62, %v1123_v10 }
 0x4ac   : > { %v1130_v19 = vsub.f32 %v4416_v0, %v1126_v2 }
 0x4ad   : > { %v4455_v58 = vpop.eup %3586 }
 0x4ae   : > { %v832_v59 = vsel %vm557_vm1, %v4455_v58, 0.0  ;;  %v4460_v61 = vpop.eup %3588  ;;  %v1137_v25 = vmul.f32 1.442695, %v1130_v19 }
 0x4af   : > { %833 = vadd.xlane.f32.xlu1 %v832_v59  ;;  %v987_v63 = vsel %vm557_vm1, %v4460_v61, 0.0  ;;  %v4471_v11 = vpop.eup %3590 }
 0x4b0   : > { %3516 = vrot.lane.b32.xlu0 %v4266_v20, %s3953_s7  ;;  %v979_v20 = vmul.f32 1.442695, %v972_v4  ;;  %v984_v49 = vsel %vm557_vm1, %v4471_v11, 0.0 }
 0x4b2   : > { %3592 = vpow2.f32 %v979_v20 }
 0x4b8   : > { %988 = vadd.xlane.f32.xlu2 %v987_v63  ;;  %v4476_v13 = vpop.eup %3592 }
 0x4b9   : > { %v990_v23 = vsel %vm557_vm1, %v4476_v13, 0.0 }
 0x4c8   : > { %3521 = vrot.lane.b32.xlu1 %v4275_v22, %s3952_s6  ;;  %v1135_v22 = vmul.f32 1.442695, %v1129_v12 }
 0x4c9   : > { %v4469_v5 = vpop.xlane.xlu0 %982 }
 0x4d9   : > { %v825_v15 = vpop.xlane.xlu0 %824 }
 0x4da   : > { %3594 = vrcp.f32 %v825_v15  ;;  %985 = vadd.xlane.f32.xlu0 %v984_v49 }
 0x4db   : > { %3596 = vpow2.f32 %v1135_v22 }
 0x4dc   : > { %3598 = vpow2.f32 %v1133_v24 }
 0x4dd   : > { %3600 = vpow2.f32 %v1137_v25 }
 0x4e0   : > { %v3595_v16 = vpop.eup %3594 }
 0x4e1   : > { %v839_v62 = vmul.f32 %v3595_v16, %v4434_v28  ;;  %v4484_v18 = vpop.eup %3596 }
 0x4e2   : > { %991 = vadd.xlane.f32.xlu0 %v990_v23  ;;  %v1145_v60 = vsel %vm557_vm1, %v4484_v18, 0.0  ;;  %v4488_v0 = vpop.eup %3598 }
 0x4e3   : > { %2971 = vmatmul.msk.f32.vlgmr.msrb.gmra.mxu0 %vm557_vm1, %v839_v62  ;;  %v4490_v21 = vpop.eup %3600  ;;  %v1142_v26 = vsel %vm557_vm1, %v4488_v0, 0.0 }
 0x4e4   : > { %v1148_v17 = vsel %vm557_vm1, %v4490_v21, 0.0 }
 0x4ea   : > { %1146 = vadd.xlane.f32.xlu0 %v1145_v60  ;;  %v1141_v33 = vpop.xlane.xlu2 %1140 }
 0x4f2   : > { %1143 = vadd.xlane.f32.xlu1 %v1142_v26  ;;  %1149 = vadd.xlane.f32.xlu0 %v1148_v17  ;;  %v3527_v40 = vpop.permute.xlu2 %3526 }
 0x4f3   : > { %v3528_v42 = vunpack.i.l.bf16 %v3527_v40 }
 0x507   : > { %v828_v27 = vpop.xlane.xlu0 %827 }
 0x508   : > { %3602 = vrcp.f32 %v828_v27 }
 0x50e   : > { %v3603_v28 = vpop.eup %3602 }
 0x50f   : > { %v831_v29 = vpop.xlane.xlu0 %830  ;;  %v840_v30 = vmul.f32 %v3603_v28, %v4445_v34  ;;  %v3529_v34 = vunpack.i.h.bf16 %v3527_v40 }
 0x510   : > { %3604 = vrcp.f32 %v831_v29 }
 0x511   : > { %2972 = vmatmul.msk.f32.gmra.mxu0 %vm557_vm1, %v840_v30  ;;  %v3311_v30 = vld [vmem:[%s4219_s22 + $0x8] sm:$0xff] }
 0x512   : > { %1304 = vmatpush.bf16.msra.mxu2 %v3311_v30 }
 0x516   : > { %v3605_v31 = vpop.eup %3604 }
 0x517   : > { %v841_v32 = vmul.f32 %v3605_v31, %v4449_v47  ;;  %v3310_v31 = vld [vmem:[%s4219_s22] sm:$0xff] }
 0x518   : > { %1305 = vmatpush.bf16.msra.mxu2 %v3310_v31 }
 0x519   : > { %2973 = vmatmul.msk.f32.gmra.mxu0 %vm557_vm1, %v841_v32 }
 0x522   : > { %v3517_v37 = vpop.permute.xlu0 %3516  ;;  %v834_v38 = vpop.xlane.xlu1 %833 }
 0x523   : > { %v3518_v39 = vunpack.i.l.bf16 %v3517_v37  ;;  %3606 = vrcp.f32 %v834_v38  ;;  %v3519_v41 = vunpack.i.h.bf16 %v3517_v37 }
 0x524   : > { %3608 = vrcp.f32 %v1141_v33 }
 0x525   : > { %1195 = vmatpush.msra.mxu0 %v3518_v39  ;;  %3610 = vrcp.f32 %v4469_v5 }
 0x527   : > { %1196 = vmatpush.msra.mxu0 %v3519_v41 }
 0x529   : > { %v3607_v46 = vpop.eup %3606  ;;  %1197 = vmatpush.msra.mxu0 %v3528_v42 }
 0x52a   : > { %v842_v48 = vmul.f32 %v3607_v46, %v4455_v58  ;;  %v3609_v47 = vpop.eup %3608 }
 0x52b   : > { %1198 = vmatpush.msra.mxu0 %v3529_v34  ;;  %v1155_v50 = vmul.f32 %v3609_v47, %v4438_v36  ;;  %v3611_v53 = vpop.eup %3610  ;;  %v989_v59 = vpop.xlane.xlu2 %988 }
 0x52c   : > { %2974 = vmatmul.msk.f32.gmra.mxu0 %vm557_vm1, %v842_v48  ;;  %v997_v57 = vmul.f32 %v3611_v53, %v4430_v14 }
 0x534   : > { %2995 = vmatmul.msk.f32.vlgmr.msra.gmra.mxu0 %vm557_vm1, %v1155_v50 }
 0x53a   : > { %v3522_v51 = vpop.permute.xlu1 %3521 }
 0x53b   : > { %v3523_v54 = vunpack.i.l.bf16 %v3522_v51  ;;  %v3524_v55 = vunpack.i.h.bf16 %v3522_v51 }
 0x53d   : > { %1039 = vmatpush.msra.mxu1 %v3523_v54 }
 0x53f   : > { %1040 = vmatpush.msra.mxu1 %v3524_v55 }
 0x540   : > { %2983 = vmatmul.msk.f32.vlgmr.msra.gmra.mxu1 %vm557_vm1, %v997_v57 }
 0x54d   : > { %v986_v58 = vpop.xlane.xlu0 %985 }
 0x54e   : > { %3612 = vrcp.f32 %v986_v58 }
 0x54f   : > { %3614 = vrcp.f32 %v989_v59 }
 0x554   : > { %v3613_v63 = vpop.eup %3612 }
 0x555   : > { %v998_v36 = vmul.f32 %v3613_v63, %v4471_v11  ;;  %v992_v56 = vpop.xlane.xlu0 %991  ;;  %v3615_v52 = vpop.eup %3614 }
 0x556   : > { %3616 = vrcp.f32 %v992_v56  ;;  %v999_v2 = vmul.f32 %v3615_v52, %v4460_v61 }
 0x557   : > { %2984 = vmatmul.msk.f32.gmra.mxu1 %vm557_vm1, %v998_v36 }
 0x55c   : > { %v3617_v14 = vpop.eup %3616 }
 0x55d   : > { %v1000_v4 = vmul.f32 %v3617_v14, %v4476_v13  ;;  %v1147_v5 = vpop.xlane.xlu0 %1146 }
 0x55f   : > { %2985 = vmatmul.msk.f32.gmra.mxu1 %vm557_vm1, %v999_v2 }
 0x560   : > { %v884_v22 = vpop.f32.mrf.mxu0 }
 0x565   : > { %v1144_v3 = vpop.xlane.xlu1 %1143  ;;  %v1150_v11 = vpop.xlane.xlu0 %1149 }
 0x566   : > { %3618 = vrcp.f32 %v1144_v3 }
 0x567   : > { %2986 = vmatmul.msk.f32.gmra.mxu1 %vm557_vm1, %v1000_v4  ;;  %3620 = vrcp.f32 %v1147_v5 }
 0x568   : > { %3622 = vrcp.f32 %v1150_v11 }
 0x56c   : > { %v3619_v20 = vpop.eup %3618 }
 0x56d   : > { %v1156_v10 = vmul.f32 %v3619_v20, %v4488_v0  ;;  %v3621_v12 = vpop.eup %3620 }
 0x56e   : > { %v1157_v61 = vmul.f32 %v3621_v12, %v4484_v18  ;;  %v3623_v15 = vpop.eup %3622 }
 0x56f   : > { %2996 = vmatmul.msk.f32.gmra.mxu0 %vm557_vm1, %v1156_v10  ;;  %v1158_v49 = vmul.f32 %v3623_v15, %v4490_v21  ;;  %v535_v10 = vld [vmem:[%s4229_s23 + $0x2] ss:$0 sm:$0xff] }
 0x577   : > { %2997 = vmatmul.msk.f32.gmra.mxu0 %vm557_vm1, %v1157_v61 }
 0x57f   : > { %2998 = vmatmul.msk.f32.gmra.mxu0 %vm557_vm1, %v1158_v49 }
 0x58e   : > { %v887_v13 = vpop.f32.mrf.mxu0 }
 0x58f   : > { %v3530_v1 = vpack.i.bf16 %v887_v13, %v884_v22 }
 0x591   : > { %3531 = vrot.lane.b32.xlu0 %v3530_v1, %s3954_s24 }
 0x596   : > { %v890_v16 = vpop.f32.mrf.mxu0 }
 0x5a9   : > { %v893_v19 = vpop.f32.mrf.mxu0 }
 0x5aa   : > { %v3545_v23 = vpack.i.bf16 %v893_v19, %v890_v16 }
 0x5ac   : > { %3546 = vrot.lane.b32.xlu0 %v3545_v23, %s3954_s24 }
 0x5b1   : > { %v1200_v0 = vpop.f32.mrf.mxu0 }
 0x5bd   : > { %v1042_v62 = vpop.f32.mrf.mxu1 }
 0x5d4   : > { %v1045_v24 = vpop.f32.mrf.mxu1 }
 0x5d5   : > { %v3535_v25 = vpack.i.bf16 %v1045_v24, %v1042_v62 }
 0x5d7   : > { %3536 = vrot.lane.b32.xlu1 %v3535_v25, %s3955_s13  ;;  %v3957_v25 = vmov 32.0  }
 0x5d8   : > { %3624 = vrcp.f32 %v3957_v25 }
 0x5dc   : > { %v1048_v18 = vpop.f32.mrf.mxu1 }
 0x5e4   : > { %v1051_v60 = vpop.f32.mrf.mxu1 }
 0x5e5   : > { %v3550_v21 = vpack.i.bf16 %v1051_v60, %v1048_v18 }
 0x5e7   : > { %3551 = vrot.lane.b32.xlu1 %v3550_v21, %s3955_s13 }
 0x5ec   : > { %v1203_v26 = vpop.f32.mrf.mxu0 }
 0x5ed   : > { %v3540_v17 = vpack.i.bf16 %v1203_v26, %v1200_v0 }
 0x5ef   : > { %3541 = vrot.lane.b32.xlu2 %v3540_v17, %s3956_s15 }
 0x5f4   : > { %v1206_v27 = vpop.f32.mrf.mxu0 }
 0x5fc   : > { %v1209_v28 = vpop.f32.mrf.mxu0 }
 0x5fd   : > { %v3555_v29 = vpack.i.bf16 %v1209_v28, %v1206_v27 }
 0x5ff   : > { %3556 = vrot.lane.b32.xlu0 %v3555_v29, %s3956_s15 }
 0x603   : > { %v3532_v32 = vpop.permute.xlu0 %3531 }
 0x604   : > { %v3534_v33 = vunpack.i.h.bf16 %v3532_v32  ;;  %v3533_v37 = vunpack.i.l.bf16 %v3532_v32 }
 0x606   : > { %v1261_v42 = vsel %vm595_vm2, %v4381_v45, %v3534_v33  ;;  %v1260_v46 = vsel %vm595_vm2, %v4377_v43, %v3533_v37 }
 0x61e   : > { %v3547_v55 = vpop.permute.xlu0 %3546 }
 0x61f   : > { %v3549_v45 = vunpack.i.h.bf16 %v3547_v55  ;;  %v3548_v58 = vunpack.i.l.bf16 %v3547_v55 }
 0x621   : > { %v1263_v36 = vsel %vm595_vm2, %v4383_v35, %v3549_v45  ;;  %v1262_v56 = vsel %vm595_vm2, %v4379_v44, %v3548_v58  ;;  %v3083_v45 = vld [vmem:[%s4221_s16 + $0x88] sm:$0xf] }
 0x622   : > { %v3337_v58 = vld [vmem:[%s4221_s16 + $0xc4] sm:$0xf0] }
 0x649   : > { %v3537_v38 = vpop.permute.xlu1 %3536  ;;  %v3542_v41 = vpop.permute.xlu2 %3541 }
 0x64a   : > { %v3539_v39 = vunpack.i.h.bf16 %v3537_v38  ;;  %v3538_v40 = vunpack.i.l.bf16 %v3537_v38  ;;  %v3544_v34 = vunpack.i.h.bf16 %v3542_v41  ;;  %v3543_v48 = vunpack.i.l.bf16 %v3542_v41 }
 0x64c   : > { %v1265_v47 = vsel %vm1264_vm3, %v1260_v46, %v3538_v40  ;;  %v1266_v50 = vsel %vm1264_vm3, %v1261_v42, %v3539_v39 }
 0x64d   : > { %v1271_v51 = vsel %vm1269_vm4, %v1266_v50, %v3544_v34  ;;  %v1270_v53 = vsel %vm1269_vm4, %v1265_v47, %v3543_v48  ;;  %v3328_v50 = vld [vmem:[%s4221_s16 + $0x84] sm:$0xf] }
 0x64e   : > { %v1274_v54 = vpack.c.bf16 %v1271_v51, %v1270_v53  ;;  %v3077_v51 = vld [vmem:[%s4221_s16 + $0xc0] sm:$0xf0]  ;;  %v3075_v53 = vld [vmem:[%s4221_s16 + $0x80] sm:$0xf] }
 0x64f   : > { %v3080_v55 = vor.u32 %v3328_v50, %v3077_v51  ;;  %v3091_v50 = vld [vmem:[%s4221_s16 + $0x90] sm:$0xf] }
 0x650   : > { %3007 = vmatmul.msk.bf16.vlgmr.msra.gmra.mxu2 %vm557_vm1, %v1274_v54  ;;  %v3338_v51 = vld [vmem:[%s4221_s16 + $0xcc] sm:$0xf0] }
 0x651   : > { %1683 = vmatpush.bf16.msrb.mxu3 %v3080_v55  ;;  %v3099_v55 = vld [vmem:[%s4221_s16 + $0x98] sm:$0xf] }
 0x659   : > { %v3552_v57 = vpop.permute.xlu1 %3551 }
 0x65a   : > { %v3554_v59 = vunpack.i.h.bf16 %v3552_v57  ;;  %v3553_v43 = vunpack.i.l.bf16 %v3552_v57  ;;  %v3336_v57 = vld [vmem:[%s4221_s16 + $0xbc] sm:$0xf0] }
 0x65c   : > { %v1267_v14 = vsel %vm1264_vm3, %v1262_v56, %v3553_v43  ;;  %v1268_v3 = vsel %vm1264_vm3, %v1263_v36, %v3554_v59  ;;  %v3076_v43 = vor.u32 %v3336_v57, %v3075_v53  ;;  %v3329_v36 = vld [vmem:[%s4221_s16 + $0x8c] sm:$0xf]  ;;  %v3339_v57 = vld [vmem:[%s4221_s16 + $0xd4] sm:$0xf0] }
 0x65d   : > { %v3085_v56 = vld [vmem:[%s4221_s16 + $0xc8] sm:$0xf0] }
 0x65e   : > { %1664 = vmatpush.bf16.msrb.mxu1 %v3076_v43  ;;  %v3029_v43 = vld [vmem:[%s4221_s16 + $0x50] sm:$0xf0] }
 0x671   : > { %v3557_v63 = vpop.permute.xlu0 %3556 }
 0x672   : > { %v3559_v52 = vunpack.i.h.bf16 %v3557_v63  ;;  %v3558_v2 = vunpack.i.l.bf16 %v3557_v63  ;;  %v3084_v63 = vor.u32 %v3337_v58, %v3083_v45  ;;  %v3100_v58 = vor.u32 %v3339_v57, %v3099_v55  ;;  %v3051_v55 = vld [vmem:[%s4221_s16 + $0x28] sm:$0xf] }
 0x673   : > { %v3325_v57 = vld [vmem:[%s4221_s16 + $0x64] sm:$0xf0] }
 0x674   : > { %v1272_v4 = vsel %vm1269_vm4, %v1267_v14, %v3558_v2  ;;  %v1273_v5 = vsel %vm1269_vm4, %v1268_v3, %v3559_v52  ;;  %v3088_v52 = vor.u32 %v3329_v36, %v3085_v56  ;;  %1702 = vmatpush.bf16.msrb.mxu0 %v3084_v63  ;;  %v3011_v14 = vld [vmem:[%s4221_s16] sm:$0xf]  ;;  %v3315_v63 = vld [vmem:[%s4221_s16 + $0x1c] sm:$0xf] }
 0x675   : > { %v1275_v20 = vpack.c.bf16 %v1273_v5, %v1272_v4  ;;  %v3320_v3 = vld [vmem:[%s4221_s16 + $0x3c] sm:$0xf0]  ;;  %v3312_v5 = vld [vmem:[%s4221_s16 + $0x4] sm:$0xf] }
 0x676   : > { %1721 = vmatpush.bf16.msrb.mxu2 %v3088_v52  ;;  %v3012_v4 = vor.u32 %v3320_v3, %v3011_v14  ;;  %v3037_v52 = vld [vmem:[%s4221_s16 + $0x58] sm:$0xf0]  ;;  %v3322_v14 = vld [vmem:[%s4221_s16 + $0x4c] sm:$0xf0] }
 0x677   : > { %3008 = vmatmul.msk.bf16.gmra.mxu2 %vm557_vm1, %v1275_v20  ;;  %v3013_v20 = vld [vmem:[%s4221_s16 + $0x40] sm:$0xf0]  ;;  %v3040_v3 = vor.u32 %v3315_v63, %v3037_v52  ;;  %v3342_v52 = vld [vmem:[%s4221_s16 + $0xec] sm:$0xf0] }
 0x678   : > { %1665 = vmatpush.bf16.msrb.mxu1 %v3012_v4 }
 0x6d3   : > { %v1307_v11 = vpop.f32.mrf.mxu2 }
 0x6d4   : > { %v1308_v12 = vadd.f32 %v1307_v11, %v535_v10  ;;  %v3016_v11 = vor.u32 %v3312_v5, %v3013_v20  ;;  %v3035_v5 = vld [vmem:[%s4221_s16 + $0x18] sm:$0xf] }
 0x6d5   : > { %v3323_v20 = vld [vmem:[%s4221_s16 + $0x54] sm:$0xf0] }
 0x6d6   : > { %v1317_v35 = vadd.f32 %v1308_v12, %v4241_v6  ;;  %v3321_v12 = vld [vmem:[%s4221_s16 + $0x44] sm:$0xf0]  ;;  %1684 = vmatpush.bf16.msrb.mxu3 %v3016_v11 }
 0x6d8   : > { %v1321_v44 = vsel %vm557_vm1, %v1317_v35, 0.0 }
 0x6d9   : > { %1322 = vadd.xlane.f32.xlu2 %v1321_v44  ;;  %v3021_v44 = vld [vmem:[%s4221_s16 + $0x48] sm:$0xf0] }
 0x6db   : > { %v1309_v61 = vpop.f32.mrf.mxu2 }
 0x6dc   : > { %v1310_v15 = vadd.f32 %v1309_v61, %v535_v10 }
 0x6de   : > { %v1318_v49 = vadd.f32 %v1310_v15, %v4243_v7  ;;  %v3625_v7 = vpop.eup %3624 }
 0x6df   : > { %v1334_v18 = vmul.f32 32.0, %v3625_v7  ;;  %vm1338_vm5 = vweird.f32 %v3625_v7 }
 0x6e0   : > { %v1324_v22 = vsel %vm557_vm1, %v1318_v49, 0.0 }
 0x6e1   : > { %1325 = vadd.xlane.f32.xlu1 %v1324_v22  ;;  %v1335_v60 = vsub.f32 1.0, %v1334_v18 }
 0x6e3   : > { %v1336_v0 = vmul.f32 %v3625_v7, %v1335_v60 }
 0x6e5   : > { %v1337_v21 = vadd.f32 %v3625_v7, %v1336_v0 }
 0x6e7   : > { %v4548_v26 = vsel %vm1338_vm5, %v3625_v7, %v1337_v21 }
 0x6fa   : > { %v1312_v13 = vpop.f32.mrf.mxu2 }
 0x6fb   : > { %v1313_v1 = vadd.f32 %v1312_v13, %v535_v10 }
 0x6fd   : > { %v1319_v16 = vadd.f32 %v1313_v1, %v4245_v8 }
 0x6ff   : > { %v1327_v19 = vsel %vm557_vm1, %v1319_v16, 0.0 }
 0x700   : > { %1328 = vadd.xlane.f32.xlu0 %v1327_v19 }
 0x702   : > { %v1314_v23 = vpop.f32.mrf.mxu2 }
 0x703   : > { %v1315_v62 = vadd.f32 %v1314_v23, %v535_v10  ;;  %v3019_v10 = vld [vmem:[%s4221_s16 + $0x8] sm:$0xf] }
 0x704   : > { %v3020_v61 = vor.u32 %v3321_v12, %v3019_v10  ;;  %v3036_v12 = vor.u32 %v3323_v20, %v3035_v5  ;;  %v3318_v20 = vld [vmem:[%s4221_s16 + $0x34] sm:$0xf] }
 0x705   : > { %v1320_v6 = vadd.f32 %v1315_v62, %v4247_v9 }
 0x706   : > { %1703 = vmatpush.bf16.msrb.mxu0 %v3020_v61 }
 0x707   : > { %v1330_v24 = vsel %vm557_vm1, %v1320_v6, 0.0 }
 0x708   : > { %1331 = vadd.xlane.f32.xlu2 %v1330_v24 }
 0x70a   : > { %1778 = vmatpush.bf16.msra.mxu0 %v3100_v58  ;;  %v3334_v58 = vld [vmem:[%s4221_s16 + $0xb4] sm:$0xf] }
 0x70e   : > { %1779 = vmatpush.bf16.msra.mxu0 %v3036_v12 }
 0x74c   : > { %v1323_v8 = vpop.xlane.xlu2 %1322 }
 0x74d   : > { %v1340_v17 = vmul.f32 %v4548_v26, %v1323_v8  ;;  %v4594_v8 = vld [vmem:[%s4229_s23 + $0x3] ss:$0 sm:$0xff] }
 0x74f   : > { %v4551_v27 = vsub.f32 %v1317_v35, %v1340_v17  ;;  %v3313_v35 = vld [vmem:[%s4221_s16 + $0xc] sm:$0xf] }
 0x750   : > { %v3024_v15 = vor.u32 %v3313_v35, %v3021_v44 }
 0x751   : > { %v1348_v9 = vmul.f32 %v4551_v27, %v4551_v27 }
 0x752   : > { %1722 = vmatpush.bf16.msrb.mxu2 %v3024_v15 }
 0x753   : > { %v1352_v28 = vsel %vm557_vm1, %v1348_v9, 0.0 }
 0x754   : > { %v1326_v29 = vpop.xlane.xlu1 %1325  ;;  %1353 = vadd.xlane.f32.xlu1 %v1352_v28 }
 0x755   : > { %v1341_v30 = vmul.f32 %v4548_v26, %v1326_v29 }
 0x757   : > { %v4557_v31 = vsub.f32 %v1318_v49, %v1341_v30  ;;  %v4599_v30 = vld [vmem:[%s4229_s23 + $0x4] ss:$0 sm:$0xff] }
 0x759   : > { %v1349_v32 = vmul.f32 %v4557_v31, %v4557_v31 }
 0x75b   : > { %v1355_v33 = vsel %vm557_vm1, %v1349_v32, 0.0 }
 0x75c   : > { %1356 = vadd.xlane.f32.xlu0 %v1355_v33 }
 0x773   : > { %v1329_v37 = vpop.xlane.xlu0 %1328 }
 0x774   : > { %v1342_v38 = vmul.f32 %v4548_v26, %v1329_v37 }
 0x776   : > { %v4563_v39 = vsub.f32 %v1319_v16, %v1342_v38 }
 0x778   : > { %v1350_v40 = vmul.f32 %v4563_v39, %v4563_v39 }
 0x77a   : > { %v1358_v41 = vsel %vm557_vm1, %v1350_v40, 0.0 }
 0x77b   : > { %v1332_v42 = vpop.xlane.xlu2 %1331  ;;  %1359 = vadd.xlane.f32.xlu2 %v1358_v41  ;;  %v3330_v41 = vld [vmem:[%s4221_s16 + $0x94] sm:$0xf] }
 0x77c   : > { %v1343_v46 = vmul.f32 %v4548_v26, %v1332_v42  ;;  %v3093_v42 = vld [vmem:[%s4221_s16 + $0xd0] sm:$0xf0] }
 0x77e   : > { %v4569_v34 = vsub.f32 %v1320_v6, %v1343_v46  ;;  %v3331_v46 = vld [vmem:[%s4221_s16 + $0x9c] sm:$0xf] }
 0x780   : > { %v1351_v48 = vmul.f32 %v4569_v34, %v4569_v34 }
 0x782   : > { %v1361_v47 = vsel %vm557_vm1, %v1351_v48, 0.0  ;;  %v3096_v48 = vor.u32 %v3330_v41, %v3093_v42 }
 0x783   : > { %1362 = vadd.xlane.f32.xlu1 %v1361_v47  ;;  %v3101_v47 = vld [vmem:[%s4221_s16 + $0xd8] sm:$0xf0] }
 0x784   : > { %v3104_v53 = vor.u32 %v3331_v46, %v3101_v47  ;;  %1759 = vmatpush.bf16.msra.mxu3 %v3096_v48  ;;  %v3053_v47 = vld [vmem:[%s4221_s16 + $0x68] sm:$0xf0] }
 0x786   : > { %1797 = vmatpush.bf16.msra.mxu2 %v3104_v53 }
 0x78a   : > { %1798 = vmatpush.bf16.msra.mxu2 %v3040_v3  ;;  %v3131_v3 = vld [vmem:[%s4221_s16 + $0xb8] sm:$0xf] }
 0x7c7   : > { %v1354_v54 = vpop.xlane.xlu1 %1353 }
 0x7c8   : > { %v1364_v59 = vmul.f32 %v1354_v54, %v4548_v26  ;;  %v3092_v54 = vor.u32 %v3338_v51, %v3091_v50  ;;  %v3043_v50 = vld [vmem:[%s4221_s16 + $0x20] sm:$0xf] }
 0x7c9   : > { %v3324_v51 = vld [vmem:[%s4221_s16 + $0x5c] sm:$0xf0] }
 0x7ca   : > { %v1368_v2 = vadd.f32 1e-05, %v1364_v59  ;;  %v3314_v59 = vld [vmem:[%s4221_s16 + $0x14] sm:$0xf]  ;;  %1740 = vmatpush.bf16.msra.mxu1 %v3092_v54  ;;  %v3044_v54 = vor.u32 %v3324_v51, %v3043_v50 }
 0x7cb   : > { %v3032_v56 = vor.u32 %v3314_v59, %v3029_v43  ;;  %v3125_v59 = vld [vmem:[%s4221_s16 + $0xf0] sm:$0xf0]  ;;  %v3335_v43 = vld [vmem:[%s4221_s16 + $0xbc] sm:$0xf] }
 0x7cc   : > { %3626 = vrsqrt.f32 %v1368_v2  ;;  %vm1378_vm7 = vweird.f32 %v1368_v2  ;;  %v3128_v63 = vor.u32 %v3334_v58, %v3125_v59 }
 0x7cd   : > { %1760 = vmatpush.bf16.msra.mxu3 %v3032_v56  ;;  %v3123_v56 = vld [vmem:[%s4221_s16 + $0xb0] sm:$0xf] }
 0x7cf   : > { %v1357_v49 = vpop.xlane.xlu0 %1356 }
 0x7d0   : > { %v1365_v22 = vmul.f32 %v1357_v49, %v4548_v26 }
 0x7d2   : > { %v3627_v13 = vpop.eup %3626  ;;  %v1369_v1 = vadd.f32 1e-05, %v1365_v22 }
 0x7d3   : > { %v1373_v16 = vmul.f32 %v3627_v13, %v1368_v2  ;;  %vm1379_vm6 = vweird.f32 %v3627_v13  ;;  %v3027_v2 = vld [vmem:[%s4221_s16 + $0x10] sm:$0xf] }
 0x7d4   : > { %3628 = vrsqrt.f32 %v1369_v1  ;;  %vm1380_vm8 = vmor %vm1378_vm7, %vm1379_vm6  ;;  %vm1388_vm10 = vweird.f32 %v1369_v1  ;;  %v3028_v4 = vor.u32 %v3322_v14, %v3027_v2  ;;  %v3124_v14 = vor.u32 %v3342_v52, %v3123_v56 }
 0x7d5   : > { %v1374_v19 = vmul.f32 %v3627_v13, %v1373_v16 }
 0x7d6   : > { %1741 = vmatpush.bf16.msra.mxu1 %v3028_v4  ;;  %v3343_v4 = vld [vmem:[%s4221_s16 + $0xf4] sm:$0xf0] }
 0x7d7   : > { %v1375_v23 = vmul.f32 0.5, %v1374_v19  ;;  %v3132_v5 = vor.u32 %v3343_v4, %v3131_v3  ;;  %v3253_v3 = vld [vmem:[%s4227_s8 + $0xd0] sm:$0xf0] }
 0x7d9   : > { %v1376_v62 = vsub.f32 1.5, %v1375_v23  ;;  %v3332_v23 = vld [vmem:[%s4221_s16 + $0xa4] sm:$0xf] }
 0x7da   : > { %v3629_v6 = vpop.eup %3628 }
 0x7db   : > { %v1377_v24 = vmul.f32 %v3627_v13, %v1376_v62  ;;  %v1383_v25 = vmul.f32 %v3629_v6, %v1369_v1  ;;  %vm1389_vm9 = vweird.f32 %v3629_v6  ;;  %v3109_v62 = vld [vmem:[%s4221_s16 + $0xe0] sm:$0xf0] }
 0x7dc   : > { %vm1390_vm11 = vmor %vm1388_vm10, %vm1389_vm9 }
 0x7dd   : > { %v1384_v7 = vmul.f32 %v3629_v6, %v1383_v25  ;;  %v1381_v18 = vsel %vm1380_vm8, %v3627_v13, %v1377_v24  ;;  %v3333_v24 = vld [vmem:[%s4221_s16 + $0xac] sm:$0xf] }
 0x7de   : > { %v1412_v21 = vmul.f32 %v1381_v18, %v4551_v27  ;;  %v3117_v25 = vld [vmem:[%s4221_s16 + $0xe8] sm:$0xf0] }
 0x7df   : > { %v1385_v60 = vmul.f32 0.5, %v1384_v7  ;;  %v3107_v7 = vld [vmem:[%s4221_s16 + $0xa0] sm:$0xf] }
 0x7e0   : > { %v1416_v28 = vmul.f32 %v1412_v21, %v4594_v8  ;;  %v3115_v21 = vld [vmem:[%s4221_s16 + $0xa8] sm:$0xf] }
 0x7e1   : > { %v1386_v0 = vsub.f32 1.5, %v1385_v60  ;;  %v3120_v60 = vor.u32 %v3333_v24, %v3117_v25  ;;  %v3243_v24 = vld [vmem:[%s4227_s8 + $0x88] sm:$0xf] }
 0x7e2   : > { %v4603_v27 = vadd.f32 %v1416_v28, %v4599_v30  ;;  %v3341_v28 = vld [vmem:[%s4221_s16 + $0xe4] sm:$0xf0] }
 0x7e3   : > { %v1387_v17 = vmul.f32 %v3629_v6, %v1386_v0  ;;  %v3340_v0 = vld [vmem:[%s4221_s16 + $0xdc] sm:$0xf0]  ;;  %v3369_v25 = vld [vmem:[%s4227_s8 + $0xc4] sm:$0xf0] }
 0x7e5   : > { %v1391_v9 = vsel %vm1390_vm11, %v3629_v6, %v1387_v17  ;;  %v3112_v6 = vor.u32 %v3332_v23, %v3109_v62  ;;  %v3360_v23 = vld [vmem:[%s4227_s8 + $0x84] sm:$0xf] }
 0x7e6   : > { %v1413_v29 = vmul.f32 %v1391_v9, %v4557_v31  ;;  %v3108_v9 = vor.u32 %v3340_v0, %v3107_v7  ;;  %v3245_v0 = vld [vmem:[%s4227_s8 + $0xc8] sm:$0xf0] }
 0x7e8   : > { %v1417_v32 = vmul.f32 %v1413_v29, %v4594_v8 }
 0x7ea   : > { %v4606_v33 = vadd.f32 %v1417_v32, %v4599_v30  ;;  %v3116_v32 = vor.u32 %v3341_v28, %v3115_v21  ;;  %v3344_v28 = vld [vmem:[%s4227_s8 + $0x4] sm:$0xf] }
 0x7ec   : > { %v4610_v37 = vpack.c.bf16 %v4606_v33, %v4603_v27 }
 0x7ee   : > { %3137 = vmatmul.msk.bf16.vlgmr.msrb.gmra.mxu1 %vm557_vm1, %v4610_v37  ;;  %3139 = vmatmul.msk.bf16.vlgmr.msrb.gmra.mxu3 %vm557_vm1, %v4610_v37  ;;  %v1360_v31 = vpop.xlane.xlu2 %1359 }
 0x7ef   : > { %3141 = vmatmul.msk.bf16.vlgmr.msrb.gmra.mxu0 %vm557_vm1, %v4610_v37  ;;  %3143 = vmatmul.msk.bf16.vlgmr.msrb.gmra.mxu2 %vm557_vm1, %v4610_v37  ;;  %v1366_v38 = vmul.f32 %v1360_v31, %v4548_v26 }
 0x7f0   : > { %1835 = vmatpush.bf16.msrb.mxu3 %v3112_v6  ;;  %1873 = vmatpush.bf16.msrb.mxu2 %v3120_v60  ;;  %v3237_v6 = vld [vmem:[%s4227_s8 + $0xc0] sm:$0xf0]  ;;  %v3361_v60 = vld [vmem:[%s4227_s8 + $0x8c] sm:$0xf] }
 0x7f1   : > { %v1370_v40 = vadd.f32 1e-05, %v1366_v38  ;;  %1816 = vmatpush.bf16.msrb.mxu1 %v3108_v9  ;;  %1854 = vmatpush.bf16.msrb.mxu0 %v3116_v32  ;;  %v3240_v7 = vor.u32 %v3360_v23, %v3237_v6  ;;  %v3248_v21 = vor.u32 %v3361_v60, %v3245_v0  ;;  %v3352_v9 = vld [vmem:[%s4227_s8 + $0x3c] sm:$0xf0]  ;;  %v3173_v32 = vld [vmem:[%s4227_s8 + $0x40] sm:$0xf0] }
 0x7f2   : > { %v3371_v23 = vld [vmem:[%s4227_s8 + $0xd4] sm:$0xf0] }
 0x7f3   : > { %3630 = vrsqrt.f32 %v1370_v40  ;;  %vm1398_vm13 = vweird.f32 %v1370_v40 }
 0x7f5   : > { %1817 = vmatpush.bf16.msrb.mxu1 %v3044_v54  ;;  %v528_v54 = vld [vmem:[%s4229_s23] ss:$8 sm:$0xf0] }
 0x7f6   : > { %v1363_v45 = vpop.xlane.xlu1 %1362 }
 0x7f7   : > { %v1367_v36 = vmul.f32 %v1363_v45, %v4548_v26  ;;  %v3052_v45 = vor.u32 %v3325_v57, %v3051_v55 }
 0x7f9   : > { %v3631_v10 = vpop.eup %3630  ;;  %v1371_v11 = vadd.f32 1e-05, %v1367_v36  ;;  %1855 = vmatpush.bf16.msrb.mxu0 %v3052_v45  ;;  %v3133_v36 = vld [vmem:[%s4221_s16 + $0xf8] sm:$0xf0] }
 0x7fa   : > { %v1393_v35 = vmul.f32 %v3631_v10, %v1370_v40  ;;  %vm1399_vm12 = vweird.f32 %v3631_v10  ;;  %v3136_v2 = vor.u32 %v3335_v43, %v3133_v36 }
 0x7fb   : > { %3632 = vrsqrt.f32 %v1371_v11  ;;  %vm1400_vm14 = vmor %vm1398_vm13, %vm1399_vm12  ;;  %vm1408_vm0 = vweird.f32 %v1371_v11 }
 0x7fc   : > { %v1394_v44 = vmul.f32 %v3631_v10, %v1393_v35  ;;  %v3069_v35 = vld [vmem:[%s4221_s16 + $0x78] sm:$0xf0] }
 0x7fe   : > { %v1395_v61 = vmul.f32 0.5, %v1394_v44  ;;  %v3059_v44 = vld [vmem:[%s4221_s16 + $0x30] sm:$0xf] }
 0x800   : > { %v1396_v15 = vsub.f32 1.5, %v1395_v61  ;;  %v3326_v61 = vld [vmem:[%s4221_s16 + $0x6c] sm:$0xf0] }
 0x801   : > { %v3633_v49 = vpop.eup %3632 }
 0x802   : > { %v1397_v22 = vmul.f32 %v3631_v10, %v1396_v15  ;;  %v1403_v13 = vmul.f32 %v3633_v49, %v1371_v11  ;;  %vm1409_vm15 = vweird.f32 %v3633_v49  ;;  %v3319_v11 = vld [vmem:[%s4221_s16 + $0x3c] sm:$0xf] }
 0x803   : > { %vm1410_vm2 = vmor %vm1408_vm0, %vm1409_vm15  ;;  %v3072_v15 = vor.u32 %v3319_v11, %v3069_v35  ;;  %v3370_v35 = vld [vmem:[%s4227_s8 + $0xcc] sm:$0xf0] }
 0x804   : > { %v1404_v1 = vmul.f32 %v3633_v49, %v1403_v13  ;;  %v1401_v16 = vsel %vm1400_vm14, %v3631_v10, %v1397_v22  ;;  %v3061_v10 = vld [vmem:[%s4221_s16 + $0x70] sm:$0xf0]  ;;  %v3067_v22 = vld [vmem:[%s4221_s16 + $0x38] sm:$0xf] }
 0x805   : > { %v1414_v17 = vmul.f32 %v1401_v16, %v4563_v39  ;;  %v3064_v12 = vor.u32 %v3318_v20, %v3061_v10  ;;  %v3327_v13 = vld [vmem:[%s4221_s16 + $0x74] sm:$0xf0]  ;;  %v3235_v16 = vld [vmem:[%s4227_s8 + $0x80] sm:$0xf] }
 0x806   : > { %v1405_v19 = vmul.f32 0.5, %v1404_v1  ;;  %v3068_v1 = vor.u32 %v3327_v13, %v3067_v22  ;;  %v3261_v22 = vld [vmem:[%s4227_s8 + $0xd8] sm:$0xf0] }
 0x807   : > { %v1418_v38 = vmul.f32 %v1414_v17, %v4594_v8  ;;  %v3171_v17 = vld [vmem:[%s4227_s8] sm:$0xf] }
 0x808   : > { %v1406_v18 = vsub.f32 1.5, %v1405_v19  ;;  %v3368_v19 = vld [vmem:[%s4227_s8 + $0xbc] sm:$0xf0] }
 0x809   : > { %v4651_v41 = vadd.f32 %v1418_v38, %v4599_v30  ;;  %v3236_v62 = vor.u32 %v3368_v19, %v3235_v16  ;;  %v3353_v38 = vld [vmem:[%s4227_s8 + $0x44] sm:$0xf0]  ;;  %v3259_v19 = vld [vmem:[%s4227_s8 + $0x98] sm:$0xf] }
 0x80a   : > { %v1407_v29 = vmul.f32 %v3633_v49, %v1406_v18  ;;  %v3244_v18 = vor.u32 %v3369_v25, %v3243_v24  ;;  %v3260_v24 = vor.u32 %v3371_v23, %v3259_v19 }
 0x80c   : > { %v1411_v31 = vsel %vm1410_vm2, %v3633_v49, %v1407_v29  ;;  %v3060_v49 = vor.u32 %v3326_v61, %v3059_v44  ;;  %v3172_v29 = vor.u32 %v3352_v9, %v3171_v17  ;;  %v3363_v44 = vld [vmem:[%s4227_s8 + $0x9c] sm:$0xf]  ;;  %v3187_v17 = vld [vmem:[%s4227_s8 + $0x10] sm:$0xf] }
 0x80d   : > { %v1415_v39 = vmul.f32 %v1411_v31, %v4569_v34  ;;  %v3316_v34 = vld [vmem:[%s4221_s16 + $0x24] sm:$0xf]  ;;  %v3179_v31 = vld [vmem:[%s4227_s8 + $0x8] sm:$0xf]  ;;  %v3264_v16 = vor.u32 %v3363_v44, %v3261_v22  ;;  %v3354_v9 = vld [vmem:[%s4227_s8 + $0x4c] sm:$0xf0] }
 0x80e   : > { %v3373_v22 = vld [vmem:[%s4227_s8 + $0xe4] sm:$0xf0] }
 0x80f   : > { %v1419_v40 = vmul.f32 %v1415_v39, %v4594_v8  ;;  %v3045_v8 = vld [vmem:[%s4221_s16 + $0x60] sm:$0xf0]  ;;  %v3176_v39 = vor.u32 %v3344_v28, %v3173_v32  ;;  %v3188_v28 = vor.u32 %v3354_v9, %v3187_v17  ;;  %v3355_v32 = vld [vmem:[%s4227_s8 + $0x54] sm:$0xf0]  ;;  %v3356_v17 = vld [vmem:[%s4227_s8 + $0x5c] sm:$0xf0] }
 0x810   : > { %v3048_v48 = vor.u32 %v3316_v34, %v3045_v8  ;;  %v3345_v34 = vld [vmem:[%s4227_s8 + $0xc] sm:$0xf] }
 0x811   : > { %v4654_v42 = vadd.f32 %v1419_v40, %v4599_v30  ;;  %v3317_v30 = vld [vmem:[%s4221_s16 + $0x2c] sm:$0xf]  ;;  %v3180_v40 = vor.u32 %v3353_v38, %v3179_v31  ;;  %v3346_v38 = vld [vmem:[%s4227_s8 + $0x14] sm:$0xf] }
 0x812   : > { %v3056_v53 = vor.u32 %v3317_v30, %v3053_v47  ;;  %1836 = vmatpush.bf16.msrb.mxu3 %v3048_v48  ;;  %v3181_v8 = vld [vmem:[%s4227_s8 + $0x48] sm:$0xf0] }
 0x813   : > { %v4658_v46 = vpack.c.bf16 %v4654_v42, %v4651_v41  ;;  %v3184_v30 = vor.u32 %v3345_v34, %v3181_v8  ;;  %v3347_v34 = vld [vmem:[%s4227_s8 + $0x1c] sm:$0xf] }
 0x814   : > { %1874 = vmatpush.bf16.msrb.mxu2 %v3056_v53  ;;  %v527_v53 = vld [vmem:[%s4229_s23] ss:$8 sm:$0xf]  ;;  %v3197_v8 = vld [vmem:[%s4227_s8 + $0x58] sm:$0xf0] }
 0x815   : > { %3138 = vmatmul.msk.bf16.gmra.mxu1 %vm557_vm1, %v4658_v46  ;;  %3140 = vmatmul.msk.bf16.gmra.mxu3 %vm557_vm1, %v4658_v46  ;;  %v4750_v55 = vor.u32 %v528_v54, %v527_v53 }
 0x816   : > { %3142 = vmatmul.msk.bf16.gmra.mxu0 %vm557_vm1, %v4658_v46  ;;  %3144 = vmatmul.msk.bf16.gmra.mxu2 %vm557_vm1, %v4658_v46 }
 0x817   : > { %v4761_v45 = vperm.slane %v4750_v55, 0  ;;  %v4764_v58 = vperm.slane %v4750_v55, 1  ;;  %v4770_v36 = vperm.slane %v4750_v55, 3 }
 0x825   : > { %3145 = vmatmul.msk.bf16.vlgmr.msra.gmra.mxu1 %vm557_vm1, %v4610_v37  ;;  %3147 = vmatmul.msk.bf16.vlgmr.msra.gmra.mxu3 %vm557_vm1, %v4610_v37 }
 0x826   : > { %3149 = vmatmul.msk.bf16.vlgmr.msra.gmra.mxu0 %vm557_vm1, %v4610_v37  ;;  %3151 = vmatmul.msk.bf16.vlgmr.msra.gmra.mxu2 %vm557_vm1, %v4610_v37 }
 0x827   : > { %1911 = vmatpush.bf16.msra.mxu3 %v3128_v63  ;;  %1949 = vmatpush.bf16.msra.mxu2 %v3136_v2  ;;  %v4767_v63 = vperm.slane %v4750_v55, 2 }
 0x828   : > { %1892 = vmatpush.bf16.msra.mxu1 %v3124_v14  ;;  %1930 = vmatpush.bf16.msra.mxu0 %v3132_v5  ;;  %v3362_v14 = vld [vmem:[%s4227_s8 + $0x94] sm:$0xf] }
 0x829   : > { %v3256_v20 = vor.u32 %v3362_v14, %v3253_v3 }
 0x82b   : > { %1912 = vmatpush.bf16.msra.mxu3 %v3064_v12  ;;  %1950 = vmatpush.bf16.msra.mxu2 %v3072_v15  ;;  %v3251_v12 = vld [vmem:[%s4227_s8 + $0x90] sm:$0xf] }
 0x82c   : > { %1893 = vmatpush.bf16.msra.mxu1 %v3060_v49  ;;  %1931 = vmatpush.bf16.msra.mxu0 %v3068_v1  ;;  %v3252_v49 = vor.u32 %v3370_v35, %v3251_v12  ;;  %v3365_v12 = vld [vmem:[%s4227_s8 + $0xac] sm:$0xf] }
 0x82d   : > { %v3277_v35 = vld [vmem:[%s4227_s8 + $0xe8] sm:$0xf0] }
 0x835   : > { %3146 = vmatmul.msk.bf16.gmra.mxu1 %vm557_vm1, %v4658_v46  ;;  %3148 = vmatmul.msk.bf16.gmra.mxu3 %vm557_vm1, %v4658_v46 }
 0x836   : > { %3150 = vmatmul.msk.bf16.gmra.mxu0 %vm557_vm1, %v4658_v46  ;;  %3152 = vmatmul.msk.bf16.gmra.mxu2 %vm557_vm1, %v4658_v46 }
 0x845   : > { %3153 = vmatmul.msk.bf16.vlgmr.msrb.gmra.mxu1 %vm557_vm1, %v4610_v37  ;;  %3155 = vmatmul.msk.bf16.vlgmr.msrb.gmra.mxu3 %vm557_vm1, %v4610_v37 }
 0x846   : > { %3157 = vmatmul.msk.bf16.vlgmr.msrb.gmra.mxu0 %vm557_vm1, %v4610_v37  ;;  %3159 = vmatmul.msk.bf16.vlgmr.msrb.gmra.mxu2 %vm557_vm1, %v4610_v37 }
 0x847   : > { %2256 = vmatpush.bf16.xpose.msrb.mxu1 %v3236_v62  ;;  %2275 = vmatpush.bf16.xpose.msrb.mxu3 %v3240_v7 }
 0x848   : > { %2294 = vmatpush.bf16.xpose.msrb.mxu0 %v3244_v18  ;;  %2313 = vmatpush.bf16.xpose.msrb.mxu2 %v3248_v21 }
 0x84f   : > { %2257 = vmatpush.bf16.xpose.msrb.mxu1 %v3172_v29  ;;  %2276 = vmatpush.bf16.xpose.msrb.mxu3 %v3176_v39  ;;  %v3195_v29 = vld [vmem:[%s4227_s8 + $0x18] sm:$0xf]  ;;  %v3189_v39 = vld [vmem:[%s4227_s8 + $0x50] sm:$0xf0] }
 0x850   : > { %2295 = vmatpush.bf16.xpose.msrb.mxu0 %v3180_v40  ;;  %2314 = vmatpush.bf16.xpose.msrb.mxu2 %v3184_v30  ;;  %v3196_v31 = vor.u32 %v3355_v32, %v3195_v29  ;;  %v3192_v40 = vor.u32 %v3346_v38, %v3189_v39  ;;  %v3200_v30 = vor.u32 %v3347_v34, %v3197_v8  ;;  %v3211_v32 = vld [vmem:[%s4227_s8 + $0x28] sm:$0xf]  ;;  %v4819_v34 = vperm.slane %v4750_v55, 5 }
 0x855   : > { %3154 = vmatmul.msk.bf16.gmra.mxu1 %vm557_vm1, %v4658_v46  ;;  %3156 = vmatmul.msk.bf16.gmra.mxu3 %vm557_vm1, %v4658_v46 }
 0x856   : > { %3158 = vmatmul.msk.bf16.gmra.mxu0 %vm557_vm1, %v4658_v46  ;;  %3160 = vmatmul.msk.bf16.gmra.mxu2 %vm557_vm1, %v4658_v46 }
 0x865   : > { %3161 = vmatmul.msk.bf16.vlgmr.msra.gmra.mxu1 %vm557_vm1, %v4610_v37  ;;  %3163 = vmatmul.msk.bf16.vlgmr.msra.gmra.mxu3 %vm557_vm1, %v4610_v37 }
 0x866   : > { %3165 = vmatmul.msk.bf16.vlgmr.msra.gmra.mxu0 %vm557_vm1, %v4610_v37  ;;  %3167 = vmatmul.msk.bf16.vlgmr.msra.gmra.mxu2 %vm557_vm1, %v4610_v37 }
 0x867   : > { %2351 = vmatpush.bf16.xpose.msra.mxu3 %v3256_v20  ;;  %2332 = vmatpush.bf16.xpose.msra.mxu1 %v3252_v49  ;;  %v3372_v20 = vld [vmem:[%s4227_s8 + $0xdc] sm:$0xf0]  ;;  %v3275_v49 = vld [vmem:[%s4227_s8 + $0xa8] sm:$0xf] }
 0x868   : > { %2389 = vmatpush.bf16.xpose.msra.mxu2 %v3264_v16  ;;  %2370 = vmatpush.bf16.xpose.msra.mxu0 %v3260_v24  ;;  %v3276_v16 = vor.u32 %v3373_v22, %v3275_v49 }
 0x86b   : > { %v1667_v48 = vpop.f32.mrf.mxu1 }
 0x86c   : > { %v1705_v47 = vpop.f32.mrf.mxu0  ;;  %v1668_v4 = vadd.f32 %v1667_v48, %v4761_v45 }
 0x86d   : > { %v1706_v10 = vadd.f32 %v1705_v47, %v4767_v63 }
 0x86e   : > { %v1962_v62 = vmax.f32 %v1668_v4, 0.0 }
 0x86f   : > { %v1964_v25 = vmax.f32 %v1706_v10, 0.0  ;;  %2333 = vmatpush.bf16.xpose.msra.mxu1 %v3188_v28  ;;  %2352 = vmatpush.bf16.xpose.msra.mxu3 %v3192_v40 }
 0x870   : > { %2371 = vmatpush.bf16.xpose.msra.mxu0 %v3196_v31  ;;  %2390 = vmatpush.bf16.xpose.msra.mxu2 %v3200_v30  ;;  %v3357_v31 = vld [vmem:[%s4227_s8 + $0x64] sm:$0xf0] }
 0x871   : > { %v1686_v50 = vpop.f32.mrf.mxu3  ;;  %v3212_v40 = vor.u32 %v3357_v31, %v3211_v32  ;;  %v3374_v32 = vld [vmem:[%s4227_s8 + $0xec] sm:$0xf0]  ;;  %v3367_v31 = vld [vmem:[%s4227_s8 + $0xbc] sm:$0xf] }
 0x872   : > { %v1724_v51 = vpop.f32.mrf.mxu2  ;;  %v1687_v5 = vadd.f32 %v1686_v50, %v4764_v58 }
 0x873   : > { %v1669_v37 = vpop.f32.mrf.mxu1  ;;  %v1725_v11 = vadd.f32 %v1724_v51, %v4770_v36 }
 0x874   : > { %v1707_v59 = vpop.f32.mrf.mxu0  ;;  %v1963_v6 = vmax.f32 %v1687_v5, 0.0  ;;  %v3267_v5 = vld [vmem:[%s4227_s8 + $0xa0] sm:$0xf] }
 0x875   : > { %3162 = vmatmul.msk.bf16.gmra.mxu1 %vm557_vm1, %v4658_v46  ;;  %3164 = vmatmul.msk.bf16.gmra.mxu3 %vm557_vm1, %v4658_v46  ;;  %v1708_v52 = vadd.f32 %v1707_v59, %v4767_v63  ;;  %v1965_v7 = vmax.f32 %v1725_v11, 0.0 }
 0x876   : > { %3166 = vmatmul.msk.bf16.gmra.mxu0 %vm557_vm1, %v4658_v46  ;;  %3168 = vmatmul.msk.bf16.gmra.mxu2 %vm557_vm1, %v4658_v46  ;;  %v1670_v46 = vadd.f32 %v1669_v37, %v4761_v45 }
 0x877   : > { %v1980_v13 = vmax.f32 %v1708_v52, 0.0 }
 0x878   : > { %v1978_v61 = vmax.f32 %v1670_v46, 0.0  ;;  %v3364_v46 = vld [vmem:[%s4227_s8 + $0xa4] sm:$0xf] }
 0x879   : > { %v1688_v57 = vpop.f32.mrf.mxu3  ;;  %v2028_v0 = vpack.c.bf16 %v1980_v13, %v1964_v25 }
 0x87a   : > { %v1726_v43 = vpop.f32.mrf.mxu2  ;;  %v1689_v56 = vadd.f32 %v1688_v57, %v4764_v58  ;;  %v2026_v18 = vpack.c.bf16 %v1978_v61, %v1962_v62 }
 0x87b   : > { %v1727_v2 = vadd.f32 %v1726_v43, %v4770_v36 }
 0x87c   : > { %v1979_v15 = vmax.f32 %v1689_v56, 0.0  ;;  %v3269_v56 = vld [vmem:[%s4227_s8 + $0xe0] sm:$0xf0] }
 0x87d   : > { %v1981_v1 = vmax.f32 %v1727_v2, 0.0  ;;  %v3272_v14 = vor.u32 %v3364_v46, %v3269_v56  ;;  %v3213_v46 = vld [vmem:[%s4227_s8 + $0x68] sm:$0xf0] }
 0x87e   : > { %v2027_v60 = vpack.c.bf16 %v1979_v15, %v1963_v6  ;;  %v3280_v15 = vor.u32 %v3365_v12, %v3277_v35 }
 0x87f   : > { %v2029_v21 = vpack.c.bf16 %v1981_v1, %v1965_v7 }
 0x885   : > { %2258 = vmatmul.bf16.vlgmr.msrb.gmra.mxu1 %v2026_v18  ;;  %2277 = vmatmul.bf16.vlgmr.msrb.gmra.mxu3 %v2027_v60  ;;  %v1466_v60 = vperm.slane %v4750_v55, 6 }
 0x886   : > { %2296 = vmatmul.bf16.vlgmr.msrb.gmra.mxu0 %v2028_v0  ;;  %2315 = vmatmul.bf16.vlgmr.msrb.gmra.mxu2 %v2029_v21  ;;  %v3203_v21 = vld [vmem:[%s4227_s8 + $0x20] sm:$0xf] }
 0x887   : > { %2427 = vmatpush.bf16.xpose.msrb.mxu3 %v3272_v14  ;;  %2465 = vmatpush.bf16.xpose.msrb.mxu2 %v3280_v15  ;;  %v3204_v29 = vor.u32 %v3356_v17, %v3203_v21  ;;  %v2940_v21 = vld [vmem:[%s4229_s23 + $0x40] ss:$8 sm:$0xf0] }
 0x888   : > { %2446 = vmatpush.bf16.xpose.msrb.mxu0 %v3276_v16 }
 0x890   : > { %2447 = vmatpush.bf16.xpose.msrb.mxu0 %v3212_v40 }
 0x892   : > { %v1672_v48 = vpop.f32.mrf.mxu1 }
 0x893   : > { %v1710_v47 = vpop.f32.mrf.mxu0  ;;  %v1673_v51 = vadd.f32 %v1672_v48, %v4761_v45  ;;  %v4822_v48 = vperm.slane %v4750_v55, 7 }
 0x894   : > { %v1711_v54 = vadd.f32 %v1710_v47, %v4767_v63 }
 0x895   : > { %v1994_v52 = vmax.f32 %v1673_v51, 0.0  ;;  %v3205_v51 = vld [vmem:[%s4227_s8 + $0x60] sm:$0xf0] }
 0x896   : > { %v1996_v3 = vmax.f32 %v1711_v54, 0.0 }
 0x898   : > { %v1691_v50 = vpop.f32.mrf.mxu3 }
 0x899   : > { %v1729_v53 = vpop.f32.mrf.mxu2  ;;  %v1692_v10 = vadd.f32 %v1691_v50, %v4764_v58  ;;  %v3348_v50 = vld [vmem:[%s4227_s8 + $0x24] sm:$0xf] }
 0x89a   : > { %v1674_v37 = vpop.f32.mrf.mxu1 }
 0x89b   : > { %v1675_v57 = vadd.f32 %v1674_v37, %v4761_v45  ;;  %v1712_v59 = vpop.f32.mrf.mxu0  ;;  %v3268_v45 = vor.u32 %v3372_v20, %v3267_v5  ;;  %v1995_v62 = vmax.f32 %v1692_v10, 0.0  ;;  %v3208_v37 = vor.u32 %v3348_v50, %v3205_v51  ;;  %v3375_v50 = vld [vmem:[%s4227_s8 + $0xf4] sm:$0xf0] }
 0x89c   : > { %v1713_v43 = vadd.f32 %v1712_v59, %v4767_v63  ;;  %v1730_v63 = vadd.f32 %v1729_v53, %v4770_v36 }
 0x89d   : > { %v2010_v2 = vmax.f32 %v1675_v57, 0.0  ;;  %2408 = vmatpush.bf16.xpose.msrb.mxu1 %v3268_v45  ;;  %2428 = vmatpush.bf16.xpose.msrb.mxu3 %v3208_v37 }
 0x89e   : > { %v2012_v4 = vmax.f32 %v1713_v43, 0.0  ;;  %v1997_v25 = vmax.f32 %v1730_v63, 0.0  ;;  %v3349_v43 = vld [vmem:[%s4227_s8 + $0x2c] sm:$0xf] }
 0x89f   : > { %v2042_v11 = vpack.c.bf16 %v2010_v2, %v1994_v52  ;;  %v3216_v2 = vor.u32 %v3349_v43, %v3213_v46 }
 0x8a0   : > { %v1693_v44 = vpop.f32.mrf.mxu3  ;;  %v2044_v61 = vpack.c.bf16 %v2012_v4, %v1996_v3 }
 0x8a1   : > { %v1694_v13 = vadd.f32 %v1693_v44, %v4764_v58  ;;  %v1731_v1 = vpop.f32.mrf.mxu2  ;;  %2263 = vmatmul.bf16.gmra.mxu1 %v2042_v11  ;;  %v1464_v58 = vperm.slane %v4750_v55, 4  ;;  %2466 = vmatpush.bf16.xpose.msrb.mxu2 %v3216_v2 }
 0x8a2   : > { %v1732_v19 = vadd.f32 %v1731_v1, %v4770_v36  ;;  %2301 = vmatmul.bf16.gmra.mxu0 %v2044_v61  ;;  %v1743_v23 = vpop.f32.mrf.mxu1 }
 0x8a3   : > { %v2011_v6 = vmax.f32 %v1694_v13, 0.0  ;;  %v1781_v24 = vpop.f32.mrf.mxu0  ;;  %v1744_v9 = vadd.f32 %v1743_v23, %v1464_v58 }
 0x8a4   : > { %v2013_v7 = vmax.f32 %v1732_v19, 0.0  ;;  %v1782_v38 = vadd.f32 %v1781_v24, %v1466_v60 }
 0x8a5   : > { %v2043_v18 = vpack.c.bf16 %v2011_v6, %v1995_v62  ;;  %2409 = vmatpush.bf16.xpose.msrb.mxu1 %v3204_v29  ;;  %v1966_v53 = vmax.f32 %v1744_v9, 0.0  ;;  %v3366_v62 = vld [vmem:[%s4227_s8 + $0xb4] sm:$0xf]  ;;  %v3283_v29 = vld [vmem:[%s4227_s8 + $0xb0] sm:$0xf] }
 0x8a6   : > { %v2045_v36 = vpack.c.bf16 %v2013_v7, %v1997_v25  ;;  %v1968_v57 = vmax.f32 %v1782_v38, 0.0  ;;  %v3285_v6 = vld [vmem:[%s4227_s8 + $0xf0] sm:$0xf0]  ;;  %v2939_v7 = vld [vmem:[%s4229_s23 + $0x40] ss:$8 sm:$0xf] }
 0x8a7   : > { %2282 = vmatmul.bf16.gmra.mxu3 %v2043_v18  ;;  %v3288_v18 = vor.u32 %v3366_v62, %v3285_v6  ;;  %v4842_v40 = vor.u32 %v2940_v21, %v2939_v7  ;;  %v3351_v6 = vld [vmem:[%s4227_s8 + $0x3c] sm:$0xf] }
 0x8a8   : > { %2320 = vmatmul.bf16.gmra.mxu2 %v2045_v36  ;;  %v1762_v0 = vpop.f32.mrf.mxu3 }
 0x8a9   : > { %v1800_v28 = vpop.f32.mrf.mxu2  ;;  %v1763_v56 = vadd.f32 %v1762_v0, %v4819_v34 }
 0x8aa   : > { %v1745_v39 = vpop.f32.mrf.mxu1  ;;  %v1801_v14 = vadd.f32 %v1800_v28, %v4822_v48 }
 0x8ab   : > { %v1746_v8 = vadd.f32 %v1745_v39, %v1464_v58  ;;  %v1783_v30 = vpop.f32.mrf.mxu0  ;;  %v1967_v11 = vmax.f32 %v1763_v56, 0.0  ;;  %v1468_v56 = vperm.slane %v4842_v40, 0 }
 0x8ac   : > { %v1784_v47 = vadd.f32 %v1783_v30, %v1466_v60  ;;  %v1969_v35 = vmax.f32 %v1801_v14, 0.0  ;;  %v3293_v30 = vld [vmem:[%s4227_s8 + $0xf8] sm:$0xf0] }
 0x8ad   : > { %v1982_v54 = vmax.f32 %v1746_v8, 0.0  ;;  %v3284_v8 = vor.u32 %v3374_v32, %v3283_v29 }
 0x8ae   : > { %v1984_v59 = vmax.f32 %v1784_v47, 0.0  ;;  %v3291_v47 = vld [vmem:[%s4227_s8 + $0xb8] sm:$0xf] }
 0x8af   : > { %v2030_v52 = vpack.c.bf16 %v1982_v54, %v1966_v53  ;;  %v3296_v54 = vor.u32 %v3367_v31, %v3293_v30  ;;  %v3292_v37 = vor.u32 %v3375_v50, %v3291_v47 }
 0x8b0   : > { %v2032_v55 = vpack.c.bf16 %v1984_v59, %v1968_v57  ;;  %v1764_v3 = vpop.f32.mrf.mxu3 }
 0x8b1   : > { %v1765_v4 = vadd.f32 %v1764_v3, %v4819_v34  ;;  %v1802_v5 = vpop.f32.mrf.mxu2  ;;  %2334 = vmatmul.bf16.vlgmr.msra.gmra.mxu1 %v2030_v52  ;;  %v3358_v3 = vld [vmem:[%s4227_s8 + $0x6c] sm:$0xf0] }
 0x8b2   : > { %v1803_v20 = vadd.f32 %v1802_v5, %v4822_v48  ;;  %2372 = vmatmul.bf16.vlgmr.msra.gmra.mxu0 %v2032_v55  ;;  %v1748_v10 = vpop.f32.mrf.mxu1  ;;  %2484 = vmatpush.bf16.xpose.msra.mxu1 %v3284_v8  ;;  %v3219_v55 = vld [vmem:[%s4227_s8 + $0x30] sm:$0xf] }
 0x8b3   : > { %v1983_v45 = vmax.f32 %v1765_v4, 0.0  ;;  %v1786_v12 = vpop.f32.mrf.mxu0  ;;  %v1749_v49 = vadd.f32 %v1748_v10, %v1464_v58  ;;  %2522 = vmatpush.bf16.xpose.msra.mxu0 %v3292_v37  ;;  %v3227_v10 = vld [vmem:[%s4227_s8 + $0x38] sm:$0xf] }
 0x8b4   : > { %v1985_v63 = vmax.f32 %v1803_v20, 0.0  ;;  %v1787_v13 = vadd.f32 %v1786_v12, %v1466_v60  ;;  %v3220_v20 = vor.u32 %v3358_v3, %v3219_v55 }
 0x8b5   : > { %v2031_v44 = vpack.c.bf16 %v1983_v45, %v1967_v11  ;;  %v1998_v24 = vmax.f32 %v1749_v49, 0.0  ;;  %v3359_v11 = vld [vmem:[%s4227_s8 + $0x74] sm:$0xf0] }
 0x8b6   : > { %v2033_v61 = vpack.c.bf16 %v1985_v63, %v1969_v35  ;;  %v2000_v36 = vmax.f32 %v1787_v13, 0.0  ;;  %v3228_v35 = vor.u32 %v3359_v11, %v3227_v10  ;;  %v1469_v63 = vperm.slane %v4842_v40, 1  ;;  %v3221_v13 = vld [vmem:[%s4227_s8 + $0x70] sm:$0xf0] }
 0x8b7   : > { %2353 = vmatmul.bf16.vlgmr.msra.gmra.mxu3 %v2031_v44 }
 0x8b8   : > { %2391 = vmatmul.bf16.vlgmr.msra.gmra.mxu2 %v2033_v61  ;;  %v1767_v15 = vpop.f32.mrf.mxu3  ;;  %2503 = vmatpush.bf16.xpose.msra.mxu3 %v3288_v18 }
 0x8b9   : > { %v1805_v22 = vpop.f32.mrf.mxu2  ;;  %v1768_v17 = vadd.f32 %v1767_v15, %v4819_v34  ;;  %2541 = vmatpush.bf16.xpose.msra.mxu2 %v3296_v54  ;;  %v1471_v15 = vperm.slane %v4842_v40, 3 }
 0x8ba   : > { %v1750_v1 = vpop.f32.mrf.mxu1  ;;  %2485 = vmatpush.bf16.xpose.msra.mxu1 %v3220_v20 }
 0x8bb   : > { %v1751_v16 = vadd.f32 %v1750_v1, %v1464_v58  ;;  %v1788_v19 = vpop.f32.mrf.mxu0  ;;  %v1999_v57 = vmax.f32 %v1768_v17, 0.0  ;;  %2523 = vmatpush.bf16.xpose.msra.mxu0 %v3228_v35 }
 0x8bc   : > { %v1789_v23 = vadd.f32 %v1788_v19, %v1466_v60  ;;  %v1806_v60 = vadd.f32 %v1805_v22, %v4822_v48  ;;  %v3350_v22 = vld [vmem:[%s4227_s8 + $0x34] sm:$0xf] }
 0x8bd   : > { %v2014_v25 = vmax.f32 %v1751_v16, 0.0  ;;  %v3224_v19 = vor.u32 %v3350_v22, %v3221_v13 }
 0x8be   : > { %v2016_v0 = vmax.f32 %v1789_v23, 0.0 }
 0x8bf   : > { %v2046_v58 = vpack.c.bf16 %v2014_v25, %v1998_v24  ;;  %v3229_v24 = vld [vmem:[%s4227_s8 + $0x78] sm:$0xf0] }
 0x8c0   : > { %v1769_v9 = vpop.f32.mrf.mxu3  ;;  %v2048_v28 = vpack.c.bf16 %v2016_v0, %v2000_v36  ;;  %2504 = vmatpush.bf16.xpose.msra.mxu3 %v3224_v19  ;;  %v3232_v18 = vor.u32 %v3351_v6, %v3229_v24 }
 0x8c1   : > { %v1770_v38 = vadd.f32 %v1769_v9, %v4819_v34  ;;  %v1807_v39 = vpop.f32.mrf.mxu2  ;;  %2339 = vmatmul.bf16.gmra.mxu1 %v2046_v58  ;;  %v2001_v34 = vmax.f32 %v1806_v60, 0.0 }
 0x8c2   : > { %v1808_v51 = vadd.f32 %v1807_v39, %v4822_v48  ;;  %2377 = vmatmul.bf16.gmra.mxu0 %v2048_v28  ;;  %v1819_v53 = vpop.f32.mrf.mxu1  ;;  %v1470_v48 = vperm.slane %v4842_v40, 2  ;;  %2542 = vmatpush.bf16.xpose.msra.mxu2 %v3232_v18 }
 0x8c3   : > { %v2015_v59 = vmax.f32 %v1770_v38, 0.0  ;;  %v1857_v43 = vpop.f32.mrf.mxu0  ;;  %v1820_v4 = vadd.f32 %v1819_v53, %v1468_v56 }
 0x8c4   : > { %v2017_v46 = vmax.f32 %v1808_v51, 0.0  ;;  %v1858_v45 = vadd.f32 %v1857_v43, %v1470_v48 }
 0x8c5   : > { %v2047_v52 = vpack.c.bf16 %v2015_v59, %v1999_v57  ;;  %v1970_v1 = vmax.f32 %v1820_v4, 0.0 }
 0x8c6   : > { %v2049_v2 = vpack.c.bf16 %v2017_v46, %v2001_v34  ;;  %v1972_v23 = vmax.f32 %v1858_v45, 0.0 }
 0x8c7   : > { %2358 = vmatmul.bf16.gmra.mxu3 %v2047_v52 }
 0x8c8   : > { %2396 = vmatmul.bf16.gmra.mxu2 %v2049_v2  ;;  %v1838_v14 = vpop.f32.mrf.mxu3 }
 0x8c9   : > { %v1876_v5 = vpop.f32.mrf.mxu2  ;;  %v1839_v25 = vadd.f32 %v1838_v14, %v1469_v63 }
 0x8ca   : > { %v1821_v12 = vpop.f32.mrf.mxu1  ;;  %v1877_v36 = vadd.f32 %v1876_v5, %v1471_v15 }
 0x8cb   : > { %v1822_v44 = vadd.f32 %v1821_v12, %v1468_v56  ;;  %v1859_v61 = vpop.f32.mrf.mxu0  ;;  %v1971_v28 = vmax.f32 %v1839_v25, 0.0 }
 0x8cc   : > { %v1860_v49 = vadd.f32 %v1859_v61, %v1470_v48  ;;  %v1973_v31 = vmax.f32 %v1877_v36, 0.0 }
 0x8cd   : > { %v1986_v16 = vmax.f32 %v1822_v44, 0.0  ;;  %v1472_v44 = vperm.slane %v4842_v40, 4 }
 0x8ce   : > { %v1988_v62 = vmax.f32 %v1860_v49, 0.0  ;;  %v1474_v49 = vperm.slane %v4842_v40, 6 }
 0x8cf   : > { %v2034_v7 = vpack.c.bf16 %v1986_v16, %v1970_v1  ;;  %v1473_v16 = vperm.slane %v4842_v40, 5 }
 0x8d0   : > { %v2036_v0 = vpack.c.bf16 %v1988_v62, %v1972_v23  ;;  %v1840_v21 = vpop.f32.mrf.mxu3  ;;  %v1475_v62 = vperm.slane %v4842_v40, 7 }
 0x8d1   : > { %v1841_v17 = vadd.f32 %v1840_v21, %v1469_v63  ;;  %v1878_v58 = vpop.f32.mrf.mxu2  ;;  %2410 = vmatmul.bf16.vlgmr.msrb.gmra.mxu1 %v2034_v7 }
 0x8d2   : > { %v1879_v60 = vadd.f32 %v1878_v58, %v1471_v15  ;;  %2448 = vmatmul.bf16.vlgmr.msrb.gmra.mxu0 %v2036_v0  ;;  %v1824_v9 = vpop.f32.mrf.mxu1 }
 0x8d3   : > { %v1987_v29 = vmax.f32 %v1841_v17, 0.0  ;;  %v1862_v32 = vpop.f32.mrf.mxu0  ;;  %v1825_v47 = vadd.f32 %v1824_v9, %v1468_v56 }
 0x8d4   : > { %v1989_v38 = vmax.f32 %v1879_v60, 0.0  ;;  %v1863_v51 = vadd.f32 %v1862_v32, %v1470_v48 }
 0x8d5   : > { %v2035_v39 = vpack.c.bf16 %v1987_v29, %v1971_v28  ;;  %v2002_v59 = vmax.f32 %v1825_v47, 0.0 }
 0x8d6   : > { %v2037_v8 = vpack.c.bf16 %v1989_v38, %v1973_v31  ;;  %v2004_v34 = vmax.f32 %v1863_v51, 0.0 }
 0x8d7   : > { %2429 = vmatmul.bf16.vlgmr.msrb.gmra.mxu3 %v2035_v39 }
 0x8d8   : > { %2467 = vmatmul.bf16.vlgmr.msrb.gmra.mxu2 %v2037_v8  ;;  %v1843_v30 = vpop.f32.mrf.mxu3 }
 0x8d9   : > { %v1881_v50 = vpop.f32.mrf.mxu2  ;;  %v1844_v52 = vadd.f32 %v1843_v30, %v1469_v63 }
 0x8da   : > { %v1826_v53 = vpop.f32.mrf.mxu1  ;;  %v1882_v14 = vadd.f32 %v1881_v50, %v1471_v15 }
 0x8db   : > { %v1827_v54 = vadd.f32 %v1826_v53, %v1468_v56  ;;  %v1864_v37 = vpop.f32.mrf.mxu0  ;;  %v2003_v11 = vmax.f32 %v1844_v52, 0.0 }
 0x8dc   : > { %v1865_v57 = vadd.f32 %v1864_v37, %v1470_v48  ;;  %v2005_v12 = vmax.f32 %v1882_v14, 0.0 }
 0x8dd   : > { %v2018_v43 = vmax.f32 %v1827_v54, 0.0 }
 0x8de   : > { %v2020_v46 = vmax.f32 %v1865_v57, 0.0 }
 0x8df   : > { %v2050_v2 = vpack.c.bf16 %v2018_v43, %v2002_v59 }
 0x8e0   : > { %v2052_v55 = vpack.c.bf16 %v2020_v46, %v2004_v34  ;;  %v1845_v3 = vpop.f32.mrf.mxu3 }
 0x8e1   : > { %v1846_v4 = vadd.f32 %v1845_v3, %v1469_v63  ;;  %v1883_v5 = vpop.f32.mrf.mxu2  ;;  %2415 = vmatmul.bf16.gmra.mxu1 %v2050_v2 }
 0x8e2   : > { %v1884_v20 = vadd.f32 %v1883_v5, %v1471_v15  ;;  %2453 = vmatmul.bf16.gmra.mxu0 %v2052_v55  ;;  %v1895_v10 = vpop.f32.mrf.mxu1 }
 0x8e3   : > { %v2019_v45 = vmax.f32 %v1846_v4, 0.0  ;;  %v1933_v56 = vpop.f32.mrf.mxu0  ;;  %v1896_v63 = vadd.f32 %v1895_v10, %v1472_v44 }
 0x8e4   : > { %v2021_v48 = vmax.f32 %v1884_v20, 0.0  ;;  %v1934_v1 = vadd.f32 %v1933_v56, %v1474_v49 }
 0x8e5   : > { %v2051_v35 = vpack.c.bf16 %v2019_v45, %v2003_v11  ;;  %v1974_v24 = vmax.f32 %v1896_v63, 0.0 }
 0x8e6   : > { %v2053_v61 = vpack.c.bf16 %v2021_v48, %v2005_v12  ;;  %v1976_v7 = vmax.f32 %v1934_v1, 0.0 }
 0x8e7   : > { %2434 = vmatmul.bf16.gmra.mxu3 %v2051_v35  ;;  %v540_v35 = vld [vmem:[%s4229_s23 + $0x7] ss:$0 sm:$0xff] }
 0x8e8   : > { %2472 = vmatmul.bf16.gmra.mxu2 %v2053_v61  ;;  %v1914_v22 = vpop.f32.mrf.mxu3 }
 0x8e9   : > { %v1952_v13 = vpop.f32.mrf.mxu2  ;;  %v1915_v36 = vadd.f32 %v1914_v22, %v1473_v16 }
 0x8ea   : > { %v1897_v15 = vpop.f32.mrf.mxu1  ;;  %v1953_v21 = vadd.f32 %v1952_v13, %v1475_v62 }
 0x8eb   : > { %v1898_v19 = vadd.f32 %v1897_v15, %v1472_v44  ;;  %v1935_v23 = vpop.f32.mrf.mxu0  ;;  %v1975_v32 = vmax.f32 %v1915_v36, 0.0 }
 0x8ec   : > { %v1936_v6 = vadd.f32 %v1935_v23, %v1474_v49  ;;  %v1977_v40 = vmax.f32 %v1953_v21, 0.0 }
 0x8ed   : > { %v1990_v25 = vmax.f32 %v1898_v19, 0.0 }
 0x8ee   : > { %v1992_v18 = vmax.f32 %v1936_v6, 0.0 }
 0x8ef   : > { %v2038_v0 = vpack.c.bf16 %v1990_v25, %v1974_v24 }
 0x8f0   : > { %v2040_v17 = vpack.c.bf16 %v1992_v18, %v1976_v7  ;;  %v1916_v58 = vpop.f32.mrf.mxu3 }
 0x8f1   : > { %v1917_v60 = vadd.f32 %v1916_v58, %v1473_v16  ;;  %v1954_v9 = vpop.f32.mrf.mxu2  ;;  %2486 = vmatmul.bf16.vlgmr.msra.gmra.mxu1 %v2038_v0 }
 0x8f2   : > { %v1955_v28 = vadd.f32 %v1954_v9, %v1475_v62  ;;  %2524 = vmatmul.bf16.vlgmr.msra.gmra.mxu0 %v2040_v17  ;;  %v1900_v29 = vpop.f32.mrf.mxu1 }
 0x8f3   : > { %v1991_v31 = vmax.f32 %v1917_v60, 0.0  ;;  %v1938_v38 = vpop.f32.mrf.mxu0  ;;  %v1901_v50 = vadd.f32 %v1900_v29, %v1472_v44 }
 0x8f4   : > { %v1993_v39 = vmax.f32 %v1955_v28, 0.0  ;;  %v1939_v53 = vadd.f32 %v1938_v38, %v1474_v49 }
 0x8f5   : > { %v2039_v8 = vpack.c.bf16 %v1991_v31, %v1975_v32  ;;  %v2006_v43 = vmax.f32 %v1901_v50, 0.0 }
 0x8f6   : > { %v2041_v30 = vpack.c.bf16 %v1993_v39, %v1977_v40  ;;  %v2008_v46 = vmax.f32 %v1939_v53, 0.0 }
 0x8f7   : > { %2505 = vmatmul.bf16.vlgmr.msra.gmra.mxu3 %v2039_v8 }
 0x8f8   : > { %2543 = vmatmul.bf16.vlgmr.msra.gmra.mxu2 %v2041_v30  ;;  %v1919_v47 = vpop.f32.mrf.mxu3 }
 0x8f9   : > { %v1957_v51 = vpop.f32.mrf.mxu2  ;;  %v1920_v2 = vadd.f32 %v1919_v47, %v1473_v16 }
 0x8fa   : > { %v1902_v54 = vpop.f32.mrf.mxu1  ;;  %v1958_v55 = vadd.f32 %v1957_v51, %v1475_v62 }
 0x8fb   : > { %v1903_v37 = vadd.f32 %v1902_v54, %v1472_v44  ;;  %v1940_v57 = vpop.f32.mrf.mxu0  ;;  %v2007_v45 = vmax.f32 %v1920_v2, 0.0 }
 0x8fc   : > { %v1941_v59 = vadd.f32 %v1940_v57, %v1474_v49  ;;  %v2009_v12 = vmax.f32 %v1958_v55, 0.0 }
 0x8fd   : > { %v2022_v34 = vmax.f32 %v1903_v37, 0.0 }
 0x8fe   : > { %v2024_v52 = vmax.f32 %v1941_v59, 0.0 }
 0x8ff   : > { %v2054_v14 = vpack.c.bf16 %v2022_v34, %v2006_v43 }
 0x900   : > { %v2056_v3 = vpack.c.bf16 %v2024_v52, %v2008_v46  ;;  %v1921_v4 = vpop.f32.mrf.mxu3 }
 0x901   : > { %v1922_v5 = vadd.f32 %v1921_v4, %v1473_v16  ;;  %v1959_v20 = vpop.f32.mrf.mxu2  ;;  %2491 = vmatmul.bf16.gmra.mxu1 %v2054_v14 }
 0x902   : > { %v1960_v10 = vadd.f32 %v1959_v20, %v1475_v62  ;;  %2529 = vmatmul.bf16.gmra.mxu0 %v2056_v3  ;;  %v2259_v11 = vpop.f32.mrf.mxu1 }
 0x903   : > { %v2023_v56 = vmax.f32 %v1922_v5, 0.0  ;;  %v2260_v49 = vadd.f32 %v2259_v11, %v540_v35  ;;  %v2297_v22 = vpop.f32.mrf.mxu0 }
 0x904   : > { %v2025_v48 = vmax.f32 %v1960_v10, 0.0 }
 0x905   : > { %v2055_v44 = vpack.c.bf16 %v2023_v56, %v2007_v45 }
 0x906   : > { %v2057_v61 = vpack.c.bf16 %v2025_v48, %v2009_v12 }
 0x907   : > { %2510 = vmatmul.bf16.gmra.mxu3 %v2055_v44 }
 0x908   : > { %2548 = vmatmul.bf16.gmra.mxu2 %v2057_v61  ;;  %v2278_v63 = vpop.f32.mrf.mxu3 }
 0x909   : > { %v2279_v13 = vadd.f32 %v2278_v63, %v2260_v49  ;;  %v2316_v1 = vpop.f32.mrf.mxu2 }
 0x90a   : > { %v2261_v16 = vpop.f32.mrf.mxu1 }
 0x90b   : > { %v2298_v15 = vadd.f32 %v2297_v22, %v2279_v13  ;;  %v2262_v23 = vadd.f32 %v2261_v16, %v540_v35  ;;  %v2299_v24 = vpop.f32.mrf.mxu0 }
 0x90d   : > { %v2317_v19 = vadd.f32 %v2316_v1, %v2298_v15 }
 0x910   : > { %v2280_v62 = vpop.f32.mrf.mxu3 }
 0x911   : > { %v2281_v6 = vadd.f32 %v2280_v62, %v2262_v23  ;;  %v2318_v7 = vpop.f32.mrf.mxu2 }
 0x913   : > { %v2300_v25 = vadd.f32 %v2299_v24, %v2281_v6 }
 0x915   : > { %v2319_v18 = vadd.f32 %v2318_v7, %v2300_v25 }
 0x91e   : > { %v2264_v36 = vpop.f32.mrf.mxu1 }
 0x91f   : > { %v2302_v0 = vpop.f32.mrf.mxu0  ;;  %v2265_v58 = vadd.f32 %v2264_v36, %v540_v35 }
 0x926   : > { %v2266_v21 = vpop.f32.mrf.mxu1 }
 0x927   : > { %v2304_v17 = vpop.f32.mrf.mxu0  ;;  %v2267_v40 = vadd.f32 %v2266_v21, %v540_v35 }
 0x92a   : > { %v2283_v60 = vpop.f32.mrf.mxu3 }
 0x92b   : > { %v2284_v9 = vadd.f32 %v2283_v60, %v2265_v58  ;;  %v2321_v28 = vpop.f32.mrf.mxu2 }
 0x92d   : > { %v2303_v29 = vadd.f32 %v2302_v0, %v2284_v9 }
 0x92e   : > { %v2335_v32 = vpop.f32.mrf.mxu1 }
 0x92f   : > { %v2322_v31 = vadd.f32 %v2321_v28, %v2303_v29  ;;  %v2373_v38 = vpop.f32.mrf.mxu0  ;;  %v2336_v12 = vadd.f32 %v2335_v32, %v2317_v19 }
 0x932   : > { %v2285_v39 = vpop.f32.mrf.mxu3 }
 0x933   : > { %v2286_v8 = vadd.f32 %v2285_v39, %v2267_v40  ;;  %v2323_v30 = vpop.f32.mrf.mxu2 }
 0x935   : > { %v2305_v47 = vadd.f32 %v2304_v17, %v2286_v8 }
 0x936   : > { %v2337_v50 = vpop.f32.mrf.mxu1 }
 0x937   : > { %v2324_v51 = vadd.f32 %v2323_v30, %v2305_v47  ;;  %v2375_v53 = vpop.f32.mrf.mxu0  ;;  %v2338_v63 = vadd.f32 %v2337_v50, %v2319_v18 }
 0x93a   : > { %v2354_v54 = vpop.f32.mrf.mxu3 }
 0x93b   : > { %v2392_v37 = vpop.f32.mrf.mxu2  ;;  %v2355_v44 = vadd.f32 %v2354_v54, %v2336_v12 }
 0x93d   : > { %v2374_v22 = vadd.f32 %v2373_v38, %v2355_v44 }
 0x93e   : > { %v2340_v57 = vpop.f32.mrf.mxu1 }
 0x93f   : > { %v2378_v59 = vpop.f32.mrf.mxu0  ;;  %v2393_v1 = vadd.f32 %v2392_v37, %v2374_v22  ;;  %v2341_v7 = vadd.f32 %v2340_v57, %v2322_v31 }
 0x942   : > { %v2356_v43 = vpop.f32.mrf.mxu3 }
 0x943   : > { %v2394_v34 = vpop.f32.mrf.mxu2  ;;  %v2357_v15 = vadd.f32 %v2356_v43, %v2338_v63 }
 0x945   : > { %v2376_v6 = vadd.f32 %v2375_v53, %v2357_v15 }
 0x946   : > { %v2342_v46 = vpop.f32.mrf.mxu1 }
 0x947   : > { %v2380_v52 = vpop.f32.mrf.mxu0  ;;  %v2395_v0 = vadd.f32 %v2394_v34, %v2376_v6  ;;  %v2343_v29 = vadd.f32 %v2342_v46, %v2324_v51 }
 0x94a   : > { %v2359_v2 = vpop.f32.mrf.mxu3 }
 0x94b   : > { %v2397_v14 = vpop.f32.mrf.mxu2  ;;  %v2360_v19 = vadd.f32 %v2359_v2, %v2341_v7 }
 0x94d   : > { %v2379_v9 = vadd.f32 %v2378_v59, %v2360_v19 }
 0x94e   : > { %v2411_v55 = vpop.f32.mrf.mxu1 }
 0x94f   : > { %v2449_v3 = vpop.f32.mrf.mxu0  ;;  %v2412_v62 = vadd.f32 %v2411_v55, %v2393_v1  ;;  %v2398_v39 = vadd.f32 %v2397_v14, %v2379_v9 }
 0x952   : > { %v2361_v4 = vpop.f32.mrf.mxu3 }
 0x953   : > { %v2399_v5 = vpop.f32.mrf.mxu2  ;;  %v2362_v8 = vadd.f32 %v2361_v4, %v2343_v29 }
 0x955   : > { %v2381_v54 = vadd.f32 %v2380_v52, %v2362_v8 }
 0x956   : > { %v2413_v20 = vpop.f32.mrf.mxu1 }
 0x957   : > { %v2451_v10 = vpop.f32.mrf.mxu0  ;;  %v2414_v58 = vadd.f32 %v2413_v20, %v2395_v0  ;;  %v2400_v51 = vadd.f32 %v2399_v5, %v2381_v54 }
 0x95a   : > { %v2430_v11 = vpop.f32.mrf.mxu3 }
 0x95b   : > { %v2468_v45 = vpop.f32.mrf.mxu2  ;;  %v2431_v24 = vadd.f32 %v2430_v11, %v2412_v62 }
 0x95d   : > { %v2450_v21 = vadd.f32 %v2449_v3, %v2431_v24 }
 0x95e   : > { %v2416_v56 = vpop.f32.mrf.mxu1 }
 0x95f   : > { %v2454_v48 = vpop.f32.mrf.mxu0  ;;  %v2469_v28 = vadd.f32 %v2468_v45, %v2450_v21  ;;  %v2417_v31 = vadd.f32 %v2416_v56, %v2398_v39 }
 0x962   : > { %v2432_v35 = vpop.f32.mrf.mxu3 }
 0x963   : > { %v2470_v61 = vpop.f32.mrf.mxu2  ;;  %v2433_v18 = vadd.f32 %v2432_v35, %v2414_v58 }
 0x965   : > { %v2452_v30 = vadd.f32 %v2451_v10, %v2433_v18 }
 0x966   : > { %v2418_v49 = vpop.f32.mrf.mxu1 }
 0x967   : > { %v2456_v23 = vpop.f32.mrf.mxu0  ;;  %v2471_v37 = vadd.f32 %v2470_v61, %v2452_v30  ;;  %v2419_v10 = vadd.f32 %v2418_v49, %v2400_v51 }
 0x96a   : > { %v2435_v13 = vpop.f32.mrf.mxu3 }
 0x96b   : > { %v2473_v16 = vpop.f32.mrf.mxu2  ;;  %v2436_v57 = vadd.f32 %v2435_v13, %v2417_v31 }
 0x96d   : > { %v2455_v46 = vadd.f32 %v2454_v48, %v2436_v57 }
 0x96e   : > { %v2487_v25 = vpop.f32.mrf.mxu1 }
 0x96f   : > { %v2525_v60 = vpop.f32.mrf.mxu0  ;;  %v2488_v32 = vadd.f32 %v2487_v25, %v2469_v28  ;;  %v2474_v45 = vadd.f32 %v2473_v16, %v2455_v46 }
 0x972   : > { %v2437_v36 = vpop.f32.mrf.mxu3 }
 0x973   : > { %v2475_v17 = vpop.f32.mrf.mxu2  ;;  %v2438_v52 = vadd.f32 %v2437_v36, %v2419_v10 }
 0x976   : > { %v2489_v38 = vpop.f32.mrf.mxu1 }
 0x977   : > { %v2527_v34 = vpop.f32.mrf.mxu0  ;;  %v2490_v2 = vadd.f32 %v2489_v38, %v2471_v37 }
 0x97a   : > { %v2506_v40 = vpop.f32.mrf.mxu3 }
 0x97b   : > { %v2507_v47 = vadd.f32 %v2506_v40, %v2488_v32  ;;  %v2544_v50 = vpop.f32.mrf.mxu2 }
 0x97d   : > { %v2526_v53 = vadd.f32 %v2525_v60, %v2507_v47 }
 0x97e   : > { %v2492_v4 = vpop.f32.mrf.mxu1 }
 0x97f   : > { %v2545_v43 = vadd.f32 %v2544_v50, %v2526_v53  ;;  %v2493_v12 = vadd.f32 %v2492_v4, %v2474_v45  ;;  %v2530_v44 = vpop.f32.mrf.mxu0  ;;  %v538_v45 = vld [vmem:[%s4229_s23 + $0x5] ss:$0 sm:$0xff] }
 0x981   : > { %v2554_v59 = vadd.f32 %v2545_v43, %v4603_v27  ;;  %v2457_v27 = vadd.f32 %v2456_v23, %v2438_v52 }
 0x982   : > { %v2508_v55 = vpop.f32.mrf.mxu3 }
 0x983   : > { %v2509_v3 = vadd.f32 %v2508_v55, %v2490_v2  ;;  %v2546_v20 = vpop.f32.mrf.mxu2  ;;  %v2558_v14 = vsel %vm557_vm1, %v2554_v59, 0.0  ;;  %v2476_v1 = vadd.f32 %v2475_v17, %v2457_v27 }
 0x984   : > { %2559 = vadd.xlane.f32.xlu0 %v2558_v14 }
 0x985   : > { %v2528_v11 = vadd.f32 %v2527_v34, %v2509_v3 }
 0x986   : > { %v2494_v13 = vpop.f32.mrf.mxu1 }
 0x987   : > { %v2547_v56 = vadd.f32 %v2546_v20, %v2528_v11  ;;  %v2495_v49 = vadd.f32 %v2494_v13, %v2476_v1 }
 0x989   : > { %v2555_v35 = vadd.f32 %v2547_v56, %v4606_v33  ;;  %v2532_v33 = vpop.f32.mrf.mxu0 }
 0x98a   : > { %v2511_v61 = vpop.f32.mrf.mxu3 }
 0x98b   : > { %v2512_v22 = vadd.f32 %v2511_v61, %v2493_v12  ;;  %v2561_v5 = vsel %vm557_vm1, %v2555_v35, 0.0  ;;  %v2549_v48 = vpop.f32.mrf.mxu2 }
 0x98c   : > { %2562 = vadd.xlane.f32.xlu2 %v2561_v5 }
 0x98d   : > { %v2531_v63 = vadd.f32 %v2530_v44, %v2512_v22 }
 0x98f   : > { %v2550_v15 = vadd.f32 %v2549_v48, %v2531_v63 }
 0x991   : > { %v2556_v16 = vadd.f32 %v2550_v15, %v4651_v41 }
 0x992   : > { %v2513_v62 = vpop.f32.mrf.mxu3 }
 0x993   : > { %v2514_v6 = vadd.f32 %v2513_v62, %v2495_v49  ;;  %v2564_v24 = vsel %vm557_vm1, %v2556_v16, 0.0  ;;  %v2551_v23 = vpop.f32.mrf.mxu2 }
 0x994   : > { %2565 = vadd.xlane.f32.xlu1 %v2564_v24 }
 0x995   : > { %v2533_v25 = vadd.f32 %v2532_v33, %v2514_v6 }
 0x997   : > { %v2552_v7 = vadd.f32 %v2551_v23, %v2533_v25 }
 0x999   : > { %v2557_v36 = vadd.f32 %v2552_v7, %v4654_v42 }
 0x99b   : > { %v2567_v0 = vsel %vm557_vm1, %v2557_v36, 0.0 }
 0x99c   : > { %2568 = vadd.xlane.f32.xlu0 %v2567_v0 }
 0x9f7   : > { %v2560_v19 = vpop.xlane.xlu0 %2559 }
 0x9f8   : > { %v2570_v21 = vmul.f32 %v2560_v19, %v4548_v26 }
 0x9fa   : > { %v2574_v17 = vsub.f32 %v2554_v59, %v2570_v21 }
 0x9fc   : > { %v2578_v58 = vmul.f32 %v2574_v17, %v2574_v17 }
 0x9fe   : > { %v2582_v41 = vsel %vm557_vm1, %v2578_v58, 0.0 }
 0x9ff   : > { %v2563_v60 = vpop.xlane.xlu2 %2562  ;;  %2583 = vadd.xlane.f32.xlu2 %v2582_v41 }
 0xa00   : > { %v2571_v9 = vmul.f32 %v2563_v60, %v4548_v26 }
 0xa02   : > { %v2575_v28 = vsub.f32 %v2555_v35, %v2571_v9  ;;  %v539_v35 = vld [vmem:[%s4229_s23 + $0x6] ss:$0 sm:$0xff] }
 0xa04   : > { %v2579_v18 = vmul.f32 %v2575_v28, %v2575_v28 }
 0xa06   : > { %v2585_v29 = vsel %vm557_vm1, %v2579_v18, 0.0 }
 0xa07   : > { %v2566_v32 = vpop.xlane.xlu1 %2565  ;;  %2586 = vadd.xlane.f32.xlu1 %v2585_v29 }
 0xa08   : > { %v2572_v42 = vmul.f32 %v2566_v32, %v4548_v26 }
 0xa0a   : > { %v4878_v38 = vsub.f32 %v2556_v16, %v2572_v42 }
 0xa0c   : > { %v2580_v40 = vmul.f32 %v4878_v38, %v4878_v38 }
 0xa0e   : > { %v2588_v39 = vsel %vm557_vm1, %v2580_v40, 0.0 }
 0xa0f   : > { %2589 = vadd.xlane.f32.xlu0 %v2588_v39  ;;  %v2569_v8 = vpop.xlane.xlu0 %2568 }
 0xa10   : > { %v2573_v30 = vmul.f32 %v2569_v8, %v4548_v26 }
 0xa12   : > { %v4884_v47 = vsub.f32 %v2557_v36, %v2573_v30 }
 0xa14   : > { %v2581_v50 = vmul.f32 %v4884_v47, %v4884_v47 }
 0xa16   : > { %v2591_v31 = vsel %vm557_vm1, %v2581_v50, 0.0 }
 0xa17   : > { %2592 = vadd.xlane.f32.xlu2 %v2591_v31 }
 0xa72   : > { %v2584_v53 = vpop.xlane.xlu2 %2583 }
 0xa73   : > { %v2594_v54 = vmul.f32 %v2584_v53, %v4548_v26 }
 0xa75   : > { %v2598_v37 = vadd.f32 1e-05, %v2594_v54 }
 0xa77   : > { %3634 = vrsqrt.f32 %v2598_v37  ;;  %vm2608_vm4 = vweird.f32 %v2598_v37 }
 0xa7a   : > { %v2587_v57 = vpop.xlane.xlu1 %2586 }
 0xa7b   : > { %v2595_v43 = vmul.f32 %v2587_v57, %v4548_v26 }
 0xa7d   : > { %v3635_v34 = vpop.eup %3634  ;;  %v2599_v2 = vadd.f32 1e-05, %v2595_v43 }
 0xa7e   : > { %v2603_v59 = vmul.f32 %v3635_v34, %v2598_v37  ;;  %vm2609_vm3 = vweird.f32 %v3635_v34 }
 0xa7f   : > { %3636 = vrsqrt.f32 %v2599_v2  ;;  %vm2610_vm5 = vmor %vm2608_vm4, %vm2609_vm3  ;;  %vm2618_vm7 = vweird.f32 %v2599_v2 }
 0xa80   : > { %v2604_v55 = vmul.f32 %v3635_v34, %v2603_v59 }
 0xa82   : > { %v2605_v51 = vmul.f32 0.5, %v2604_v55  ;;  %v2590_v46 = vpop.xlane.xlu0 %2589 }
 0xa83   : > { %v2596_v3 = vmul.f32 %v2590_v46, %v4548_v26 }
 0xa84   : > { %v2606_v20 = vsub.f32 1.5, %v2605_v51 }
 0xa85   : > { %v3637_v14 = vpop.eup %3636  ;;  %v2600_v4 = vadd.f32 1e-05, %v2596_v3 }
 0xa86   : > { %v2607_v10 = vmul.f32 %v3635_v34, %v2606_v20  ;;  %v2613_v11 = vmul.f32 %v3637_v14, %v2599_v2  ;;  %vm2619_vm6 = vweird.f32 %v3637_v14 }
 0xa87   : > { %3638 = vrsqrt.f32 %v2600_v4  ;;  %vm2620_vm8 = vmor %vm2618_vm7, %vm2619_vm6  ;;  %vm2628_vm10 = vweird.f32 %v2600_v4 }
 0xa88   : > { %v2611_v52 = vsel %vm2610_vm5, %v3635_v34, %v2607_v10  ;;  %v2614_v56 = vmul.f32 %v3637_v14, %v2613_v11 }
 0xa89   : > { %v2642_v12 = vmul.f32 %v2611_v52, %v2574_v17 }
 0xa8a   : > { %v2615_v44 = vmul.f32 0.5, %v2614_v56  ;;  %v2593_v61 = vpop.xlane.xlu2 %2592 }
 0xa8b   : > { %v2646_v27 = vmul.f32 %v2642_v12, %v538_v45  ;;  %v2597_v22 = vmul.f32 %v2593_v61, %v4548_v26 }
 0xa8c   : > { %v2616_v5 = vsub.f32 1.5, %v2615_v44 }
 0xa8d   : > { %v3639_v48 = vpop.eup %3638  ;;  %v2650_v63 = vadd.f32 %v2646_v27, %v539_v35  ;;  %v2601_v13 = vadd.f32 1e-05, %v2597_v22 }
 0xa8e   : > { %v2617_v1 = vmul.f32 %v3637_v14, %v2616_v5  ;;  %v2623_v15 = vmul.f32 %v3639_v48, %v2600_v4  ;;  %vm2629_vm9 = vweird.f32 %v3639_v48 }
 0xa8f   : > { %2654 = vst.msk [vmem:[#allocation2] sm:$0xff] %vm557_vm1, %v2650_v63  ;;  %3640 = vrsqrt.f32 %v2601_v13  ;;  %vm2630_vm11 = vmor %vm2628_vm10, %vm2629_vm9  ;;  %vm2638_vm13 = vweird.f32 %v2601_v13 }
 0xa90   : > { %v2621_v49 = vsel %vm2620_vm8, %v3637_v14, %v2617_v1  ;;  %v2624_v16 = vmul.f32 %v3639_v48, %v2623_v15 }
 0xa91   : > { %v2643_v62 = vmul.f32 %v2621_v49, %v2575_v28 }
 0xa92   : > { %v2625_v6 = vmul.f32 0.5, %v2624_v16 }
 0xa93   : > { %v2647_v24 = vmul.f32 %v2643_v62, %v538_v45 }
 0xa94   : > { %v2626_v33 = vsub.f32 1.5, %v2625_v6 }
 0xa95   : > { %v3641_v25 = vpop.eup %3640  ;;  %v2651_v23 = vadd.f32 %v2647_v24, %v539_v35 }
 0xa96   : > { %v2627_v7 = vmul.f32 %v3639_v48, %v2626_v33  ;;  %v2633_v36 = vmul.f32 %v3641_v25, %v2601_v13  ;;  %vm2639_vm12 = vweird.f32 %v3641_v25 }
 0xa97   : > { %2655 = vst.msk [vmem:[#allocation2 + $0x8] sm:$0xff] %vm557_vm1, %v2651_v23  ;;  %vm2640_vm14 = vmor %vm2638_vm13, %vm2639_vm12 }
 0xa98   : > { %v2631_v0 = vsel %vm2630_vm11, %v3639_v48, %v2627_v7  ;;  %v2634_v19 = vmul.f32 %v3641_v25, %v2633_v36 }
 0xa99   : > { %v2644_v21 = vmul.f32 %v2631_v0, %v4878_v38 }
 0xa9a   : > { %v2635_v17 = vmul.f32 0.5, %v2634_v19 }
 0xa9b   : > { %v2648_v58 = vmul.f32 %v2644_v21, %v538_v45 }
 0xa9c   : > { %v2636_v41 = vsub.f32 1.5, %v2635_v17 }
 0xa9d   : > { %v2652_v60 = vadd.f32 %v2648_v58, %v539_v35 }
 0xa9e   : > { %v2637_v9 = vmul.f32 %v3641_v25, %v2636_v41 }
 0xa9f   : > { %2656 = vst.msk [vmem:[#allocation2 + $0x10] sm:$0xff] %vm557_vm1, %v2652_v60 }
 0xaa0   : > { %v2641_v28 = vsel %vm2640_vm14, %v3641_v25, %v2637_v9 }
 0xaa1   : > { %v2645_v18 = vmul.f32 %v2641_v28, %v4884_v47 }
 0xaa3   : > { %v2649_v29 = vmul.f32 %v2645_v18, %v538_v45  ;;  %2661 = sbr.rel (%p3297_p1) target bundleno = 3133 (0xc3d), region = 88 }
 0xaa5   : > { %v2653_v32 = vadd.f32 %v2649_v29, %v539_v35 }
 0xaa7   : > { %2657 = vst.msk [vmem:[#allocation2 + $0x18] sm:$0xff] %vm557_vm1, %v2653_v32 }
 0xaa8   : > { %v2662_v42 = vld [vmem:[#allocation2] sm:$0xff]  ;;  %v2664_v38 = vld [vmem:[#allocation2 + $0x10] sm:$0xff]  ;;  %v2663_v8 = vld [vmem:[#allocation2 + $0x8] sm:$0xff] }
 0xaa9   : > { %v2666_v40 = vsel %vm557_vm1, %v2662_v42, 0.0  ;;  %v2672_v39 = vsel %vm557_vm1, %v2664_v38, 0.0  ;;  %v2669_v50 = vsel %vm557_vm1, %v2663_v8, 0.0  ;;  %v2685_v31 = vld [vmem:[#allocation14 + $0x18] sm:$0xff]  ;;  %v2684_v53 = vld [vmem:[#allocation14 + $0x10] sm:$0xff]  ;;  %v2683_v54 = vld [vmem:[#allocation14 + $0x8] sm:$0xff] }
 0xaaa   : > { %2667 = vadd.xlane.f32.xlu0 %v2666_v40  ;;  %2673 = vadd.xlane.f32.xlu1 %v2672_v39  ;;  %v2682_v37 = vld [vmem:[#allocation14] sm:$0xff] }
 0xaab   : > { %2734 = vmatpush.msra.mxu0 %v2685_v31  ;;  %v2686_v20 = vld [vmem:[%s4981_s10] sm:$0x1] }
 0xaad   : > { %2735 = vmatpush.msra.mxu0 %v2684_v53 }
 0xaae   : > { %v2665_v30 = vld [vmem:[#allocation2 + $0x18] sm:$0xff] }
 0xaaf   : > { %v2675_v47 = vsel %vm557_vm1, %v2665_v30, 0.0  ;;  %2736 = vmatpush.msra.mxu0 %v2683_v54 }
 0xab1   : > { %2737 = vmatpush.msra.mxu0 %v2682_v37 }
 0xab2   : > { %2670 = vadd.xlane.f32.xlu0 %v2669_v50  ;;  %2676 = vadd.xlane.f32.xlu1 %v2675_v47 }
 0xb1d   : > { %v2668_v57 = vpop.xlane.xlu0 %2667  ;;  %v2674_v59 = vpop.xlane.xlu1 %2673 }
 0xb1e   : > { %v2678_v43 = vmul.f32 %v2668_v57, %v4548_v26  ;;  %v2680_v55 = vmul.f32 %v2674_v59, %v4548_v26 }
 0xb20   : > { %2687 = vxpose.xlu2.b32.start [1/4] (short) (narrow) %v2678_v43, 8 }
 0xb25   : > { %v2671_v34 = vpop.xlane.xlu0 %2670  ;;  %v2677_v51 = vpop.xlane.xlu1 %2676 }
 0xb26   : > { %v2679_v2 = vmul.f32 %v2671_v34, %v4548_v26  ;;  %v2681_v46 = vmul.f32 %v2677_v51, %v4548_v26 }
 0xb28   : > { %2688 = vxpose.xlu2.b32.cont [2/4] (short) (narrow) %v2679_v2, 8 }
 0xb30   : > { %2689 = vxpose.xlu2.b32.cont [3/4] (short) (narrow) %v2680_v55, 8 }
 0xb38   : > { %2690 = vxpose.xlu2.b32.end [4/4] (short) (narrow) %v2681_v46, 8 }
 0xbb9   : > { %v2703_v3 = vpop.trf.xlu2 }
 0xbba   : > { %3298 = vmatmul.msk.f32.vlgmr.msra.gmra.mxu0 %vm557_vm1, %v2703_v3 }
 0xc37   : > { %v2739_v14 = vpop.f32.mrf.mxu0 }
 0xc38   : > { %v2740_v4 = vadd.f32 %v2739_v14, %v2686_v20 }
 0xc3a   : > { %v2742_v10 = vperm.slane %v2740_v4, 0 }
 0xc3c   : > { %2743 = vst [vmem:[#allocation15] sm:$0xff] %v2742_v10 }
 0xc3d PF: > { %s4982_s27 = sld [smem:[#allocation24_spill]]  ;;  %s3958_s11 = smov [#allocation15]  }
 0xc3e   : > { %s2750_s22 = sshll.u32 %s3958_s11, 4  ;;  %s4983_s19 = sld [smem:[#allocation32_spill]]  ;;  %s2751_s22 = int_to_ptr.vmem [resolvable:$true] %s2750_s22 }
 0xc43   : > { %p3432_p4 = scmp.eq.s32.totalorder %s4982_s27, 1 }
 0xc44   : > { %s2752_s8 = sshll.u32 %s4983_s19, 4  ;;  %s2753_s8 = int_to_ptr.hbm [resolvable:$true] %s2752_s8 }
 0xc45   : > { %3401 = dma.vmem_to_hbm [thread:$0]  (%p3432_p4), %s2751_s22, 128, %s2753_s8, [#allocation5]  }
 0xc46   : > { %3917 = dma.done.wait (%p3432_p4), [#allocation5], 128  }
 0xc47   : > { %3919 = vsyncadd (%p3432_p4), [#allocation5], 4294967168 }
 0xc48 PF: > { %s4984_s30 = sld [smem:[#allocation26_spill]] }
 0xc49   : > { %s4985_s27 = sld [smem:[#allocation22_spill]] }
 0xc4a   : > { %s4986_s28 = sld [smem:[#allocation23_spill]] }
 0xc4b   : > { %s4987_s29 = sld [smem:[#allocation27_spill]] }
 0xc4e   : > { %p26_p5 = scmp.ge.s32.totalorder %s4984_s30, 4  }
 0xc50   :  { %28 = sbr.rel (!%p26_p5) target bundleno = 15 (0xf), region = 155 }
 0xc55   :  { %2766 = vsyncpa [#allocation4], 1 }
 0xc56   :  { %2768 = vsyncpa [#allocation4 + $0x1], 1 }
 0xc57   :  { %2769 = vsyncpa [#allocation7], 1 }
 0xc58   :  { %2771 = vsyncpa [#allocation7 + $0x1], 1 }
 0xc59   :  { %2772 = vsyncpa [#allocation10], 1 }
 0xc5a   :  { %2774 = vsyncpa [#allocation10 + $0x1], 1 }
 0xc5b   :  { %2775 = vsyncpa [#allocation13], 1 }
 0xc5c   :  { %2777 = vsyncpa [#allocation13 + $0x1], 1 }
 0xc5d   :  { %2778 = vsyncpa [#allocation5], 1 }
 0xc5e   :  { %2780 = vsyncpa [#allocation5 + $0x1], 1 }

</bundles_post_ra>
